<compile_context>
chip_gen: v7x
topology: tpu7x:2x2x1
jax: 0.10.0
libtpu: 0.0.40
codegen_flags: <defaults>
</compile_context>

<pallas_src>
import functools

import jax
import jax.numpy as jnp
from jax.experimental import pallas as pl
from jax.experimental.pallas import tpu as pltpu

LANE = 128        # lane (last-dim) alignment
SUBLANE = 8       # sublane (second-minor) alignment

L1_CHAN, L2_CHAN, HIDDEN = 100, 100, 500
KSIZE = 5
CONV_PAD = (0, 4)            # (pad_h, pad_w) as in the PyTorch module
EPS = 1e-5

# Actual per-step footprint is ~3 MiB; 32 MiB keeps headroom and is safe on
# v5e/v6e (128 MiB physical VMEM) and v7x (64 MiB physical VMEM).
VMEM_LIMIT = 32 * 1024 * 1024


def _round_up(v, m):
    return (v + m - 1) // m * m


def _pad_to(x, shape):
    pads = [(0, t - s) for s, t in zip(x.shape, shape)]
    if all(p == (0, 0) for p in pads):
        return x
    return jnp.pad(x, pads)


# ---------------------------------------------------------------------------
# Geometry helpers (shared by param prep and forward so layouts always match)
# ---------------------------------------------------------------------------

def _conv_layout(ho, wo):
    """Pooled-output layout for one conv layer: #grid h-blocks, pooled rows per
    block, pooled width, sublane-padded rows-per-block."""
    hop, wop = ho // 2, wo // 2                      # MaxPool2d(2,2) floors
    n_blk = 2 if (hop >= 2 and hop % 2 == 0) else 1  # extra parallel steps (v7x)
    hop_b = hop // n_blk
    pp = _round_up(hop_b * wop, SUBLANE)
    return n_blk, hop_b, wop, pp


def _layer_geometry(img_size):
    ph, pw = CONV_PAD
    h, w = img_size
    ho1 = h + 2 * ph - (KSIZE - 1)
    wo1 = w + 2 * pw - (KSIZE - 1)
    nb1, hb1, wop1, pp1 = _conv_layout(ho1, wo1)
    hi2, wi2 = ho1 // 2, wo1 // 2
    ho2 = hi2 + 2 * ph - (KSIZE - 1)
    wo2 = wi2 + 2 * pw - (KSIZE - 1)
    nb2, hb2, wop2, pp2 = _conv_layout(ho2, wo2)
    return dict(ho1=ho1, wo1=wo1, nb1=nb1, hb1=hb1, wop1=wop1, pp1=pp1,
                hi2=hi2, wi2=wi2,
                ho2=ho2, wo2=wo2, nb2=nb2, hb2=hb2, wop2=wop2, pp2=pp2,
                hop2=ho2 // 2)


def fc1_in_features(img_size):
    g = _layer_geometry(img_size)
    return g["hop2"] * g["wop2"] * L2_CHAN


# ---------------------------------------------------------------------------
# im2col builders (XLA glue; all MACs stay inside the Pallas kernels)
# ---------------------------------------------------------------------------

def _quadrant_reorder(p, n_blk, pp):
    """(N, Ho, Wo, K) conv-output-ordered patches -> (N, n_blk, 4*pp, K) where
    rows are grouped into 4 contiguous pooling 'quadrants' (dh, dw) of pp rows
    each, so MaxPool2d(2,2) inside the kernel is 3 elementwise maxes over
    static, sublane-aligned slices of the single big matmul result."""
    n, ho, wo, k = p.shape
    hop, wop = ho // 2, wo // 2
    p = p[:, :hop * 2, :wop * 2]                     # floor-mode pool drop
    hop_b = hop // n_blk
    p = p.reshape(n, n_blk, hop_b, 2, wop, 2, k)
    p = jnp.transpose(p, (0, 1, 3, 5, 2, 4, 6))      # (N, blk, dh, dw, h', w', K)
    p = p.reshape(n, n_blk, 4, hop_b * wop, k)
    p = _pad_to(p, (n, n_blk, 4, pp, k))
    return p.reshape(n, n_blk, 4 * pp, k)


def _build_conv1_lhs(xpad, ho, wo, n_blk, pp):
    """Layer-1 im2col: Cin == 1, so the 25 taps ARE the contraction axis
    (padded 25 -> 128 lanes); the input is never padded 1 -> 128 channels."""
    taps = [xpad[:, kh:kh + ho, kw:kw + wo]
            for kh in range(KSIZE) for kw in range(KSIZE)]
    p = jnp.stack(taps, axis=-1)                     # (N, Ho, Wo, 25)
    p = _pad_to(p, (*p.shape[:3], _round_up(KSIZE * KSIZE, LANE)))
    return _quadrant_reorder(p, n_blk, pp).astype(jnp.bfloat16)


def _build_conv2_lhs(xpad, ho, wo, n_blk, pp):
    """Layer-2 im2col: K = 25 taps x 128 (lane-padded) channels = 3200, so one
    MXU dot per image with K >> 256 (full array width on v6e/v7x)."""
    taps = [xpad[:, kh:kh + ho, kw:kw + wo, :]
            for kh in range(KSIZE) for kw in range(KSIZE)]
    p = jnp.stack(taps, axis=3)                      # (N, Ho, Wo, 25, C)
    p = p.reshape(*p.shape[:3], -1)                  # (N, Ho, Wo, 25*C)
    return _quadrant_reorder(p, n_blk, pp).astype(jnp.bfloat16)


# ---------------------------------------------------------------------------
# Kernel 1: fused Conv2d + bias + ReLU + MaxPool2d(2,2) + eval-mode BatchNorm
# ---------------------------------------------------------------------------

def _conv_pool_bn_kernel(lhs_ref, w_ref, b_ref, sc_ref, sh_ref, o_ref, *, pp):
    """One grid step = one large-M bf16 MXU dot with f32 accumulation, then
    MaxPool(2,2) as 3 maxes over static sublane-aligned slices (LHS rows were
    pre-grouped into 4 pooling quadrants), then bias + ReLU + folded BN in f32
    (v5e-safe epilogue), and a single lane/sublane-dense store."""
    acc = jnp.dot(lhs_ref[0, 0], w_ref[...], preferred_element_type=jnp.float32)
    m = jnp.maximum(jnp.maximum(acc[0 * pp:1 * pp], acc[1 * pp:2 * pp]),
                    jnp.maximum(acc[2 * pp:3 * pp], acc[3 * pp:4 * pp]))
    # bias / scale / shift read exactly once per step (no per-row loop).
    r = jnp.maximum(m + b_ref[...], 0.0) * sc_ref[...] + sh_ref[...]
    o_ref[0, 0] = r.astype(o_ref.dtype)


def conv_relu_pool_bn(lhs, w, b, scale, shift, *, pp):
    n, n_blk, rows, k = lhs.shape
    c = w.shape[1]
    assert rows == 4 * pp and w.shape[0] == k
    kernel = functools.partial(_conv_pool_bn_kernel, pp=pp)
    return pl.pallas_call(
        kernel,
        out_shape=jax.ShapeDtypeStruct((n, n_blk, pp, c), jnp.bfloat16),
        grid=(n, n_blk),
        in_specs=[
            pl.BlockSpec((1, 1, rows, k), lambda i, j: (i, j, 0, 0)),
            pl.BlockSpec((k, c), lambda i, j: (0, 0)),
            pl.BlockSpec((1, c), lambda i, j: (0, 0)),
            pl.BlockSpec((1, c), lambda i, j: (0, 0)),
            pl.BlockSpec((1, c), lambda i, j: (0, 0)),
        ],
        out_specs=pl.BlockSpec((1, 1, pp, c), lambda i, j: (i, j, 0, 0)),
        compiler_params=pltpu.CompilerParams(
            dimension_semantics=("parallel", "parallel"),
            vmem_limit_bytes=VMEM_LIMIT),
    )(lhs, w, b, scale, shift)


# ---------------------------------------------------------------------------
# Kernel 2: fused fc1 + fc2 (hidden activation never leaves VMEM)
# ---------------------------------------------------------------------------

def _fc_fused_kernel(x_ref, w1_ref, b1_ref, w2_ref, b2_ref, o_ref):
    """Single-step fused Linear->Linear (no K grid, no accumulator scratch):
    both weights fit in VMEM on every TPU generation at these sizes."""
    h = jnp.dot(x_ref[...], w1_ref[...],
                preferred_element_type=jnp.float32) + b1_ref[...]
    h = h.astype(jnp.bfloat16)                       # MXU operand for fc2
    o_ref[...] = (jnp.dot(h, w2_ref[...],
                          preferred_element_type=jnp.float32)
                  + b2_ref[...]).astype(o_ref.dtype)


def fc1_fc2(x, w1, b1, w2, b2, out_dtype=jnp.float32):
    m, k1 = x.shape
    hid = w1.shape[1]
    nout = w2.shape[1]
    assert w1.shape[0] == k1 and w2.shape[0] == hid
    tm = min(_round_up(m, SUBLANE), 256)             # keep MXU rows occupied if
    mp = _round_up(m, tm)                            # the batch ever grows
    xp = _pad_to(x.astype(jnp.bfloat16), (mp, k1))
    out = pl.pallas_call(
        _fc_fused_kernel,
        out_shape=jax.ShapeDtypeStruct((mp, nout), out_dtype),
        grid=(mp // tm,),
        in_specs=[
            pl.BlockSpec((tm, k1), lambda i: (i, 0)),
            pl.BlockSpec((k1, hid), lambda i: (0, 0)),
            pl.BlockSpec((1, hid), lambda i: (0, 0)),
            pl.BlockSpec((hid, nout), lambda i: (0, 0)),
            pl.BlockSpec((1, nout), lambda i: (0, 0)),
        ],
        out_specs=pl.BlockSpec((tm, nout), lambda i: (i, 0)),
        compiler_params=pltpu.CompilerParams(
            dimension_semantics=("parallel",),
            vmem_limit_bytes=VMEM_LIMIT),
    )(xp, w1, b1, w2, b2)
    return out[:m]


# --------------------------- Parameters / layouts ---------------------------

def init_params(key, img_size, out_size):
    """Raw parameters in PyTorch-equivalent layouts (eval-mode BN folded to
    per-channel scale/shift)."""
    fc1_in = fc1_in_features(img_size)
    ks = jax.random.split(key, 16)

    def u(k, shape, fan_in):
        bound = 1.0 / (fan_in ** 0.5)
        return jax.random.uniform(k, shape, jnp.float32, -bound, bound)

    def bn(kg, kb, km, kv, c):
        gamma = jax.random.uniform(kg, (c,), jnp.float32, 0.5, 1.5)
        beta = 0.1 * jax.random.normal(kb, (c,), jnp.float32)
        mean = 0.1 * jax.random.normal(km, (c,), jnp.float32)
        var = jax.random.uniform(kv, (c,), jnp.float32, 0.5, 1.5)
        scale = gamma / jnp.sqrt(var + EPS)
        shift = beta - mean * scale
        return scale, shift

    bn1_scale, bn1_shift = bn(ks[4], ks[5], ks[6], ks[7], L1_CHAN)
    bn2_scale, bn2_shift = bn(ks[8], ks[9], ks[10], ks[11], L2_CHAN)
    return {
        "w1": u(ks[0], (L1_CHAN, 1, KSIZE, KSIZE), 1 * KSIZE * KSIZE),
        "b1": u(ks[1], (L1_CHAN,), 1 * KSIZE * KSIZE),
        "w2": u(ks[2], (L2_CHAN, L1_CHAN, KSIZE, KSIZE), L1_CHAN * KSIZE * KSIZE),
        "b2": u(ks[3], (L2_CHAN,), L1_CHAN * KSIZE * KSIZE),
        "bn1_scale": bn1_scale, "bn1_shift": bn1_shift,
        "bn2_scale": bn2_scale, "bn2_shift": bn2_shift,
        "fc1_w": u(ks[12], (fc1_in, HIDDEN), fc1_in),
        "fc1_b": u(ks[13], (HIDDEN,), fc1_in),
        "fc2_w": u(ks[14], (HIDDEN, out_size), HIDDEN),
        "fc2_b": u(ks[15], (out_size,), HIDDEN),
    }


def _conv_weight(w_oihw, cin_pad, cout_pad, k_rows_pad=None):
    """(Cout, Cin, kh, kw) -> (kh*kw*cin_pad, cout_pad) bf16, K ordered
    (tap, cin) with cin minor — exactly the im2col feature order."""
    cout, cin, kh, kw = w_oihw.shape
    w = jnp.transpose(w_oihw, (2, 3, 1, 0))          # (kh, kw, cin, cout)
    w = _pad_to(w, (kh, kw, cin_pad, cout_pad))
    w = w.reshape(kh * kw * cin_pad, cout_pad)
    if k_rows_pad is not None:
        w = _pad_to(w, (k_rows_pad, cout_pad))
    return w.astype(jnp.bfloat16)


def _pad_row_f32(v, n_pad):
    return _pad_to(v.reshape(1, -1), (1, n_pad)).astype(jnp.float32)


def prepare_params(raw, img_size, out_size):
    """One-time layout hoisting: conv weights as tap-packed K matrices, fc
    weights bf16 padded to 128-multiples, fc1 rows remapped from PyTorch's
    (C,H,W)-flatten order to the conv-2 kernel's (blk, pooled-row, C_pad)
    output flatten order (including its sublane row padding)."""
    g = _layer_geometry(img_size)
    c1p = _round_up(L1_CHAN, LANE)
    c2p = _round_up(L2_CHAN, LANE)
    hidp = _round_up(HIDDEN, LANE)
    outp = _round_up(out_size, LANE)
    k1p = _round_up(KSIZE * KSIZE, LANE)             # 25 taps -> 128

    nb2, hb2, wop2, pp2 = g["nb2"], g["hb2"], g["wop2"], g["pp2"]
    hop2 = g["hop2"]
    fc1_w = raw["fc1_w"].reshape(L2_CHAN, hop2, wop2, HIDDEN)
    fc1_w = jnp.pad(fc1_w, ((0, c2p - L2_CHAN), (0, 0), (0, 0), (0, 0)))
    fc1_w = fc1_w.reshape(c2p, nb2, hb2, wop2, HIDDEN)
    fc1_w = jnp.transpose(fc1_w, (1, 2, 3, 0, 4))    # (blk, h', w', c, hidden)
    fc1_w = fc1_w.reshape(nb2, hb2 * wop2, c2p, HIDDEN)
    fc1_w = jnp.pad(fc1_w, ((0, 0), (0, pp2 - hb2 * wop2), (0, 0), (0, 0)))
    fc1_w = fc1_w.reshape(nb2 * pp2 * c2p, HIDDEN)
    fc1_w = _pad_to(fc1_w, (fc1_w.shape[0], hidp)).astype(jnp.bfloat16)

    fc2_w = _pad_to(raw["fc2_w"], (hidp, outp)).astype(jnp.bfloat16)

    return {
        "w1": _conv_weight(raw["w1"], 1, c1p, k_rows_pad=k1p),   # (128, 128)
        "b1": _pad_row_f32(raw["b1"], c1p),
        "bn1_scale": _pad_row_f32(raw["bn1_scale"], c1p),
        "bn1_shift": _pad_row_f32(raw["bn1_shift"], c1p),
        "w2": _conv_weight(raw["w2"], c1p, c2p),                 # (3200, 128)
        "b2": _pad_row_f32(raw["b2"], c2p),
        "bn2_scale": _pad_row_f32(raw["bn2_scale"], c2p),
        "bn2_shift": _pad_row_f32(raw["bn2_shift"], c2p),
        "fc1_w": fc1_w, "fc1_b": _pad_row_f32(raw["fc1_b"], hidp),
        "fc2_w": fc2_w, "fc2_b": _pad_row_f32(raw["fc2_b"], outp),
    }


# --------------------------------- Forward ----------------------------------

def convnet_forward(params, x_nchw, out_size):
    n, _, h0, w0 = x_nchw.shape
    g = _layer_geometry((h0, w0))
    ph, pw = CONV_PAD
    c1p = _round_up(L1_CHAN, LANE)

    # -------- layer1: Conv2d(1,100,k=5,pad=(0,4)) + ReLU + MaxPool + BN -----
    x = x_nchw[:, 0]                                 # Cin == 1
    xpad = jnp.pad(x, ((0, 0), (ph, ph), (pw, pw)))
    lhs1 = _build_conv1_lhs(xpad, g["ho1"], g["wo1"], g["nb1"], g["pp1"])
    a1 = conv_relu_pool_bn(lhs1, params["w1"], params["b1"],
                           params["bn1_scale"], params["bn1_shift"],
                           pp=g["pp1"])
    # (N, nb1, pp1, C) -> (N, hop1, wop1, C): drop per-block row padding.
    a1 = a1[:, :, :g["hb1"] * g["wop1"], :].reshape(
        n, g["nb1"] * g["hb1"], g["wop1"], c1p)

    # drop_out_2d: identity in eval mode.
    # TODO(synk): train-mode Dropout2d (per-channel RNG masking) not implemented.

    # -------- layer2: Conv2d(100,100,k=5,pad=(0,4)) + ReLU + MaxPool + BN ---
    a1p = jnp.pad(a1, ((0, 0), (ph, ph), (pw, pw), (0, 0)))
    lhs2 = _build_conv2_lhs(a1p, g["ho2"], g["wo2"], g["nb2"], g["pp2"])
    a2 = conv_relu_pool_bn(lhs2, params["w2"], params["b2"],
                           params["bn2_scale"], params["bn2_shift"],
                           pp=g["pp2"])

    # -------- flatten + fc1 + fc2 (single fused kernel) ---------------------
    # drop_out: identity in eval mode.
    # fc1_w rows were remapped (and zero-padded) at init to exactly this
    # (blk, pooled-row, channel) flatten order, so padded/junk rows hit zeros.
    feat = a2.reshape(n, -1)
    out = fc1_fc2(feat, params["fc1_w"], params["fc1_b"],
                  params["fc2_w"], params["fc2_b"])
    return out[:, :out_size]


if __name__ == "__main__":
    img_size = (16, 16)   # conv1 (12,20) -> pool (6,10) -> conv2 (2,14) -> pool (1,7)
    out_size = 10
    batch = 2

    key = jax.random.PRNGKey(0)
    pkey, xkey = jax.random.split(key)
    raw_params = init_params(pkey, img_size, out_size)
    params = prepare_params(raw_params, img_size, out_size)
    x = jax.random.normal(xkey, (batch, 1, img_size[0], img_size[1]), jnp.float32)

    fwd = jax.jit(functools.partial(convnet_forward, out_size=out_size))
    out = jax.block_until_ready(fwd(params, x))
    assert out.shape == (batch, out_size), out.shape
    assert bool(jnp.all(jnp.isfinite(out)))
    print("KERNEL_OK")
</pallas_src>

<mosaic_0001>
module attributes {stable_mosaic.version = 11 : i64} {
  func.func @_conv_pool_bn_kernel(%arg0: i32, %arg1: i32, %arg2: memref<1x1x128x128xbf16, #tpu.memory_space<vmem>>, %arg3: memref<128x128xbf16, #tpu.memory_space<vmem>>, %arg4: memref<1x128xf32, #tpu.memory_space<vmem>>, %arg5: memref<1x128xf32, #tpu.memory_space<vmem>>, %arg6: memref<1x128xf32, #tpu.memory_space<vmem>>, %arg7: memref<1x1x32x128xbf16, #tpu.memory_space<vmem>>) attributes {dimension_semantics = [#tpu.dimension_semantics<parallel>, #tpu.dimension_semantics<parallel>], iteration_bounds = array<i64: 2, 2>, scalar_prefetch = 0 : i64, scratch_operands = 0 : i64, tpu.core_type = #tpu.core_type<tc>, window_params = [{transform_indices = @transform_0, window_bounds = array<i64: 1, 1, 128, 128>}, {pipeline_mode = #tpu.pipeline_mode<synchronous>, transform_indices = @transform_1, window_bounds = array<i64: 128, 128>}, {pipeline_mode = #tpu.pipeline_mode<synchronous>, transform_indices = @transform_2, window_bounds = array<i64: 1, 128>}, {pipeline_mode = #tpu.pipeline_mode<synchronous>, transform_indices = @transform_3, window_bounds = array<i64: 1, 128>}, {pipeline_mode = #tpu.pipeline_mode<synchronous>, transform_indices = @transform_4, window_bounds = array<i64: 1, 128>}, {transform_indices = @transform_5, window_bounds = array<i64: 1, 1, 32, 128>}]} {
    %c0 = arith.constant 0 : index
    %c0_0 = arith.constant 0 : index
    %c0_1 = arith.constant 0 : index
    %c0_2 = arith.constant 0 : index
    %0 = vector.load %arg2[%c0, %c0_0, %c0_1, %c0_2] : memref<1x1x128x128xbf16, #tpu.memory_space<vmem>>, vector<1x1x128x128xbf16>
    %1 = vector.shape_cast %0 : vector<1x1x128x128xbf16> to vector<128x128xbf16>
    %c0_3 = arith.constant 0 : index
    %c0_4 = arith.constant 0 : index
    %2 = vector.load %arg3[%c0_3, %c0_4] : memref<128x128xbf16, #tpu.memory_space<vmem>>, vector<128x128xbf16>
    %cst = arith.constant dense<0.000000e+00> : vector<128x128xf32>
    %3 = tpu.matmul %1, %2, %cst {dimension_numbers = #tpu.dot_dimension_numbers<[1], [0], [0], [1], [0, 0, 1, 1], [], []>} : vector<128x128xbf16>, vector<128x128xbf16>, vector<128x128xf32> -> vector<128x128xf32>
    %4 = vector.extract_strided_slice %3 {offsets = [0, 0], sizes = [32, 128], strides = [1, 1]} : vector<128x128xf32> to vector<32x128xf32>
    %5 = vector.extract_strided_slice %3 {offsets = [32, 0], sizes = [32, 128], strides = [1, 1]} : vector<128x128xf32> to vector<32x128xf32>
    %6 = arith.maximumf %4, %5 : vector<32x128xf32>
    %7 = vector.extract_strided_slice %3 {offsets = [64, 0], sizes = [32, 128], strides = [1, 1]} : vector<128x128xf32> to vector<32x128xf32>
    %8 = vector.extract_strided_slice %3 {offsets = [96, 0], sizes = [32, 128], strides = [1, 1]} : vector<128x128xf32> to vector<32x128xf32>
    %9 = arith.maximumf %7, %8 : vector<32x128xf32>
    %10 = arith.maximumf %6, %9 : vector<32x128xf32>
    %c0_5 = arith.constant 0 : index
    %c0_6 = arith.constant 0 : index
    %11 = vector.load %arg4[%c0_5, %c0_6] : memref<1x128xf32, #tpu.memory_space<vmem>>, vector<1x128xf32>
    %12 = vector.broadcast %11 : vector<1x128xf32> to vector<32x128xf32>
    %13 = arith.addf %10, %12 : vector<32x128xf32>
    %cst_7 = arith.constant 0.000000e+00 : f32
    %14 = vector.broadcast %cst_7 : f32 to vector<32x128xf32>
    %15 = arith.maximumf %13, %14 : vector<32x128xf32>
    %c0_8 = arith.constant 0 : index
    %c0_9 = arith.constant 0 : index
    %16 = vector.load %arg5[%c0_8, %c0_9] : memref<1x128xf32, #tpu.memory_space<vmem>>, vector<1x128xf32>
    %17 = vector.broadcast %16 : vector<1x128xf32> to vector<32x128xf32>
    %18 = arith.mulf %15, %17 : vector<32x128xf32>
    %c0_10 = arith.constant 0 : index
    %c0_11 = arith.constant 0 : index
    %19 = vector.load %arg6[%c0_10, %c0_11] : memref<1x128xf32, #tpu.memory_space<vmem>>, vector<1x128xf32>
    %20 = vector.broadcast %19 : vector<1x128xf32> to vector<32x128xf32>
    %21 = arith.addf %18, %20 : vector<32x128xf32>
    %22 = arith.truncf %21 : vector<32x128xf32> to vector<32x128xbf16>
    %c0_12 = arith.constant 0 : index
    %c0_13 = arith.constant 0 : index
    %c0_14 = arith.constant 0 : index
    %c0_15 = arith.constant 0 : index
    %23 = vector.load %arg7[%c0_12, %c0_13, %c0_14, %c0_15] : memref<1x1x32x128xbf16, #tpu.memory_space<vmem>>, vector<1x1x32x128xbf16>
    %24 = vector.shape_cast %23 : vector<1x1x32x128xbf16> to vector<32x128xbf16>
    %25 = vector.shape_cast %22 : vector<32x128xbf16> to vector<1x1x32x128xbf16>
    tpu.vector_store %arg7[%c0_12, %c0_13, %c0_14, %c0_15], %25 {strides = array<i32>} : memref<1x1x32x128xbf16, #tpu.memory_space<vmem>>, vector<1x1x32x128xbf16>,
    return
  }
  func.func @transform_0(%arg0: i32, %arg1: i32) -> (i32, i32, i32, i32) {
    %c0_i32 = arith.constant 0 : i32
    %c0_i32_0 = arith.constant 0 : i32
    %c0_i32_1 = arith.constant 0 : i32
    return %arg0, %arg1, %c0_i32, %c0_i32_0 : i32, i32, i32, i32
  }
  func.func @transform_1(%arg0: i32, %arg1: i32) -> (i32, i32) {
    %c0_i32 = arith.constant 0 : i32
    %c0_i32_0 = arith.constant 0 : i32
    %c0_i32_1 = arith.constant 0 : i32
    return %c0_i32, %c0_i32_0 : i32, i32
  }
  func.func @transform_2(%arg0: i32, %arg1: i32) -> (i32, i32) {
    %c0_i32 = arith.constant 0 : i32
    %c0_i32_0 = arith.constant 0 : i32
    %c0_i32_1 = arith.constant 0 : i32
    return %c0_i32, %c0_i32_0 : i32, i32
  }
  func.func @transform_3(%arg0: i32, %arg1: i32) -> (i32, i32) {
    %c0_i32 = arith.constant 0 : i32
    %c0_i32_0 = arith.constant 0 : i32
    %c0_i32_1 = arith.constant 0 : i32
    return %c0_i32, %c0_i32_0 : i32, i32
  }
  func.func @transform_4(%arg0: i32, %arg1: i32) -> (i32, i32) {
    %c0_i32 = arith.constant 0 : i32
    %c0_i32_0 = arith.constant 0 : i32
    %c0_i32_1 = arith.constant 0 : i32
    return %c0_i32, %c0_i32_0 : i32, i32
  }
  func.func @transform_5(%arg0: i32, %arg1: i32) -> (i32, i32, i32, i32) {
    %c0_i32 = arith.constant 0 : i32
    %c0_i32_0 = arith.constant 0 : i32
    %c0_i32_1 = arith.constant 0 : i32
    return %arg0, %arg1, %c0_i32, %c0_i32_0 : i32, i32, i32, i32
  }
}

module attributes {stable_mosaic.version = 11 : i64} {
  func.func @_conv_pool_bn_kernel(%arg0: i32, %arg1: i32, %arg2: memref<1x1x32x3200xbf16, #tpu.memory_space<vmem>>, %arg3: memref<3200x128xbf16, #tpu.memory_space<vmem>>, %arg4: memref<1x128xf32, #tpu.memory_space<vmem>>, %arg5: memref<1x128xf32, #tpu.memory_space<vmem>>, %arg6: memref<1x128xf32, #tpu.memory_space<vmem>>, %arg7: memref<1x1x8x128xbf16, #tpu.memory_space<vmem>>) attributes {dimension_semantics = [#tpu.dimension_semantics<parallel>, #tpu.dimension_semantics<parallel>], iteration_bounds = array<i64: 2, 1>, scalar_prefetch = 0 : i64, scratch_operands = 0 : i64, tpu.core_type = #tpu.core_type<tc>, window_params = [{transform_indices = @transform_0, window_bounds = array<i64: 1, 1, 32, 3200>}, {pipeline_mode = #tpu.pipeline_mode<synchronous>, transform_indices = @transform_1, window_bounds = array<i64: 3200, 128>}, {pipeline_mode = #tpu.pipeline_mode<synchronous>, transform_indices = @transform_2, window_bounds = array<i64: 1, 128>}, {pipeline_mode = #tpu.pipeline_mode<synchronous>, transform_indices = @transform_3, window_bounds = array<i64: 1, 128>}, {pipeline_mode = #tpu.pipeline_mode<synchronous>, transform_indices = @transform_4, window_bounds = array<i64: 1, 128>}, {transform_indices = @transform_5, window_bounds = array<i64: 1, 1, 8, 128>}]} {
    %c0 = arith.constant 0 : index
    %c0_0 = arith.constant 0 : index
    %c0_1 = arith.constant 0 : index
    %c0_2 = arith.constant 0 : index
    %0 = vector.load %arg2[%c0, %c0_0, %c0_1, %c0_2] : memref<1x1x32x3200xbf16, #tpu.memory_space<vmem>>, vector<1x1x32x3200xbf16>
    %1 = vector.shape_cast %0 : vector<1x1x32x3200xbf16> to vector<32x3200xbf16>
    %c0_3 = arith.constant 0 : index
    %c0_4 = arith.constant 0 : index
    %2 = vector.load %arg3[%c0_3, %c0_4] : memref<3200x128xbf16, #tpu.memory_space<vmem>>, vector<3200x128xbf16>
    %cst = arith.constant dense<0.000000e+00> : vector<32x128xf32>
    %3 = tpu.matmul %1, %2, %cst {dimension_numbers = #tpu.dot_dimension_numbers<[1], [0], [0], [1], [0, 0, 1, 1], [], []>} : vector<32x3200xbf16>, vector<3200x128xbf16>, vector<32x128xf32> -> vector<32x128xf32>
    %4 = vector.extract_strided_slice %3 {offsets = [0, 0], sizes = [8, 128], strides = [1, 1]} : vector<32x128xf32> to vector<8x128xf32>
    %5 = vector.extract_strided_slice %3 {offsets = [8, 0], sizes = [8, 128], strides = [1, 1]} : vector<32x128xf32> to vector<8x128xf32>
    %6 = arith.maximumf %4, %5 : vector<8x128xf32>
    %7 = vector.extract_strided_slice %3 {offsets = [16, 0], sizes = [8, 128], strides = [1, 1]} : vector<32x128xf32> to vector<8x128xf32>
    %8 = vector.extract_strided_slice %3 {offsets = [24, 0], sizes = [8, 128], strides = [1, 1]} : vector<32x128xf32> to vector<8x128xf32>
    %9 = arith.maximumf %7, %8 : vector<8x128xf32>
    %10 = arith.maximumf %6, %9 : vector<8x128xf32>
    %c0_5 = arith.constant 0 : index
    %c0_6 = arith.constant 0 : index
    %11 = vector.load %arg4[%c0_5, %c0_6] : memref<1x128xf32, #tpu.memory_space<vmem>>, vector<1x128xf32>
    %12 = vector.broadcast %11 : vector<1x128xf32> to vector<8x128xf32>
    %13 = arith.addf %10, %12 : vector<8x128xf32>
    %cst_7 = arith.constant 0.000000e+00 : f32
    %14 = vector.broadcast %cst_7 : f32 to vector<8x128xf32>
    %15 = arith.maximumf %13, %14 : vector<8x128xf32>
    %c0_8 = arith.constant 0 : index
    %c0_9 = arith.constant 0 : index
    %16 = vector.load %arg5[%c0_8, %c0_9] : memref<1x128xf32, #tpu.memory_space<vmem>>, vector<1x128xf32>
    %17 = vector.broadcast %16 : vector<1x128xf32> to vector<8x128xf32>
    %18 = arith.mulf %15, %17 : vector<8x128xf32>
    %c0_10 = arith.constant 0 : index
    %c0_11 = arith.constant 0 : index
    %19 = vector.load %arg6[%c0_10, %c0_11] : memref<1x128xf32, #tpu.memory_space<vmem>>, vector<1x128xf32>
    %20 = vector.broadcast %19 : vector<1x128xf32> to vector<8x128xf32>
    %21 = arith.addf %18, %20 : vector<8x128xf32>
    %22 = arith.truncf %21 : vector<8x128xf32> to vector<8x128xbf16>
    %c0_12 = arith.constant 0 : index
    %c0_13 = arith.constant 0 : index
    %c0_14 = arith.constant 0 : index
    %c0_15 = arith.constant 0 : index
    %23 = vector.load %arg7[%c0_12, %c0_13, %c0_14, %c0_15] : memref<1x1x8x128xbf16, #tpu.memory_space<vmem>>, vector<1x1x8x128xbf16>
    %24 = vector.shape_cast %23 : vector<1x1x8x128xbf16> to vector<8x128xbf16>
    %25 = vector.shape_cast %22 : vector<8x128xbf16> to vector<1x1x8x128xbf16>
    tpu.vector_store %arg7[%c0_12, %c0_13, %c0_14, %c0_15], %25 {strides = array<i32>} : memref<1x1x8x128xbf16, #tpu.memory_space<vmem>>, vector<1x1x8x128xbf16>,
    return
  }
  func.func @transform_0(%arg0: i32, %arg1: i32) -> (i32, i32, i32, i32) {
    %c0_i32 = arith.constant 0 : i32
    %c0_i32_0 = arith.constant 0 : i32
    %c0_i32_1 = arith.constant 0 : i32
    return %arg0, %arg1, %c0_i32, %c0_i32_0 : i32, i32, i32, i32
  }
  func.func @transform_1(%arg0: i32, %arg1: i32) -> (i32, i32) {
    %c0_i32 = arith.constant 0 : i32
    %c0_i32_0 = arith.constant 0 : i32
    %c0_i32_1 = arith.constant 0 : i32
    return %c0_i32, %c0_i32_0 : i32, i32
  }
  func.func @transform_2(%arg0: i32, %arg1: i32) -> (i32, i32) {
    %c0_i32 = arith.constant 0 : i32
    %c0_i32_0 = arith.constant 0 : i32
    %c0_i32_1 = arith.constant 0 : i32
    return %c0_i32, %c0_i32_0 : i32, i32
  }
  func.func @transform_3(%arg0: i32, %arg1: i32) -> (i32, i32) {
    %c0_i32 = arith.constant 0 : i32
    %c0_i32_0 = arith.constant 0 : i32
    %c0_i32_1 = arith.constant 0 : i32
    return %c0_i32, %c0_i32_0 : i32, i32
  }
  func.func @transform_4(%arg0: i32, %arg1: i32) -> (i32, i32) {
    %c0_i32 = arith.constant 0 : i32
    %c0_i32_0 = arith.constant 0 : i32
    %c0_i32_1 = arith.constant 0 : i32
    return %c0_i32, %c0_i32_0 : i32, i32
  }
  func.func @transform_5(%arg0: i32, %arg1: i32) -> (i32, i32, i32, i32) {
    %c0_i32 = arith.constant 0 : i32
    %c0_i32_0 = arith.constant 0 : i32
    %c0_i32_1 = arith.constant 0 : i32
    return %arg0, %arg1, %c0_i32, %c0_i32_0 : i32, i32, i32, i32
  }
}

module attributes {stable_mosaic.version = 11 : i64} {
  func.func @_fc_fused_kernel(%arg0: i32, %arg1: memref<8x1024xbf16, #tpu.memory_space<vmem>>, %arg2: memref<1024x512xbf16, #tpu.memory_space<vmem>>, %arg3: memref<1x512xf32, #tpu.memory_space<vmem>>, %arg4: memref<512x128xbf16, #tpu.memory_space<vmem>>, %arg5: memref<1x128xf32, #tpu.memory_space<vmem>>, %arg6: memref<8x128xf32, #tpu.memory_space<vmem>>) attributes {dimension_semantics = [#tpu.dimension_semantics<parallel>], iteration_bounds = array<i64: 1>, scalar_prefetch = 0 : i64, scratch_operands = 0 : i64, tpu.core_type = #tpu.core_type<tc>, window_params = [{transform_indices = @transform_0, window_bounds = array<i64: 8, 1024>}, {pipeline_mode = #tpu.pipeline_mode<synchronous>, transform_indices = @transform_1, window_bounds = array<i64: 1024, 512>}, {pipeline_mode = #tpu.pipeline_mode<synchronous>, transform_indices = @transform_2, window_bounds = array<i64: 1, 512>}, {pipeline_mode = #tpu.pipeline_mode<synchronous>, transform_indices = @transform_3, window_bounds = array<i64: 512, 128>}, {pipeline_mode = #tpu.pipeline_mode<synchronous>, transform_indices = @transform_4, window_bounds = array<i64: 1, 128>}, {transform_indices = @transform_5, window_bounds = array<i64: 8, 128>}]} {
    %c0 = arith.constant 0 : index
    %c0_0 = arith.constant 0 : index
    %0 = vector.load %arg1[%c0, %c0_0] : memref<8x1024xbf16, #tpu.memory_space<vmem>>, vector<8x1024xbf16>
    %c0_1 = arith.constant 0 : index
    %c0_2 = arith.constant 0 : index
    %1 = vector.load %arg2[%c0_1, %c0_2] : memref<1024x512xbf16, #tpu.memory_space<vmem>>, vector<1024x512xbf16>
    %cst = arith.constant dense<0.000000e+00> : vector<8x512xf32>
    %2 = tpu.matmul %0, %1, %cst {dimension_numbers = #tpu.dot_dimension_numbers<[1], [0], [0], [1], [0, 0, 1, 1], [], []>} : vector<8x1024xbf16>, vector<1024x512xbf16>, vector<8x512xf32> -> vector<8x512xf32>
    %c0_3 = arith.constant 0 : index
    %c0_4 = arith.constant 0 : index
    %3 = vector.load %arg3[%c0_3, %c0_4] : memref<1x512xf32, #tpu.memory_space<vmem>>, vector<1x512xf32>
    %4 = vector.broadcast %3 : vector<1x512xf32> to vector<8x512xf32>
    %5 = arith.addf %2, %4 : vector<8x512xf32>
    %6 = arith.truncf %5 : vector<8x512xf32> to vector<8x512xbf16>
    %c0_5 = arith.constant 0 : index
    %c0_6 = arith.constant 0 : index
    %7 = vector.load %arg4[%c0_5, %c0_6] : memref<512x128xbf16, #tpu.memory_space<vmem>>, vector<512x128xbf16>
    %cst_7 = arith.constant dense<0.000000e+00> : vector<8x128xf32>
    %8 = tpu.matmul %6, %7, %cst_7 {dimension_numbers = #tpu.dot_dimension_numbers<[1], [0], [0], [1], [0, 0, 1, 1], [], []>} : vector<8x512xbf16>, vector<512x128xbf16>, vector<8x128xf32> -> vector<8x128xf32>
    %c0_8 = arith.constant 0 : index
    %c0_9 = arith.constant 0 : index
    %9 = vector.load %arg5[%c0_8, %c0_9] : memref<1x128xf32, #tpu.memory_space<vmem>>, vector<1x128xf32>
    %10 = vector.broadcast %9 : vector<1x128xf32> to vector<8x128xf32>
    %11 = arith.addf %8, %10 : vector<8x128xf32>
    %c0_10 = arith.constant 0 : index
    %c0_11 = arith.constant 0 : index
    %12 = vector.load %arg6[%c0_10, %c0_11] : memref<8x128xf32, #tpu.memory_space<vmem>>, vector<8x128xf32>
    tpu.vector_store %arg6[%c0_10, %c0_11], %11 {strides = array<i32>} : memref<8x128xf32, #tpu.memory_space<vmem>>, vector<8x128xf32>,
    return
  }
  func.func @transform_0(%arg0: i32) -> (i32, i32) {
    %c0_i32 = arith.constant 0 : i32
    %c0_i32_0 = arith.constant 0 : i32
    return %arg0, %c0_i32 : i32, i32
  }
  func.func @transform_1(%arg0: i32) -> (i32, i32) {
    %c0_i32 = arith.constant 0 : i32
    %c0_i32_0 = arith.constant 0 : i32
    %c0_i32_1 = arith.constant 0 : i32
    return %c0_i32, %c0_i32_0 : i32, i32
  }
  func.func @transform_2(%arg0: i32) -> (i32, i32) {
    %c0_i32 = arith.constant 0 : i32
    %c0_i32_0 = arith.constant 0 : i32
    %c0_i32_1 = arith.constant 0 : i32
    return %c0_i32, %c0_i32_0 : i32, i32
  }
  func.func @transform_3(%arg0: i32) -> (i32, i32) {
    %c0_i32 = arith.constant 0 : i32
    %c0_i32_0 = arith.constant 0 : i32
    %c0_i32_1 = arith.constant 0 : i32
    return %c0_i32, %c0_i32_0 : i32, i32
  }
  func.func @transform_4(%arg0: i32) -> (i32, i32) {
    %c0_i32 = arith.constant 0 : i32
    %c0_i32_0 = arith.constant 0 : i32
    %c0_i32_1 = arith.constant 0 : i32
    return %c0_i32, %c0_i32_0 : i32, i32
  }
  func.func @transform_5(%arg0: i32) -> (i32, i32) {
    %c0_i32 = arith.constant 0 : i32
    %c0_i32_0 = arith.constant 0 : i32
    return %arg0, %c0_i32 : i32, i32
  }
}

</mosaic_0001>

<bundles_post_ra>
// kernel: convnet_forward.3
= control target key start
LH: loop header
LB: loop body
LE: loop exit
PB: predicated region body
PF: predicated region fallthrough
CT: control target
= control target key end

     0   :  { %s892_s18 = smov 0   ;;  %s894_s19 = smov 0   ;;  %s994_s0 = inlined_call_operand.vmem [shape: bf16[2,2,128,128], index: 0, kind: input, shape index: {}]   ;;  %s995_s1 = inlined_call_operand.vmem [shape: bf16[128,128], index: 1, kind: input, shape index: {}]   ;;  %s996_s2 = inlined_call_operand.vmem [shape: f32[1,128], index: 2, kind: input, shape index: {}]   ;;  %s997_s3 = inlined_call_operand.vmem [shape: f32[1,128], index: 3, kind: input, shape index: {}]   ;;  %s998_s4 = inlined_call_operand.vmem [shape: f32[1,128], index: 4, kind: input, shape index: {}]   ;;  %s999_s5 = inlined_call_operand.vmem [shape: bf16[2,2,32,128], index: 5, kind: output, shape index: {}]  }
   0x1   :  { %s896_s20 = smov 0   ;;  %s898_s21 = smov 0  }
   0x2   :  { %s900_s22 = smov 0  }
   0x3 LB: > { %s24_s23 = sadd.s32 1, %s852_s20  ;;  %s27_s24 = sadd.s32 1, %s856_s21  ;;  %s860_s22 = sphi %s900_s22, %s15_s22   ;;  %s856_s21 = sphi %s898_s21, %s1003_s21   ;;  %s852_s20 = sphi %s896_s20, %s1002_s20   ;;  %s848_s19 = sphi %s894_s19, %s1001_s19   ;;  %s844_s18 = sphi %s892_s18, %s1000_s18  }
   0x4   : > { %p25_p0 = scmp.ge.s32.totalorder %s24_s23, 2  ;;  %p655_p1 = scmp.ge.s32.totalorder %s860_s22, 1 }
   0x5   : > { %p207_p2 = scmp.lt.s32.totalorder %s860_s22, 5 }
   0x6   : > { %s1005_s23 = smov (%p25_p0, %s24_s23), 0  ;;  %s1007_s24 = smov (!%p25_p0, %s27_s24), %s856_s21 }
   0x7   : > { %p208_p3 = pnand %p655_p1, %p207_p2  ;;  %p29_p4 = scmp.ge.s32.totalorder %s1007_s24, 2 }
   0x8   : > { %v806_v0 = vld [vmem:[%s995_s1] sm:$0xff] (!%p208_p3)   ;;  %p243_p5 = scmp.lt.s32.totalorder (!%p208_p3), %s848_s19, 1  ;;  %v807_v1 = vld [vmem:[%s995_s1 + $0x8] sm:$0xff] (!%p208_p3)   ;;  %p245_p6 = scmp.lt.s32.totalorder (!%p208_p3), %s844_s18, 1  ;;  %v808_v2 = vld [vmem:[%s995_s1 + $0x10] sm:$0xff] (!%p208_p3)  }
   0x9   : > { %s1009_s24 = smov (%p29_p4, %s1007_s24), 0  ;;  %211 = sbr.rel (%p208_p3) target bundleno = 281 (0x119), region = 40 }
   0xa   : > { %718 = vmatprep.subr.bf16.mxu0 (!%p208_p3), %v806_v0  ;;  %750 = vmatprep.subr.bf16.mxu1 (!%p208_p3), %v806_v0  ;;  %v809_v3 = vld [vmem:[%s995_s1 + $0x18] sm:$0xff] (!%p208_p3)   ;;  %v810_v6 = vld [vmem:[%s995_s1 + $0x20] sm:$0xff] (!%p208_p3)   ;;  %v811_v7 = vld [vmem:[%s995_s1 + $0x28] sm:$0xff] (!%p208_p3)  }
   0xb   : > { %719 = vmatpush3.bf16.msra.mxu0 (!%p208_p3), %v806_v0  ;;  %758 = vmatpush3.bf16.msra.mxu1 (!%p208_p3), %v806_v0  ;;  %v812_v8 = vld [vmem:[%s995_s1 + $0x30] sm:$0xff] (!%p208_p3)   ;;  %v813_v9 = vld [vmem:[%s995_s1 + $0x38] sm:$0xff] (!%p208_p3)   ;;  %v678_v30 = vld [vmem:[%s996_s2] ss:$0 sm:$0xff] (!%p208_p3) }
   0xc   : > { %720 = vmatprep.subr.bf16.mxu0 (!%p208_p3), %v807_v1  ;;  %751 = vmatprep.subr.bf16.mxu1 (!%p208_p3), %v807_v1  ;;  %v679_v45 = vld [vmem:[%s997_s3] ss:$0 sm:$0xff] (!%p208_p3) }
   0xd   : > { %v680_v54 = vld [vmem:[%s998_s4] ss:$0 sm:$0xff] (!%p208_p3) }
   0xf   : > { %721 = vmatpush3.bf16.msra.mxu0 (!%p208_p3), %v807_v1  ;;  %759 = vmatpush3.bf16.msra.mxu1 (!%p208_p3), %v807_v1 }
  0x10   : > { %s1011_s19 = smov (!%p243_p5, %s848_s19), 1  ;;  %s1013_s18 = smov (!%p245_p6, %s844_s18), 1  ;;  %722 = vmatprep.subr.bf16.mxu0 %v808_v2  ;;  %752 = vmatprep.subr.bf16.mxu1 %v808_v2 }
  0x11   : > { %s657_s6 = sshll.u32 %s1011_s19, 5  ;;  %s656_s7 = sshll.u32 %s1013_s18, 4 }
  0x12   : > { %s249_s8 = sadd.s32 %s657_s6, %s656_s7  ;;  %s659_s7 = sshll.u32 %s1013_s18, 2 }
  0x13   : > { %s658_s9 = sshll.u32 %s249_s8, 2  ;;  %723 = vmatpush3.bf16.msra.mxu0 %v808_v2  ;;  %760 = vmatpush3.bf16.msra.mxu1 %v808_v2  ;;  %s660_s8 = sshll.u32 %s1011_s19, 3 }
  0x14   : > { %s943_s14 = scalar_lea.vmem %s994_s0, %s658_s9  ;;  %724 = vmatprep.subr.bf16.mxu0 %v809_v3  ;;  %753 = vmatprep.subr.bf16.mxu1 %v809_v3  ;;  %s258_s11 = sadd.s32 %s660_s8, %s659_s7 }
  0x15   : > { %v814_v4 = vld [vmem:[%s943_s14] sm:$0xff]   ;;  %v816_v10 = vld [vmem:[%s943_s14 + $0x8] sm:$0xff]   ;;  %v818_v12 = vld [vmem:[%s943_s14 + $0x10] sm:$0xff]   ;;  %s661_s18 = sshll.u32 %s258_s11, 2 }
  0x16   : > { %v815_v5 = vld [vmem:[%s943_s14 + $0x20] sm:$0xff]   ;;  %734 = vmatprep.mubr.bf16.mxu0 %v814_v4  ;;  %v817_v11 = vld [vmem:[%s943_s14 + $0x28] sm:$0xff]   ;;  %v819_v13 = vld [vmem:[%s943_s14 + $0x30] sm:$0xff]   ;;  %s260_s15 = scalar_lea.vmem %s999_s5, %s661_s18 }
  0x17   : > { %742 = vmatprep.mubr.bf16.mxu1 %v815_v5  ;;  %725 = vmatpush3.bf16.msra.mxu0 %v809_v3  ;;  %v820_v14 = vld [vmem:[%s943_s14 + $0x18] sm:$0xff]  }
  0x18   : > { %761 = vmatpush3.bf16.msra.mxu1 %v809_v3  ;;  %726 = vmatprep.subr.bf16.mxu0 %v810_v6  ;;  %v821_v15 = vld [vmem:[%s943_s14 + $0x38] sm:$0xff]  }
  0x19   : > { %754 = vmatprep.subr.bf16.mxu1 %v810_v6 }
  0x1b   : > { %727 = vmatpush3.bf16.msra.mxu0 %v810_v6 }
  0x1c   : > { %762 = vmatpush3.bf16.msra.mxu1 %v810_v6  ;;  %728 = vmatprep.subr.bf16.mxu0 %v811_v7 }
  0x1d   : > { %755 = vmatprep.subr.bf16.mxu1 %v811_v7 }
  0x1f   : > { %729 = vmatpush3.bf16.msra.mxu0 %v811_v7 }
  0x20   : > { %763 = vmatpush3.bf16.msra.mxu1 %v811_v7  ;;  %730 = vmatprep.subr.bf16.mxu0 %v812_v8 }
  0x21   : > { %756 = vmatprep.subr.bf16.mxu1 %v812_v8 }
  0x23   : > { %731 = vmatpush3.bf16.msra.mxu0 %v812_v8 }
  0x24   : > { %764 = vmatpush3.bf16.msra.mxu1 %v812_v8  ;;  %732 = vmatprep.subr.bf16.mxu0 %v813_v9 }
  0x25   : > { %757 = vmatprep.subr.bf16.mxu1 %v813_v9 }
  0x27   : > { %733 = vmatpush3.bf16.msra.mxu0 %v813_v9 }
  0x28   : > { %765 = vmatpush3.bf16.msra.mxu1 %v813_v9 }
  0x2a   : > { %735 = vmatmul.mubr.bf16.vlgmr.msra.gmra.mrb[0].mxu0 %v816_v10 }
  0x2b   : > { %743 = vmatmul.mubr.bf16.vlgmr.msra.gmra.mrb[0].mxu1 %v817_v11  ;;  %738 = vmatprep.mubr.bf16.mxu0 %v818_v12 }
  0x2c   : > { %746 = vmatprep.mubr.bf16.mxu1 %v819_v13 }
  0x32   : > { %739 = vmatmul.mubr.bf16.gmra.mrb[4].mxu0 %v820_v14 }
  0x33   : > { %747 = vmatmul.mubr.bf16.gmra.mrb[4].mxu1 %v821_v15 }
  0xfd   : > { %v736_v16 = vpop.f32.mrb[0].mxu0 }
  0xfe   : > { %v744_v17 = vpop.f32.mrb[0].mxu1  ;;  %v424_v18 = vpop.f32.mrb[1].mxu0 }
  0xff   : > { %v456_v19 = vpop.f32.mrb[1].mxu1  ;;  %v737_v20 = vpop.f32.mrb[2].mxu0 }
 0x100   : > { %v745_v21 = vpop.f32.mrb[2].mxu1  ;;  %v427_v22 = vpop.f32.mrb[3].mxu0 }
 0x101   : > { %v459_v23 = vpop.f32.mrb[3].mxu1 }
 0x105   : > { %v740_v24 = vpop.f32.mrb[4].mxu0 }
 0x106   : > { %v748_v25 = vpop.f32.mrb[4].mxu1  ;;  %v489_v26 = vmax.f32 %v736_v16, %v740_v24  ;;  %v440_v28 = vpop.f32.mrb[5].mxu0 }
 0x107   : > { %v493_v27 = vmax.f32 %v744_v17, %v748_v25  ;;  %v472_v29 = vpop.f32.mrb[5].mxu1  ;;  %v487_v31 = vmax.f32 %v424_v18, %v440_v28  ;;  %v741_v33 = vpop.f32.mrb[6].mxu0 }
 0x108   : > { %v491_v32 = vmax.f32 %v456_v19, %v472_v29  ;;  %v749_v34 = vpop.f32.mrb[6].mxu1  ;;  %v490_v36 = vmax.f32 %v737_v20, %v741_v33  ;;  %v443_v38 = vpop.f32.mrb[7].mxu0 }
 0x109   : > { %v497_v35 = vmax.f32 %v489_v26, %v493_v27  ;;  %v494_v37 = vmax.f32 %v745_v21, %v749_v34  ;;  %v475_v39 = vpop.f32.mrb[7].mxu1  ;;  %v488_v41 = vmax.f32 %v427_v22, %v443_v38 }
 0x10a   : > { %v495_v40 = vmax.f32 %v487_v31, %v491_v32  ;;  %v492_v42 = vmax.f32 %v459_v23, %v475_v39 }
 0x10b   : > { %v508_v43 = vadd.f32 %v678_v30, %v497_v35  ;;  %v498_v44 = vmax.f32 %v490_v36, %v494_v37 }
 0x10c   : > { %v506_v46 = vadd.f32 %v678_v30, %v495_v40  ;;  %v496_v47 = vmax.f32 %v488_v41, %v492_v42 }
 0x10d   : > { %v512_v48 = vmax.f32 %v508_v43, 0.0  ;;  %v509_v49 = vadd.f32 %v678_v30, %v498_v44 }
 0x10e   : > { %v510_v50 = vmax.f32 %v506_v46, 0.0  ;;  %v507_v51 = vadd.f32 %v678_v30, %v496_v47 }
 0x10f   : > { %v523_v52 = vmul.f32 %v679_v45, %v512_v48  ;;  %v513_v53 = vmax.f32 %v509_v49, 0.0 }
 0x110   : > { %v521_v55 = vmul.f32 %v679_v45, %v510_v50  ;;  %v511_v56 = vmax.f32 %v507_v51, 0.0 }
 0x111   : > { %v524_v57 = vmul.f32 %v679_v45, %v513_v53  ;;  %v534_v59 = vadd.f32 %v680_v54, %v523_v52 }
 0x112   : > { %v522_v58 = vmul.f32 %v679_v45, %v511_v56  ;;  %v532_v61 = vadd.f32 %v680_v54, %v521_v55 }
 0x113   : > { %v535_v60 = vadd.f32 %v680_v54, %v524_v57 }
 0x114   : > { %v533_v62 = vadd.f32 %v680_v54, %v522_v58 }
 0x115   : > { %v699_v63 = vpack.c.bf16 %v535_v60, %v534_v59 }
 0x116   : > { %v694_v0 = vpack.c.bf16 %v533_v62, %v532_v61 }
 0x117   : > { %701 = vst [vmem:[%s260_s15 + $0x8] sm:$0xff] %v699_v63  }
 0x118   : > { %695 = vst [vmem:[%s260_s15] sm:$0xff] %v694_v0  }
 0x119 PF: > { %s15_s22 = sadd.s32 1, %s860_s22   ;;  %s1000_s18 = smov %s852_s20 }
 0x11a   : > { %p12_p7 = scmp.ge.s32.totalorder %s15_s22, 6   ;;  %s1001_s19 = smov %s856_s21 }
 0x11b   : > { %s1002_s20 = smov %s1005_s23  ;;  %s1003_s21 = smov %s1009_s24 }
 0x11c   :  { %14 = sbr.rel (!%p12_p7) target bundleno = 3 (0x3), region = 70 }

// kernel: convnet_forward.4
= control target key start
LH: loop header
LB: loop body
LE: loop exit
PB: predicated region body
PF: predicated region fallthrough
CT: control target
= control target key end

     0   :  { %s3890_s18 = smov 0   ;;  %s3892_s19 = smov 0   ;;  %s4592_s0 = inlined_call_operand.vmem [shape: bf16[2,1,32,3200], index: 0, kind: input, shape index: {}]   ;;  %s4593_s1 = inlined_call_operand.vmem [shape: bf16[3200,128], index: 1, kind: input, shape index: {}]   ;;  %s4594_s2 = inlined_call_operand.vmem [shape: f32[1,128], index: 2, kind: input, shape index: {}]   ;;  %s4595_s3 = inlined_call_operand.vmem [shape: f32[1,128], index: 3, kind: input, shape index: {}]   ;;  %s4596_s4 = inlined_call_operand.vmem [shape: f32[1,128], index: 4, kind: input, shape index: {}]   ;;  %s4597_s5 = inlined_call_operand.vmem [shape: bf16[2,1,8,128], index: 5, kind: output, shape index: {}]  }
   0x1   :  { %s3894_s20 = smov 0  }
   0x2 LB: > { %s27_s21 = sadd.s32 1, %s3854_s19  ;;  %p2913_p0 = scmp.ge.s32.totalorder %s3858_s20, 1  ;;  %s3858_s20 = sphi %s3894_s20, %s15_s20   ;;  %s3854_s19 = sphi %s3892_s19, %s4599_s19   ;;  %s3850_s18 = sphi %s3890_s18, %s4598_s18  }
   0x3   : > { %p29_p1 = scmp.ge.s32.totalorder %s27_s21, 2  ;;  %p207_p2 = scmp.lt.s32.totalorder %s3858_s20, 3 }
   0x5   : > { %s4601_s21 = smov (%p29_p1, %s27_s21), 0  ;;  %p208_p3 = pnand %p2913_p0, %p207_p2 }
   0x6   : > { %v3562_v0 = vld [vmem:[%s4593_s1 + $0x40] sm:$0xff] (!%p208_p3)   ;;  %v3566_v4 = vld [vmem:[%s4593_s1 + $0x48] sm:$0xff] (!%p208_p3)   ;;  %v3570_v8 = vld [vmem:[%s4593_s1 + $0x50] sm:$0xff] (!%p208_p3)   ;;  %p241_p4 = scmp.lt.s32.totalorder (!%p208_p3), %s3850_s18, 1 }
   0x7   : > { %211 = sbr.rel (%p208_p3) target bundleno = 464 (0x1d0), region = 40  ;;  %v3563_v1 = vld [vmem:[%s4593_s1 + $0xc0] sm:$0xff] (!%p208_p3)   ;;  %3171 = vmatprep.subr.bf16.mxu0 (!%p208_p3), %v3562_v0  ;;  %v3567_v5 = vld [vmem:[%s4593_s1 + $0xc8] sm:$0xff] (!%p208_p3)   ;;  %v3571_v9 = vld [vmem:[%s4593_s1 + $0xd0] sm:$0xff] (!%p208_p3)  }
   0x8   : > { %v3564_v2 = vld [vmem:[%s4593_s1] sm:$0xff] (!%p208_p3)   ;;  %3199 = vmatprep.subr.bf16.mxu1 (!%p208_p3), %v3563_v1  ;;  %v3568_v6 = vld [vmem:[%s4593_s1 + $0x8] sm:$0xff] (!%p208_p3)   ;;  %v3572_v10 = vld [vmem:[%s4593_s1 + $0x10] sm:$0xff] (!%p208_p3)  }
   0x9   : > { %v3565_v3 = vld [vmem:[%s4593_s1 + $0x80] sm:$0xff] (!%p208_p3)   ;;  %3172 = vmatpush3.bf16.msra.mxu0 (!%p208_p3), %v3564_v2  ;;  %v3569_v7 = vld [vmem:[%s4593_s1 + $0x88] sm:$0xff] (!%p208_p3)   ;;  %v3573_v11 = vld [vmem:[%s4593_s1 + $0x90] sm:$0xff] (!%p208_p3)  }
   0xa   : > { %3200 = vmatpush3.bf16.msra.mxu1 (!%p208_p3), %v3565_v3  ;;  %3173 = vmatprep.subr.bf16.mxu0 (!%p208_p3), %v3566_v4  ;;  %v3574_v12 = vld [vmem:[%s4593_s1 + $0x58] sm:$0xff] (!%p208_p3)   ;;  %v3578_v16 = vld [vmem:[%s4593_s1 + $0x60] sm:$0xff] (!%p208_p3)   ;;  %v3582_v20 = vld [vmem:[%s4593_s1 + $0x68] sm:$0xff] (!%p208_p3)  }
   0xb   : > { %3201 = vmatprep.subr.bf16.mxu1 (!%p208_p3), %v3567_v5  ;;  %v3575_v13 = vld [vmem:[%s4593_s1 + $0xd8] sm:$0xff] (!%p208_p3)   ;;  %v3579_v17 = vld [vmem:[%s4593_s1 + $0xe0] sm:$0xff] (!%p208_p3)   ;;  %v3583_v21 = vld [vmem:[%s4593_s1 + $0xe8] sm:$0xff] (!%p208_p3)  }
   0xc   : > { %v3576_v14 = vld [vmem:[%s4593_s1 + $0x18] sm:$0xff] (!%p208_p3)   ;;  %v3580_v18 = vld [vmem:[%s4593_s1 + $0x20] sm:$0xff] (!%p208_p3)   ;;  %v3584_v22 = vld [vmem:[%s4593_s1 + $0x28] sm:$0xff] (!%p208_p3)  }
   0xd   : > { %3174 = vmatpush3.bf16.msra.mxu0 (!%p208_p3), %v3568_v6  ;;  %v3577_v15 = vld [vmem:[%s4593_s1 + $0x98] sm:$0xff] (!%p208_p3)   ;;  %v3581_v19 = vld [vmem:[%s4593_s1 + $0xa0] sm:$0xff] (!%p208_p3)   ;;  %v3585_v23 = vld [vmem:[%s4593_s1 + $0xa8] sm:$0xff] (!%p208_p3)  }
   0xe   : > { %3202 = vmatpush3.bf16.msra.mxu1 %v3569_v7  ;;  %3175 = vmatprep.subr.bf16.mxu0 %v3570_v8  ;;  %s4603_s18 = smov (!%p241_p4, %s3850_s18), 1  ;;  %v3586_v24 = vld [vmem:[%s4593_s1 + $0x70] sm:$0xff]   ;;  %v3590_v28 = vld [vmem:[%s4593_s1 + $0x78] sm:$0xff]   ;;  %v3600_v36 = vld [vmem:[%s4593_s1 + $0x140] sm:$0xff]  }
   0xf   : > { %3203 = vmatprep.subr.bf16.mxu1 %v3571_v9  ;;  %v3587_v25 = vld [vmem:[%s4593_s1 + $0xf0] sm:$0xff]   ;;  %s3537_s7 = smul.u32 400, %s4603_s18  ;;  %v3591_v29 = vld [vmem:[%s4593_s1 + $0xf8] sm:$0xff]   ;;  %v3601_v37 = vld [vmem:[%s4593_s1 + $0x100] sm:$0xff]   ;;  %s2915_s28 = sshll.u32 %s4603_s18, 2 }
  0x10   : > { %v3588_v26 = vld [vmem:[%s4593_s1 + $0x30] sm:$0xff]   ;;  %v3592_v30 = vld [vmem:[%s4593_s1 + $0x38] sm:$0xff]   ;;  %v3602_v38 = vld [vmem:[%s4593_s1 + $0x1c0] sm:$0xff]   ;;  %s256_s6 = scalar_lea.vmem %s4597_s5, %s2915_s28 }
  0x11   : > { %3176 = vmatpush3.bf16.msra.mxu0 %v3572_v10  ;;  %v3589_v27 = vld [vmem:[%s4593_s1 + $0xb0] sm:$0xff]   ;;  %s4008_s22 = scalar_lea.vmem %s4592_s0, %s3537_s7  ;;  %v3593_v31 = vld [vmem:[%s4593_s1 + $0xb8] sm:$0xff]   ;;  %v3603_v39 = vld [vmem:[%s4593_s1 + $0x180] sm:$0xff]  }
  0x12   : > { %3204 = vmatpush3.bf16.msra.mxu1 %v3573_v11  ;;  %3177 = vmatprep.subr.bf16.mxu0 %v3574_v12  ;;  %v3594_v32 = vld [vmem:[%s4008_s22] ss:$100 sps:$4 sm:$0xff]   ;;  %v3597_v34 = vld [vmem:[%s4008_s22 + $0x8] ss:$100 sps:$4 sm:$0xff]   ;;  %v3608_v44 = vld [vmem:[%s4593_s1 + $0x150] sm:$0xff]  }
  0x13   : > { %3205 = vmatprep.subr.bf16.mxu1 %v3575_v13  ;;  %v3596_v33 = vld [vmem:[%s4008_s22 + $0x4] ss:$100 sps:$4 sm:$0xff]   ;;  %v3599_v35 = vld [vmem:[%s4008_s22 + $0xc] ss:$100 sps:$4 sm:$0xff]   ;;  %v3612_v48 = vld [vmem:[%s4593_s1 + $0x158] sm:$0xff]  }
  0x14   : > { %2194 = vmatprep.mubr.bf16.mxu0 %v3596_v33  ;;  %2243 = vmatprep.mubr.bf16.mxu1 %v3599_v35  ;;  %v3604_v40 = vld [vmem:[%s4593_s1 + $0x148] sm:$0xff]   ;;  %v3609_v45 = vld [vmem:[%s4593_s1 + $0x110] sm:$0xff]   ;;  %v3613_v49 = vld [vmem:[%s4593_s1 + $0x118] sm:$0xff]  }
  0x15   : > { %3178 = vmatpush3.bf16.msra.mxu0 %v3576_v14  ;;  %v3605_v41 = vld [vmem:[%s4593_s1 + $0x108] sm:$0xff]   ;;  %v3610_v46 = vld [vmem:[%s4593_s1 + $0x1d0] sm:$0xff]   ;;  %v3614_v50 = vld [vmem:[%s4593_s1 + $0x1d8] sm:$0xff]  }
  0x16   : > { %3206 = vmatpush3.bf16.msra.mxu1 %v3577_v15  ;;  %3179 = vmatprep.subr.bf16.mxu0 %v3578_v16  ;;  %v3606_v42 = vld [vmem:[%s4593_s1 + $0x1c8] sm:$0xff]   ;;  %v3611_v47 = vld [vmem:[%s4593_s1 + $0x190] sm:$0xff]   ;;  %v3615_v51 = vld [vmem:[%s4593_s1 + $0x198] sm:$0xff]  }
  0x17   : > { %3207 = vmatprep.subr.bf16.mxu1 %v3579_v17  ;;  %v3607_v43 = vld [vmem:[%s4593_s1 + $0x188] sm:$0xff]   ;;  %v3616_v52 = vld [vmem:[%s4593_s1 + $0x160] sm:$0xff]   ;;  %v3623_v58 = vld [vmem:[%s4008_s22 + $0xd4] ss:$100 sps:$4 sm:$0xff]  }
  0x18   : > { %v3617_v53 = vld [vmem:[%s4593_s1 + $0x120] sm:$0xff]   ;;  %v3620_v56 = vld [vmem:[%s4593_s1 + $0x168] sm:$0xff]   ;;  %v3627_v61 = vld [vmem:[%s4008_s22 + $0xd0] ss:$100 sps:$4 sm:$0xff]  }
  0x19   : > { %3180 = vmatpush3.bf16.msra.mxu0 %v3580_v18  ;;  %v3618_v54 = vld [vmem:[%s4593_s1 + $0x1e0] sm:$0xff]   ;;  %v3621_v57 = vld [vmem:[%s4008_s22 + $0xcc] ss:$100 sps:$4 sm:$0xff]   ;;  %v3634_v4 = vld [vmem:[%s4593_s1 + $0x178] sm:$0xff]  }
  0x1a   : > { %3208 = vmatpush3.bf16.msra.mxu1 %v3581_v19  ;;  %3181 = vmatprep.subr.bf16.mxu0 %v3582_v20  ;;  %v3619_v55 = vld [vmem:[%s4593_s1 + $0x1a0] sm:$0xff]   ;;  %v3625_v59 = vld [vmem:[%s4593_s1 + $0x128] sm:$0xff]   ;;  %v3630_v0 = vld [vmem:[%s4593_s1 + $0x170] sm:$0xff]  }
  0x1b   : > { %3209 = vmatprep.subr.bf16.mxu1 %v3583_v21  ;;  %v3626_v60 = vld [vmem:[%s4008_s22 + $0xc8] ss:$100 sps:$4 sm:$0xff]   ;;  %v3631_v1 = vld [vmem:[%s4593_s1 + $0x130] sm:$0xff]   ;;  %v3635_v5 = vld [vmem:[%s4593_s1 + $0x138] sm:$0xff]  }
  0x1c   : > { %v3628_v62 = vld [vmem:[%s4593_s1 + $0x1e8] sm:$0xff]   ;;  %v3632_v2 = vld [vmem:[%s4593_s1 + $0x1f0] sm:$0xff]   ;;  %v3636_v6 = vld [vmem:[%s4593_s1 + $0x1f8] sm:$0xff]  }
  0x1d   : > { %3182 = vmatpush3.bf16.msra.mxu0 %v3584_v22  ;;  %v3629_v63 = vld [vmem:[%s4593_s1 + $0x1a8] sm:$0xff]   ;;  %v3633_v3 = vld [vmem:[%s4593_s1 + $0x1b0] sm:$0xff]   ;;  %v3640_v9 = vld [vmem:[%s4593_s1 + $0x1b8] sm:$0xff]  }
  0x1e   : > { %3210 = vmatpush3.bf16.msra.mxu1 %v3585_v23  ;;  %3183 = vmatprep.subr.bf16.mxu0 %v3586_v24  ;;  %v3637_v7 = vld [vmem:[%s4008_s22 + $0x10] ss:$100 sps:$4 sm:$0xff]   ;;  %v3641_v10 = vld [vmem:[%s4593_s1 + $0x240] sm:$0xff]   ;;  %v3642_v11 = vld [vmem:[%s4008_s22 + $0x18] ss:$100 sps:$4 sm:$0xff]  }
  0x1f   : > { %3211 = vmatprep.subr.bf16.mxu1 %v3587_v25  ;;  %v3639_v8 = vld [vmem:[%s4008_s22 + $0x14] ss:$100 sps:$4 sm:$0xff]   ;;  %v3644_v12 = vld [vmem:[%s4008_s22 + $0x1c] ss:$100 sps:$4 sm:$0xff]   ;;  %v3648_v16 = vld [vmem:[%s4593_s1 + $0x248] sm:$0xff]  }
  0x20   : > { %v3645_v13 = vld [vmem:[%s4593_s1 + $0x200] sm:$0xff]   ;;  %v3649_v17 = vld [vmem:[%s4593_s1 + $0x208] sm:$0xff]   ;;  %v3654_v21 = vld [vmem:[%s4008_s22 + $0xd8] ss:$100 sps:$4 sm:$0xff]  }
  0x21   : > { %3184 = vmatpush3.bf16.msra.mxu0 %v3588_v26  ;;  %v3646_v14 = vld [vmem:[%s4593_s1 + $0x2c0] sm:$0xff]   ;;  %v3650_v18 = vld [vmem:[%s4593_s1 + $0x2c8] sm:$0xff]   ;;  %v3655_v22 = vld [vmem:[%s4593_s1 + $0x250] sm:$0xff]  }
  0x22   : > { %3212 = vmatpush3.bf16.msra.mxu1 %v3589_v27  ;;  %3185 = vmatprep.subr.bf16.mxu0 %v3590_v28  ;;  %v3647_v15 = vld [vmem:[%s4593_s1 + $0x280] sm:$0xff]   ;;  %v3653_v20 = vld [vmem:[%s4593_s1 + $0x288] sm:$0xff]   ;;  %v3658_v24 = vld [vmem:[%s4593_s1 + $0x210] sm:$0xff]  }
  0x23   : > { %3213 = vmatprep.subr.bf16.mxu1 %v3591_v29  ;;  %v3651_v19 = vld [vmem:[%s4008_s22 + $0xdc] ss:$100 sps:$4 sm:$0xff]   ;;  %v3656_v23 = vld [vmem:[%s4008_s22 + $0xe4] ss:$100 sps:$4 sm:$0xff]   ;;  %v3660_v26 = vld [vmem:[%s4593_s1 + $0x2d0] sm:$0xff]  }
  0x24   : > { %v3659_v25 = vld [vmem:[%s4008_s22 + $0xe0] ss:$100 sps:$4 sm:$0xff]   ;;  %v3661_v27 = vld [vmem:[%s4593_s1 + $0x290] sm:$0xff]   ;;  %v3662_v28 = vld [vmem:[%s4593_s1 + $0x258] sm:$0xff]  }
  0x25   : > { %3186 = vmatpush3.bf16.msra.mxu0 %v3592_v30  ;;  %v3663_v29 = vld [vmem:[%s4593_s1 + $0x218] sm:$0xff]   ;;  %v3667_v33 = vld [vmem:[%s4593_s1 + $0x220] sm:$0xff]  }
  0x26   : > { %3214 = vmatpush3.bf16.msra.mxu1 %v3593_v31  ;;  %3227 = vmatprep.subr.bf16.mxu0 %v3600_v36  ;;  %v3664_v30 = vld [vmem:[%s4593_s1 + $0x2d8] sm:$0xff]   ;;  %v3669_v35 = vld [vmem:[%s4593_s1 + $0x2a0] sm:$0xff]   ;;  %v3670_v36 = vld [vmem:[%s4593_s1 + $0x268] sm:$0xff]  }
  0x27   : > { %3255 = vmatprep.subr.bf16.mxu1 %v3602_v38  ;;  %v3665_v31 = vld [vmem:[%s4593_s1 + $0x298] sm:$0xff]   ;;  %v3672_v38 = vld [vmem:[%s4593_s1 + $0x2e8] sm:$0xff]  }
  0x28   : > { %2195 = vmatmul.mubr.bf16.vlgmr.msra.gmra.mrb[0].mxu0 %v3594_v32  ;;  %v3666_v32 = vld [vmem:[%s4593_s1 + $0x260] sm:$0xff]  }
  0x29   : > { %2244 = vmatmul.mubr.bf16.vlgmr.msra.gmra.mrb[0].mxu1 %v3597_v34  ;;  %3228 = vmatpush3.bf16.msra.mxu0 %v3601_v37  ;;  %v3668_v34 = vld [vmem:[%s4593_s1 + $0x2e0] sm:$0xff]   ;;  %v3671_v37 = vld [vmem:[%s4593_s1 + $0x228] sm:$0xff]  }
  0x2a   : > { %3256 = vmatpush3.bf16.msra.mxu1 %v3603_v39  ;;  %3229 = vmatprep.subr.bf16.mxu0 %v3604_v40  ;;  %v3673_v39 = vld [vmem:[%s4593_s1 + $0x2a8] sm:$0xff]   ;;  %v3674_v40 = vld [vmem:[%s4593_s1 + $0x270] sm:$0xff]  }
  0x2b   : > { %3257 = vmatprep.subr.bf16.mxu1 %v3606_v42  ;;  %2202 = vmatprep.mubr.bf16.mxu0 %v3621_v57  ;;  %v3676_v42 = vld [vmem:[%s4593_s1 + $0x2f0] sm:$0xff]   ;;  %v3693_v57 = vld [vmem:[%s4593_s1 + $0x308] sm:$0xff]  }
  0x2c   : > { %2251 = vmatprep.mubr.bf16.mxu1 %v3623_v58  ;;  %v3694_v58 = vld [vmem:[%s4593_s1 + $0x3c8] sm:$0xff]  }
  0x2d   : > { %3230 = vmatpush3.bf16.msra.mxu0 %v3605_v41  ;;  %v3675_v41 = vld [vmem:[%s4593_s1 + $0x230] sm:$0xff]  }
  0x2e   : > { %3258 = vmatpush3.bf16.msra.mxu1 %v3607_v43  ;;  %3231 = vmatprep.subr.bf16.mxu0 %v3608_v44  ;;  %v3677_v43 = vld [vmem:[%s4593_s1 + $0x2b0] sm:$0xff]   ;;  %v3678_v44 = vld [vmem:[%s4593_s1 + $0x278] sm:$0xff]  }
  0x2f   : > { %3259 = vmatprep.subr.bf16.mxu1 %v3610_v46  ;;  %v3680_v46 = vld [vmem:[%s4593_s1 + $0x2f8] sm:$0xff]  }
  0x30   : > { %2203 = vmatmul.mubr.bf16.gmra.mrb[4].mxu0 %v3626_v60  ;;  %v3697_v60 = vld [vmem:[%s4593_s1 + $0x388] sm:$0xff]  }
  0x31   : > { %3232 = vmatpush3.bf16.msra.mxu0 %v3609_v45  ;;  %2252 = vmatmul.mubr.bf16.gmra.mrb[4].mxu1 %v3627_v61  ;;  %v3679_v45 = vld [vmem:[%s4593_s1 + $0x238] sm:$0xff]   ;;  %v3698_v61 = vld [vmem:[%s4008_s22 + $0xe8] ss:$100 sps:$4 sm:$0xff]  }
  0x32   : > { %3260 = vmatpush3.bf16.msra.mxu1 %v3611_v47  ;;  %3233 = vmatprep.subr.bf16.mxu0 %v3612_v48  ;;  %v3681_v47 = vld [vmem:[%s4008_s22 + $0x20] ss:$100 sps:$4 sm:$0xff]  }
  0x33   : > { %3261 = vmatprep.subr.bf16.mxu1 %v3614_v50  ;;  %2292 = vmatprep.mubr.bf16.mxu0 %v3639_v8  ;;  %v3683_v48 = vld [vmem:[%s4008_s22 + $0x24] ss:$100 sps:$4 sm:$0xff]  }
  0x34   : > { %2341 = vmatprep.mubr.bf16.mxu1 %v3644_v12  ;;  %v3685_v50 = vld [vmem:[%s4593_s1 + $0x340] sm:$0xff]   ;;  %v3714_v12 = vld [vmem:[%s4593_s1 + $0x368] sm:$0xff]  }
  0x35   : > { %3234 = vmatpush3.bf16.msra.mxu0 %v3613_v49  ;;  %v3684_v49 = vld [vmem:[%s4593_s1 + $0x2b8] sm:$0xff]   ;;  %v3710_v8 = vld [vmem:[%s4593_s1 + $0x360] sm:$0xff]  }
  0x36   : > { %3262 = vmatpush3.bf16.msra.mxu1 %v3615_v51  ;;  %3235 = vmatprep.subr.bf16.mxu0 %v3616_v52  ;;  %v3686_v51 = vld [vmem:[%s4008_s22 + $0x28] ss:$100 sps:$4 sm:$0xff]  }
  0x37   : > { %3263 = vmatprep.subr.bf16.mxu1 %v3618_v54  ;;  %v3688_v52 = vld [vmem:[%s4008_s22 + $0x2c] ss:$100 sps:$4 sm:$0xff]   ;;  %v3690_v54 = vld [vmem:[%s4593_s1 + $0x3c0] sm:$0xff]  }
  0x39   : > { %3236 = vmatpush3.bf16.msra.mxu0 %v3617_v53  ;;  %v3689_v53 = vld [vmem:[%s4593_s1 + $0x300] sm:$0xff]  }
  0x3a   : > { %3264 = vmatpush3.bf16.msra.mxu1 %v3619_v55  ;;  %3237 = vmatprep.subr.bf16.mxu0 %v3620_v56  ;;  %v3691_v55 = vld [vmem:[%s4593_s1 + $0x380] sm:$0xff]   ;;  %v3692_v56 = vld [vmem:[%s4593_s1 + $0x348] sm:$0xff]  }
  0x3b   : > { %3265 = vmatprep.subr.bf16.mxu1 %v3628_v62  ;;  %v3699_v62 = vld [vmem:[%s4593_s1 + $0x350] sm:$0xff]  }
  0x3d   : > { %3238 = vmatpush3.bf16.msra.mxu0 %v3625_v59  ;;  %v3695_v59 = vld [vmem:[%s4008_s22 + $0xec] ss:$100 sps:$4 sm:$0xff]  }
  0x3e   : > { %3266 = vmatpush3.bf16.msra.mxu1 %v3629_v63  ;;  %3239 = vmatprep.subr.bf16.mxu0 %v3630_v0  ;;  %v3700_v63 = vld [vmem:[%s4008_s22 + $0xf4] ss:$100 sps:$4 sm:$0xff]  }
  0x3f   : > { %3267 = vmatprep.subr.bf16.mxu1 %v3632_v2  ;;  %v3702_v0 = vld [vmem:[%s4593_s1 + $0x310] sm:$0xff]  }
  0x40   : > { %v3704_v2 = vld [vmem:[%s4593_s1 + $0x3d0] sm:$0xff]  }
  0x41   : > { %3240 = vmatpush3.bf16.msra.mxu0 %v3631_v1  ;;  %v3703_v1 = vld [vmem:[%s4008_s22 + $0xf0] ss:$100 sps:$4 sm:$0xff]  }
  0x42   : > { %3268 = vmatpush3.bf16.msra.mxu1 %v3633_v3  ;;  %3241 = vmatprep.subr.bf16.mxu0 %v3634_v4  ;;  %v3705_v3 = vld [vmem:[%s4593_s1 + $0x390] sm:$0xff]   ;;  %v3706_v4 = vld [vmem:[%s4593_s1 + $0x358] sm:$0xff]  }
  0x43   : > { %3269 = vmatprep.subr.bf16.mxu1 %v3636_v6  ;;  %v3708_v6 = vld [vmem:[%s4593_s1 + $0x3d8] sm:$0xff]  }
  0x45   : > { %3242 = vmatpush3.bf16.msra.mxu0 %v3635_v5  ;;  %v3707_v5 = vld [vmem:[%s4593_s1 + $0x318] sm:$0xff]  }
  0x46   : > { %3270 = vmatpush3.bf16.msra.mxu1 %v3640_v9  ;;  %3283 = vmatprep.subr.bf16.mxu0 %v3641_v10  ;;  %v3711_v9 = vld [vmem:[%s4593_s1 + $0x320] sm:$0xff]  }
  0x47   : > { %3311 = vmatprep.subr.bf16.mxu1 %v3646_v14  ;;  %v3712_v10 = vld [vmem:[%s4593_s1 + $0x3e0] sm:$0xff]   ;;  %v3716_v14 = vld [vmem:[%s4593_s1 + $0x3e8] sm:$0xff]  }
  0x48   : > { %2293 = vmatmul.mubr.bf16.vlgmr.msra.gmra.mrb[8].mxu0 %v3637_v7  ;;  %v3709_v7 = vld [vmem:[%s4593_s1 + $0x398] sm:$0xff]  }
  0x49   : > { %3284 = vmatpush3.bf16.msra.mxu0 %v3645_v13  ;;  %2342 = vmatmul.mubr.bf16.vlgmr.msra.gmra.mrb[8].mxu1 %v3642_v11  ;;  %v3713_v11 = vld [vmem:[%s4593_s1 + $0x3a0] sm:$0xff]   ;;  %v3715_v13 = vld [vmem:[%s4593_s1 + $0x328] sm:$0xff]  }
  0x4a   : > { %3312 = vmatpush3.bf16.msra.mxu1 %v3647_v15  ;;  %3285 = vmatprep.subr.bf16.mxu0 %v3648_v16  ;;  %v3717_v15 = vld [vmem:[%s4593_s1 + $0x3a8] sm:$0xff]   ;;  %v3718_v16 = vld [vmem:[%s4593_s1 + $0x370] sm:$0xff]  }
  0x4b   : > { %3313 = vmatprep.subr.bf16.mxu1 %v3650_v18  ;;  %2300 = vmatprep.mubr.bf16.mxu0 %v3651_v19  ;;  %v3720_v18 = vld [vmem:[%s4593_s1 + $0x3f0] sm:$0xff]  }
  0x4c   : > { %2349 = vmatprep.mubr.bf16.mxu1 %v3656_v23  ;;  %v3721_v19 = vld [vmem:[%s4593_s1 + $0x3b0] sm:$0xff]  }
  0x4d   : > { %3286 = vmatpush3.bf16.msra.mxu0 %v3649_v17  ;;  %v3719_v17 = vld [vmem:[%s4593_s1 + $0x330] sm:$0xff]  }
  0x4e   : > { %3314 = vmatpush3.bf16.msra.mxu1 %v3653_v20  ;;  %3287 = vmatprep.subr.bf16.mxu0 %v3655_v22  ;;  %v3722_v20 = vld [vmem:[%s4593_s1 + $0x378] sm:$0xff]   ;;  %v3725_v23 = vld [vmem:[%s4008_s22 + $0x30] ss:$100 sps:$4 sm:$0xff]  }
  0x4f   : > { %3315 = vmatprep.subr.bf16.mxu1 %v3660_v26  ;;  %v3724_v22 = vld [vmem:[%s4593_s1 + $0x3f8] sm:$0xff]   ;;  %v3729_v26 = vld [vmem:[%s4593_s1 + $0x440] sm:$0xff]  }
  0x50   : > { %2301 = vmatmul.mubr.bf16.gmra.mrb[12].mxu0 %v3654_v21  ;;  %v3723_v21 = vld [vmem:[%s4593_s1 + $0x338] sm:$0xff]  }
  0x51   : > { %3288 = vmatpush3.bf16.msra.mxu0 %v3658_v24  ;;  %2350 = vmatmul.mubr.bf16.gmra.mrb[12].mxu1 %v3659_v25  ;;  %v3727_v24 = vld [vmem:[%s4008_s22 + $0x34] ss:$100 sps:$4 sm:$0xff]  }
  0x52   : > { %3316 = vmatpush3.bf16.msra.mxu1 %v3661_v27  ;;  %3289 = vmatprep.subr.bf16.mxu0 %v3662_v28  ;;  %v3728_v25 = vld [vmem:[%s4593_s1 + $0x3b8] sm:$0xff]  }
  0x53   : > { %3317 = vmatprep.subr.bf16.mxu1 %v3664_v30  ;;  %2390 = vmatprep.mubr.bf16.mxu0 %v3683_v48  ;;  %v3730_v27 = vld [vmem:[%s4008_s22 + $0x38] ss:$100 sps:$4 sm:$0xff]   ;;  %v3734_v30 = vld [vmem:[%s4593_s1 + $0x4c0] sm:$0xff]  }
  0x54   : > { %2439 = vmatprep.mubr.bf16.mxu1 %v3688_v52  ;;  %v3732_v28 = vld [vmem:[%s4008_s22 + $0x3c] ss:$100 sps:$4 sm:$0xff]   ;;  %v3758_v52 = vld [vmem:[%s4593_s1 + $0x468] sm:$0xff]  }
  0x55   : > { %3290 = vmatpush3.bf16.msra.mxu0 %v3663_v29  ;;  %v3733_v29 = vld [vmem:[%s4593_s1 + $0x400] sm:$0xff]  }
  0x56   : > { %3318 = vmatpush3.bf16.msra.mxu1 %v3665_v31  ;;  %3291 = vmatprep.subr.bf16.mxu0 %v3666_v32  ;;  %v3735_v31 = vld [vmem:[%s4593_s1 + $0x480] sm:$0xff]   ;;  %v3736_v32 = vld [vmem:[%s4593_s1 + $0x448] sm:$0xff]  }
  0x57   : > { %3319 = vmatprep.subr.bf16.mxu1 %v3668_v34  ;;  %v3738_v34 = vld [vmem:[%s4593_s1 + $0x4c8] sm:$0xff]   ;;  %v3754_v48 = vld [vmem:[%s4593_s1 + $0x460] sm:$0xff]  }
  0x59   : > { %3292 = vmatpush3.bf16.msra.mxu0 %v3667_v33  ;;  %v3737_v33 = vld [vmem:[%s4593_s1 + $0x408] sm:$0xff]  }
  0x5a   : > { %3320 = vmatpush3.bf16.msra.mxu1 %v3669_v35  ;;  %3293 = vmatprep.subr.bf16.mxu0 %v3670_v36  ;;  %v3739_v35 = vld [vmem:[%s4008_s22 + $0xfc] ss:$100 sps:$4 sm:$0xff]   ;;  %v3741_v36 = vld [vmem:[%s4593_s1 + $0x488] sm:$0xff]  }
  0x5b   : > { %3321 = vmatprep.subr.bf16.mxu1 %v3672_v38  ;;  %v3743_v38 = vld [vmem:[%s4593_s1 + $0x450] sm:$0xff]  }
  0x5d   : > { %3294 = vmatpush3.bf16.msra.mxu0 %v3671_v37  ;;  %v3742_v37 = vld [vmem:[%s4008_s22 + $0xf8] ss:$100 sps:$4 sm:$0xff]  }
  0x5e   : > { %3322 = vmatpush3.bf16.msra.mxu1 %v3673_v39  ;;  %3295 = vmatprep.subr.bf16.mxu0 %v3674_v40  ;;  %v3744_v39 = vld [vmem:[%s4008_s22 + $0x104] ss:$100 sps:$4 sm:$0xff]   ;;  %v3746_v40 = vld [vmem:[%s4593_s1 + $0x410] sm:$0xff]  }
  0x5f   : > { %3323 = vmatprep.subr.bf16.mxu1 %v3676_v42  ;;  %v3748_v42 = vld [vmem:[%s4593_s1 + $0x4d0] sm:$0xff]  }
  0x61   : > { %3296 = vmatpush3.bf16.msra.mxu0 %v3675_v41  ;;  %v3747_v41 = vld [vmem:[%s4008_s22 + $0x100] ss:$100 sps:$4 sm:$0xff]  }
  0x62   : > { %3324 = vmatpush3.bf16.msra.mxu1 %v3677_v43  ;;  %3297 = vmatprep.subr.bf16.mxu0 %v3678_v44  ;;  %v3749_v43 = vld [vmem:[%s4593_s1 + $0x490] sm:$0xff]   ;;  %v3750_v44 = vld [vmem:[%s4593_s1 + $0x458] sm:$0xff]  }
  0x63   : > { %3325 = vmatprep.subr.bf16.mxu1 %v3680_v46  ;;  %v3752_v46 = vld [vmem:[%s4593_s1 + $0x4d8] sm:$0xff]  }
  0x65   : > { %3298 = vmatpush3.bf16.msra.mxu0 %v3679_v45  ;;  %v3751_v45 = vld [vmem:[%s4593_s1 + $0x418] sm:$0xff]  }
  0x66   : > { %3326 = vmatpush3.bf16.msra.mxu1 %v3684_v49  ;;  %3339 = vmatprep.subr.bf16.mxu0 %v3685_v50  ;;  %v3755_v49 = vld [vmem:[%s4593_s1 + $0x420] sm:$0xff]  }
  0x67   : > { %3367 = vmatprep.subr.bf16.mxu1 %v3690_v54  ;;  %v3756_v50 = vld [vmem:[%s4593_s1 + $0x4e0] sm:$0xff]   ;;  %v3760_v54 = vld [vmem:[%s4593_s1 + $0x4e8] sm:$0xff]  }
  0x68   : > { %2391 = vmatmul.mubr.bf16.vlgmr.msra.gmra.mrb[16].mxu0 %v3681_v47  ;;  %v3753_v47 = vld [vmem:[%s4593_s1 + $0x498] sm:$0xff]  }
  0x69   : > { %3340 = vmatpush3.bf16.msra.mxu0 %v3689_v53  ;;  %2440 = vmatmul.mubr.bf16.vlgmr.msra.gmra.mrb[16].mxu1 %v3686_v51  ;;  %v3757_v51 = vld [vmem:[%s4593_s1 + $0x4a0] sm:$0xff]   ;;  %v3759_v53 = vld [vmem:[%s4593_s1 + $0x428] sm:$0xff]  }
  0x6a   : > { %3368 = vmatpush3.bf16.msra.mxu1 %v3691_v55  ;;  %3341 = vmatprep.subr.bf16.mxu0 %v3692_v56  ;;  %v3761_v55 = vld [vmem:[%s4593_s1 + $0x4a8] sm:$0xff]   ;;  %v3762_v56 = vld [vmem:[%s4593_s1 + $0x470] sm:$0xff]  }
  0x6b   : > { %3369 = vmatprep.subr.bf16.mxu1 %v3694_v58  ;;  %2398 = vmatprep.mubr.bf16.mxu0 %v3695_v59  ;;  %v3764_v58 = vld [vmem:[%s4593_s1 + $0x4f0] sm:$0xff]  }
  0x6c   : > { %2447 = vmatprep.mubr.bf16.mxu1 %v3700_v63  ;;  %v3765_v59 = vld [vmem:[%s4593_s1 + $0x4b0] sm:$0xff]   ;;  %v3769_v63 = vld [vmem:[%s4008_s22 + $0x40] ss:$100 sps:$4 sm:$0xff]  }
  0x6d   : > { %3342 = vmatpush3.bf16.msra.mxu0 %v3693_v57  ;;  %v3763_v57 = vld [vmem:[%s4593_s1 + $0x430] sm:$0xff]  }
  0x6e   : > { %3370 = vmatpush3.bf16.msra.mxu1 %v3697_v60  ;;  %3343 = vmatprep.subr.bf16.mxu0 %v3699_v62  ;;  %v3766_v60 = vld [vmem:[%s4593_s1 + $0x478] sm:$0xff]  }
  0x6f   : > { %3371 = vmatprep.subr.bf16.mxu1 %v3704_v2  ;;  %v3768_v62 = vld [vmem:[%s4593_s1 + $0x4f8] sm:$0xff]   ;;  %v3773_v2 = vld [vmem:[%s4593_s1 + $0x540] sm:$0xff]  }
  0x70   : > { %2399 = vmatmul.mubr.bf16.gmra.mrb[20].mxu0 %v3698_v61  ;;  %v3767_v61 = vld [vmem:[%s4593_s1 + $0x438] sm:$0xff]  }
  0x71   : > { %3344 = vmatpush3.bf16.msra.mxu0 %v3702_v0  ;;  %2448 = vmatmul.mubr.bf16.gmra.mrb[20].mxu1 %v3703_v1  ;;  %v3771_v0 = vld [vmem:[%s4008_s22 + $0x44] ss:$100 sps:$4 sm:$0xff]   ;;  %v3772_v1 = vld [vmem:[%s4593_s1 + $0x4b8] sm:$0xff]  }
  0x72   : > { %3372 = vmatpush3.bf16.msra.mxu1 %v3705_v3  ;;  %3345 = vmatprep.subr.bf16.mxu0 %v3706_v4  ;;  %v3774_v3 = vld [vmem:[%s4008_s22 + $0x48] ss:$100 sps:$4 sm:$0xff]  }
  0x73   : > { %3373 = vmatprep.subr.bf16.mxu1 %v3708_v6  ;;  %2488 = vmatprep.mubr.bf16.mxu0 %v3727_v24  ;;  %v3776_v4 = vld [vmem:[%s4008_s22 + $0x4c] ss:$100 sps:$4 sm:$0xff]   ;;  %v3778_v6 = vld [vmem:[%s4593_s1 + $0x5c0] sm:$0xff]  }
  0x74   : > { %2537 = vmatprep.mubr.bf16.mxu1 %v3732_v28  ;;  %v3798_v24 = vld [vmem:[%s4593_s1 + $0x560] sm:$0xff]   ;;  %v3802_v28 = vld [vmem:[%s4593_s1 + $0x568] sm:$0xff]  }
  0x75   : > { %3346 = vmatpush3.bf16.msra.mxu0 %v3707_v5  ;;  %v3777_v5 = vld [vmem:[%s4593_s1 + $0x500] sm:$0xff]  }
  0x76   : > { %3374 = vmatpush3.bf16.msra.mxu1 %v3709_v7  ;;  %3347 = vmatprep.subr.bf16.mxu0 %v3710_v8  ;;  %v3779_v7 = vld [vmem:[%s4593_s1 + $0x580] sm:$0xff]   ;;  %v3780_v8 = vld [vmem:[%s4593_s1 + $0x548] sm:$0xff]  }
  0x77   : > { %3375 = vmatprep.subr.bf16.mxu1 %v3712_v10  ;;  %v3782_v10 = vld [vmem:[%s4593_s1 + $0x5c8] sm:$0xff]  }
  0x79   : > { %3348 = vmatpush3.bf16.msra.mxu0 %v3711_v9  ;;  %v3781_v9 = vld [vmem:[%s4593_s1 + $0x508] sm:$0xff]  }
  0x7a   : > { %3376 = vmatpush3.bf16.msra.mxu1 %v3713_v11  ;;  %3349 = vmatprep.subr.bf16.mxu0 %v3714_v12  ;;  %v3783_v11 = vld [vmem:[%s4008_s22 + $0x10c] ss:$100 sps:$4 sm:$0xff]  }
  0x7b   : > { %3377 = vmatprep.subr.bf16.mxu1 %v3716_v14  ;;  %v3785_v12 = vld [vmem:[%s4593_s1 + $0x588] sm:$0xff]   ;;  %v3787_v14 = vld [vmem:[%s4593_s1 + $0x550] sm:$0xff]  }
  0x7d   : > { %3350 = vmatpush3.bf16.msra.mxu0 %v3715_v13  ;;  %v3786_v13 = vld [vmem:[%s4008_s22 + $0x108] ss:$100 sps:$4 sm:$0xff]  }
  0x7e   : > { %3378 = vmatpush3.bf16.msra.mxu1 %v3717_v15  ;;  %3351 = vmatprep.subr.bf16.mxu0 %v3718_v16  ;;  %v3788_v15 = vld [vmem:[%s4008_s22 + $0x114] ss:$100 sps:$4 sm:$0xff]  }
  0x7f   : > { %3379 = vmatprep.subr.bf16.mxu1 %v3720_v18  ;;  %v3790_v16 = vld [vmem:[%s4593_s1 + $0x510] sm:$0xff]  }
  0x80   : > { %v3792_v18 = vld [vmem:[%s4593_s1 + $0x5d0] sm:$0xff]  }
  0x81   : > { %3352 = vmatpush3.bf16.msra.mxu0 %v3719_v17  ;;  %v3791_v17 = vld [vmem:[%s4008_s22 + $0x110] ss:$100 sps:$4 sm:$0xff]  }
  0x82   : > { %3380 = vmatpush3.bf16.msra.mxu1 %v3721_v19  ;;  %3353 = vmatprep.subr.bf16.mxu0 %v3722_v20  ;;  %v3793_v19 = vld [vmem:[%s4593_s1 + $0x590] sm:$0xff]   ;;  %v3794_v20 = vld [vmem:[%s4593_s1 + $0x558] sm:$0xff]  }
  0x83   : > { %3381 = vmatprep.subr.bf16.mxu1 %v3724_v22  ;;  %v3796_v22 = vld [vmem:[%s4593_s1 + $0x5d8] sm:$0xff]  }
  0x85   : > { %3354 = vmatpush3.bf16.msra.mxu0 %v3723_v21  ;;  %v3795_v21 = vld [vmem:[%s4593_s1 + $0x518] sm:$0xff]  }
  0x86   : > { %3382 = vmatpush3.bf16.msra.mxu1 %v3728_v25  ;;  %3395 = vmatprep.subr.bf16.mxu0 %v3729_v26  ;;  %v3799_v25 = vld [vmem:[%s4593_s1 + $0x520] sm:$0xff]  }
  0x87   : > { %3423 = vmatprep.subr.bf16.mxu1 %v3734_v30  ;;  %v3800_v26 = vld [vmem:[%s4593_s1 + $0x5e0] sm:$0xff]   ;;  %v3804_v30 = vld [vmem:[%s4593_s1 + $0x5e8] sm:$0xff]  }
  0x88   : > { %2489 = vmatmul.mubr.bf16.vlgmr.msra.gmra.mrb[24].mxu0 %v3725_v23  ;;  %v3797_v23 = vld [vmem:[%s4593_s1 + $0x598] sm:$0xff]  }
  0x89   : > { %3396 = vmatpush3.bf16.msra.mxu0 %v3733_v29  ;;  %2538 = vmatmul.mubr.bf16.vlgmr.msra.gmra.mrb[24].mxu1 %v3730_v27  ;;  %v3801_v27 = vld [vmem:[%s4593_s1 + $0x5a0] sm:$0xff]   ;;  %v3803_v29 = vld [vmem:[%s4593_s1 + $0x528] sm:$0xff]  }
  0x8a   : > { %3424 = vmatpush3.bf16.msra.mxu1 %v3735_v31  ;;  %3397 = vmatprep.subr.bf16.mxu0 %v3736_v32  ;;  %v3805_v31 = vld [vmem:[%s4593_s1 + $0x5a8] sm:$0xff]   ;;  %v3806_v32 = vld [vmem:[%s4593_s1 + $0x570] sm:$0xff]  }
  0x8b   : > { %3425 = vmatprep.subr.bf16.mxu1 %v3738_v34  ;;  %2496 = vmatprep.mubr.bf16.mxu0 %v3739_v35  ;;  %v3808_v34 = vld [vmem:[%s4593_s1 + $0x5f0] sm:$0xff]  }
  0x8c   : > { %2545 = vmatprep.mubr.bf16.mxu1 %v3744_v39  ;;  %v3809_v35 = vld [vmem:[%s4593_s1 + $0x5b0] sm:$0xff]  }
  0x8d   : > { %3398 = vmatpush3.bf16.msra.mxu0 %v3737_v33  ;;  %v3807_v33 = vld [vmem:[%s4593_s1 + $0x530] sm:$0xff]  }
  0x8e   : > { %3426 = vmatpush3.bf16.msra.mxu1 %v3741_v36  ;;  %3399 = vmatprep.subr.bf16.mxu0 %v3743_v38  ;;  %v3810_v36 = vld [vmem:[%s4593_s1 + $0x578] sm:$0xff]   ;;  %v3813_v39 = vld [vmem:[%s4008_s22 + $0x50] ss:$100 sps:$4 sm:$0xff]  }
  0x8f   : > { %3427 = vmatprep.subr.bf16.mxu1 %v3748_v42  ;;  %v3812_v38 = vld [vmem:[%s4593_s1 + $0x5f8] sm:$0xff]   ;;  %v3817_v42 = vld [vmem:[%s4593_s1 + $0x600] sm:$0xff]  }
  0x90   : > { %2497 = vmatmul.mubr.bf16.gmra.mrb[28].mxu0 %v3742_v37  ;;  %v3811_v37 = vld [vmem:[%s4593_s1 + $0x538] sm:$0xff]  }
  0x91   : > { %3400 = vmatpush3.bf16.msra.mxu0 %v3746_v40  ;;  %2546 = vmatmul.mubr.bf16.gmra.mrb[28].mxu1 %v3747_v41  ;;  %v3815_v40 = vld [vmem:[%s4008_s22 + $0x54] ss:$100 sps:$4 sm:$0xff]  }
  0x92   : > { %3428 = vmatpush3.bf16.msra.mxu1 %v3749_v43  ;;  %3401 = vmatprep.subr.bf16.mxu0 %v3750_v44  ;;  %v3816_v41 = vld [vmem:[%s4593_s1 + $0x5b8] sm:$0xff]  }
  0x93   : > { %3429 = vmatprep.subr.bf16.mxu1 %v3752_v46  ;;  %2586 = vmatprep.mubr.bf16.mxu0 %v3771_v0  ;;  %v3818_v43 = vld [vmem:[%s4008_s22 + $0x58] ss:$100 sps:$4 sm:$0xff]  }
  0x94   : > { %2635 = vmatprep.mubr.bf16.mxu1 %v3776_v4  ;;  %v3820_v44 = vld [vmem:[%s4008_s22 + $0x5c] ss:$100 sps:$4 sm:$0xff]  }
  0x95   : > { %3402 = vmatpush3.bf16.msra.mxu0 %v3751_v45  ;;  %v3821_v45 = vld [vmem:[%s4593_s1 + $0x608] sm:$0xff]   ;;  %v3822_v46 = vld [vmem:[%s4008_s22 + $0x11c] ss:$100 sps:$4 sm:$0xff]  }
  0x96   : > { %3430 = vmatpush3.bf16.msra.mxu1 %v3753_v47  ;;  %3403 = vmatprep.subr.bf16.mxu0 %v3754_v48  ;;  %v3824_v47 = vld [vmem:[%s4008_s22 + $0x118] ss:$100 sps:$4 sm:$0xff]   ;;  %v3825_v48 = vld [vmem:[%s4593_s1 + $0x610] sm:$0xff]  }
  0x97   : > { %3431 = vmatprep.subr.bf16.mxu1 %v3756_v50  ;;  %v3829_v50 = vld [vmem:[%s4593_s1 + $0x618] sm:$0xff]  }
  0x99   : > { %3404 = vmatpush3.bf16.msra.mxu0 %v3755_v49  ;;  %v3826_v49 = vld [vmem:[%s4008_s22 + $0x124] ss:$100 sps:$4 sm:$0xff]  }
  0x9a   : > { %3432 = vmatpush3.bf16.msra.mxu1 %v3757_v51  ;;  %3405 = vmatprep.subr.bf16.mxu0 %v3758_v52  ;;  %v3828_v51 = vld [vmem:[%s4008_s22 + $0x120] ss:$100 sps:$4 sm:$0xff]  }
  0x9b   : > { %3433 = vmatprep.subr.bf16.mxu1 %v3760_v54  ;;  %v3830_v52 = vld [vmem:[%s4593_s1 + $0x620] sm:$0xff]   ;;  %v3831_v54 = vld [vmem:[%s4593_s1 + $0x628] sm:$0xff]  }
  0x9d   : > { %3406 = vmatpush3.bf16.msra.mxu0 %v3759_v53  ;;  %v3834_v53 = vld [vmem:[%s4008_s22 + $0x60] ss:$100 sps:$4 sm:$0xff]  }
  0x9e   : > { %3434 = vmatpush3.bf16.msra.mxu1 %v3761_v55  ;;  %3407 = vmatprep.subr.bf16.mxu0 %v3762_v56  ;;  %v3832_v55 = vld [vmem:[%s4593_s1 + $0x630] sm:$0xff]   ;;  %v3833_v56 = vld [vmem:[%s4593_s1 + $0x638] sm:$0xff]  }
  0x9f   : > { %3435 = vmatprep.subr.bf16.mxu1 %v3764_v58 }
  0xa1   : > { %3408 = vmatpush3.bf16.msra.mxu0 %v3763_v57 }
  0xa2   : > { %3436 = vmatpush3.bf16.msra.mxu1 %v3765_v59  ;;  %3409 = vmatprep.subr.bf16.mxu0 %v3766_v60 }
  0xa3   : > { %3437 = vmatprep.subr.bf16.mxu1 %v3768_v62 }
  0xa5   : > { %3410 = vmatpush3.bf16.msra.mxu0 %v3767_v61 }
  0xa6   : > { %3438 = vmatpush3.bf16.msra.mxu1 %v3772_v1  ;;  %3451 = vmatprep.subr.bf16.mxu0 %v3773_v2 }
  0xa7   : > { %3479 = vmatprep.subr.bf16.mxu1 %v3778_v6 }
  0xa8   : > { %2587 = vmatmul.mubr.bf16.vlgmr.msra.gmra.mrb[32].mxu0 %v3769_v63  ;;  %v3835_v63 = vld [vmem:[%s4008_s22 + $0x128] ss:$100 sps:$4 sm:$0xff]  }
  0xa9   : > { %3452 = vmatpush3.bf16.msra.mxu0 %v3777_v5  ;;  %2636 = vmatmul.mubr.bf16.vlgmr.msra.gmra.mrb[32].mxu1 %v3774_v3 }
  0xaa   : > { %3480 = vmatpush3.bf16.msra.mxu1 %v3779_v7  ;;  %3453 = vmatprep.subr.bf16.mxu0 %v3780_v8 }
  0xab   : > { %3481 = vmatprep.subr.bf16.mxu1 %v3782_v10  ;;  %2594 = vmatprep.mubr.bf16.mxu0 %v3783_v11 }
  0xac   : > { %2643 = vmatprep.mubr.bf16.mxu1 %v3788_v15 }
  0xad   : > { %3454 = vmatpush3.bf16.msra.mxu0 %v3781_v9 }
  0xae   : > { %3482 = vmatpush3.bf16.msra.mxu1 %v3785_v12  ;;  %3455 = vmatprep.subr.bf16.mxu0 %v3787_v14 }
  0xaf   : > { %3483 = vmatprep.subr.bf16.mxu1 %v3792_v18 }
  0xb0   : > { %2595 = vmatmul.mubr.bf16.gmra.mrb[36].mxu0 %v3786_v13 }
  0xb1   : > { %3456 = vmatpush3.bf16.msra.mxu0 %v3790_v16  ;;  %2644 = vmatmul.mubr.bf16.gmra.mrb[36].mxu1 %v3791_v17 }
  0xb2   : > { %3484 = vmatpush3.bf16.msra.mxu1 %v3793_v19  ;;  %3457 = vmatprep.subr.bf16.mxu0 %v3794_v20 }
  0xb3   : > { %3485 = vmatprep.subr.bf16.mxu1 %v3796_v22  ;;  %2684 = vmatprep.mubr.bf16.mxu0 %v3815_v40 }
  0xb4   : > { %2733 = vmatprep.mubr.bf16.mxu1 %v3820_v44 }
  0xb5   : > { %3458 = vmatpush3.bf16.msra.mxu0 %v3795_v21 }
  0xb6   : > { %3486 = vmatpush3.bf16.msra.mxu1 %v3797_v23  ;;  %3459 = vmatprep.subr.bf16.mxu0 %v3798_v24 }
  0xb7   : > { %3487 = vmatprep.subr.bf16.mxu1 %v3800_v26 }
  0xb9   : > { %3460 = vmatpush3.bf16.msra.mxu0 %v3799_v25 }
  0xba   : > { %3488 = vmatpush3.bf16.msra.mxu1 %v3801_v27  ;;  %3461 = vmatprep.subr.bf16.mxu0 %v3802_v28 }
  0xbb   : > { %3489 = vmatprep.subr.bf16.mxu1 %v3804_v30 }
  0xbd   : > { %3462 = vmatpush3.bf16.msra.mxu0 %v3803_v29 }
  0xbe   : > { %3490 = vmatpush3.bf16.msra.mxu1 %v3805_v31  ;;  %3463 = vmatprep.subr.bf16.mxu0 %v3806_v32 }
  0xbf   : > { %3491 = vmatprep.subr.bf16.mxu1 %v3808_v34 }
  0xc1   : > { %3464 = vmatpush3.bf16.msra.mxu0 %v3807_v33 }
  0xc2   : > { %3492 = vmatpush3.bf16.msra.mxu1 %v3809_v35  ;;  %3465 = vmatprep.subr.bf16.mxu0 %v3810_v36 }
  0xc3   : > { %3493 = vmatprep.subr.bf16.mxu1 %v3812_v38 }
  0xc5   : > { %3466 = vmatpush3.bf16.msra.mxu0 %v3811_v37 }
  0xc6   : > { %3494 = vmatpush3.bf16.msra.mxu1 %v3816_v41  ;;  %3517 = vmatprep.subr.bf16.mxu0 %v3817_v42 }
  0xc8   : > { %2685 = vmatmul.mubr.bf16.vlgmr.msra.gmra.mrb[40].mxu0 %v3813_v39 }
  0xc9   : > { %3518 = vmatpush3.bf16.msra.mxu0 %v3817_v42  ;;  %2734 = vmatmul.mubr.bf16.vlgmr.msra.gmra.mrb[40].mxu1 %v3818_v43 }
  0xca   : > { %3519 = vmatprep.subr.bf16.mxu0 %v3821_v45  ;;  %2692 = vmatprep.mubr.bf16.mxu0 %v3822_v46 }
  0xcb   : > { %2741 = vmatprep.mubr.bf16.mxu1 %v3826_v49 }
  0xcd   : > { %3520 = vmatpush3.bf16.msra.mxu0 %v3821_v45 }
  0xce   : > { %3521 = vmatprep.subr.bf16.mxu0 %v3825_v48 }
  0xd0   : > { %2693 = vmatmul.mubr.bf16.gmra.mrb[44].mxu0 %v3824_v47 }
  0xd1   : > { %3522 = vmatpush3.bf16.msra.mxu0 %v3825_v48  ;;  %2742 = vmatmul.mubr.bf16.gmra.mrb[44].mxu1 %v3828_v51 }
  0xd2   : > { %3523 = vmatprep.subr.bf16.mxu0 %v3829_v50  ;;  %3533 = vmatprep.mubr.bf16.mxu0 %v3834_v53 }
  0xd5   : > { %3524 = vmatpush3.bf16.msra.mxu0 %v3829_v50 }
  0xd6   : > { %3525 = vmatprep.subr.bf16.mxu0 %v3830_v52 }
  0xd9   : > { %3526 = vmatpush3.bf16.msra.mxu0 %v3830_v52 }
  0xda   : > { %3527 = vmatprep.subr.bf16.mxu0 %v3831_v54 }
  0xdd   : > { %3528 = vmatpush3.bf16.msra.mxu0 %v3831_v54 }
  0xde   : > { %3529 = vmatprep.subr.bf16.mxu0 %v3832_v55 }
  0xe1   : > { %3530 = vmatpush3.bf16.msra.mxu0 %v3832_v55 }
  0xe2   : > { %3531 = vmatprep.subr.bf16.mxu0 %v3833_v56 }
  0xe5   : > { %3532 = vmatpush3.bf16.msra.mxu0 %v3833_v56 }
  0xe8   : > { %3534 = vmatmul.mubr.bf16.vlgmr.msra.gmra.mrb[48].mxu0 %v3835_v63 }
  0xfb   : > { %v3187_v57 = vpop.f32.mrb[0].mxu0 }
  0xfc   : > { %v3215_v58 = vpop.f32.mrb[0].mxu1  ;;  %v3188_v59 = vpop.f32.mrb[1].mxu0 }
  0xfd   : > { %v3189_v60 = vadd.f32 %v3188_v59, %v3187_v57  ;;  %v3216_v61 = vpop.f32.mrb[1].mxu1  ;;  %v3190_v62 = vpop.f32.mrb[2].mxu0 }
  0xfe   : > { %v3217_v0 = vadd.f32 %v3216_v61, %v3215_v58  ;;  %v3218_v1 = vpop.f32.mrb[2].mxu1  ;;  %v3191_v2 = vpop.f32.mrb[3].mxu0 }
  0xff   : > { %v3192_v3 = vadd.f32 %v3191_v2, %v3190_v62  ;;  %v3219_v4 = vpop.f32.mrb[3].mxu1 }
 0x100   : > { %v2246_v5 = vadd.f32 %v3217_v0, %v3189_v60  ;;  %v3220_v6 = vadd.f32 %v3219_v4, %v3218_v1 }
 0x102   : > { %v2249_v7 = vadd.f32 %v3220_v6, %v3192_v3 }
 0x103   : > { %v3193_v8 = vpop.f32.mrb[4].mxu0 }
 0x104   : > { %v3221_v9 = vpop.f32.mrb[4].mxu1  ;;  %v3194_v10 = vpop.f32.mrb[5].mxu0 }
 0x105   : > { %v3222_v11 = vpop.f32.mrb[5].mxu1  ;;  %v3195_v12 = vadd.f32 %v3194_v10, %v3193_v8  ;;  %v3196_v14 = vpop.f32.mrb[6].mxu0 }
 0x106   : > { %v3223_v13 = vadd.f32 %v3222_v11, %v3221_v9  ;;  %v3224_v15 = vpop.f32.mrb[6].mxu1  ;;  %v3197_v16 = vpop.f32.mrb[7].mxu0 }
 0x107   : > { %v3225_v17 = vpop.f32.mrb[7].mxu1  ;;  %v3198_v19 = vadd.f32 %v3197_v16, %v3196_v14 }
 0x108   : > { %v2254_v18 = vadd.f32 %v3223_v13, %v3195_v12  ;;  %v3226_v20 = vadd.f32 %v3225_v17, %v3224_v15 }
 0x10a   : > { %v2257_v21 = vadd.f32 %v3226_v20, %v3198_v19 }
 0x11b   : > { %v3243_v22 = vpop.f32.mrb[8].mxu0 }
 0x11c   : > { %v3244_v23 = vpop.f32.mrb[9].mxu0  ;;  %v3271_v26 = vpop.f32.mrb[8].mxu1 }
 0x11d   : > { %v3245_v24 = vadd.f32 %v3244_v23, %v3243_v22  ;;  %v3246_v25 = vpop.f32.mrb[10].mxu0  ;;  %v3272_v30 = vpop.f32.mrb[9].mxu1 }
 0x11e   : > { %v3247_v27 = vpop.f32.mrb[11].mxu0  ;;  %v3273_v31 = vadd.f32 %v3272_v30, %v3271_v26  ;;  %v3274_v32 = vpop.f32.mrb[10].mxu1 }
 0x11f   : > { %v2295_v28 = vadd.f32 %v3245_v24, %v2246_v5  ;;  %v3248_v29 = vadd.f32 %v3247_v27, %v3246_v25  ;;  %v3275_v34 = vpop.f32.mrb[11].mxu1 }
 0x120   : > { %v3276_v36 = vadd.f32 %v3275_v34, %v3274_v32 }
 0x121   : > { %v2298_v33 = vadd.f32 %v3248_v29, %v2249_v7  ;;  %v2344_v35 = vadd.f32 %v3273_v31, %v2295_v28 }
 0x123   : > { %v2347_v37 = vadd.f32 %v3276_v36, %v2298_v33  ;;  %v3249_v38 = vpop.f32.mrb[12].mxu0 }
 0x124   : > { %v3250_v39 = vpop.f32.mrb[13].mxu0  ;;  %v3277_v42 = vpop.f32.mrb[12].mxu1 }
 0x125   : > { %v3251_v40 = vadd.f32 %v3250_v39, %v3249_v38  ;;  %v3252_v41 = vpop.f32.mrb[14].mxu0  ;;  %v3278_v46 = vpop.f32.mrb[13].mxu1 }
 0x126   : > { %v3253_v43 = vpop.f32.mrb[15].mxu0  ;;  %v3279_v47 = vadd.f32 %v3278_v46, %v3277_v42  ;;  %v3280_v48 = vpop.f32.mrb[14].mxu1 }
 0x127   : > { %v2303_v44 = vadd.f32 %v3251_v40, %v2254_v18  ;;  %v3254_v45 = vadd.f32 %v3253_v43, %v3252_v41  ;;  %v3281_v50 = vpop.f32.mrb[15].mxu1 }
 0x128   : > { %v3282_v52 = vadd.f32 %v3281_v50, %v3280_v48 }
 0x129   : > { %v2306_v49 = vadd.f32 %v3254_v45, %v2257_v21  ;;  %v2352_v51 = vadd.f32 %v3279_v47, %v2303_v44 }
 0x12b   : > { %v2355_v53 = vadd.f32 %v3282_v52, %v2306_v49 }
 0x13b   : > { %v3299_v54 = vpop.f32.mrb[16].mxu0 }
 0x13c   : > { %v3300_v55 = vpop.f32.mrb[17].mxu0  ;;  %v3327_v60 = vpop.f32.mrb[16].mxu1 }
 0x13d   : > { %v3301_v56 = vadd.f32 %v3300_v55, %v3299_v54  ;;  %v3302_v57 = vpop.f32.mrb[18].mxu0  ;;  %v3328_v62 = vpop.f32.mrb[17].mxu1 }
 0x13e   : > { %v3303_v58 = vpop.f32.mrb[19].mxu0  ;;  %v3329_v0 = vadd.f32 %v3328_v62, %v3327_v60  ;;  %v3330_v1 = vpop.f32.mrb[18].mxu1 }
 0x13f   : > { %v2393_v59 = vadd.f32 %v3301_v56, %v2344_v35  ;;  %v3304_v61 = vadd.f32 %v3303_v58, %v3302_v57  ;;  %v3331_v2 = vpop.f32.mrb[19].mxu1 }
 0x140   : > { %v3332_v4 = vadd.f32 %v3331_v2, %v3330_v1 }
 0x141   : > { %v2396_v63 = vadd.f32 %v3304_v61, %v2347_v37  ;;  %v2442_v3 = vadd.f32 %v3329_v0, %v2393_v59 }
 0x143   : > { %v2445_v5 = vadd.f32 %v3332_v4, %v2396_v63  ;;  %v3305_v6 = vpop.f32.mrb[20].mxu0 }
 0x144   : > { %v3306_v7 = vpop.f32.mrb[21].mxu0  ;;  %v3333_v10 = vpop.f32.mrb[20].mxu1 }
 0x145   : > { %v3307_v8 = vadd.f32 %v3306_v7, %v3305_v6  ;;  %v3308_v9 = vpop.f32.mrb[22].mxu0  ;;  %v3334_v14 = vpop.f32.mrb[21].mxu1 }
 0x146   : > { %v3309_v11 = vpop.f32.mrb[23].mxu0  ;;  %v3335_v15 = vadd.f32 %v3334_v14, %v3333_v10  ;;  %v3336_v16 = vpop.f32.mrb[22].mxu1 }
 0x147   : > { %v2401_v12 = vadd.f32 %v3307_v8, %v2352_v51  ;;  %v3310_v13 = vadd.f32 %v3309_v11, %v3308_v9  ;;  %v3337_v18 = vpop.f32.mrb[23].mxu1 }
 0x148   : > { %v3338_v20 = vadd.f32 %v3337_v18, %v3336_v16 }
 0x149   : > { %v2404_v17 = vadd.f32 %v3310_v13, %v2355_v53  ;;  %v2450_v19 = vadd.f32 %v3335_v15, %v2401_v12 }
 0x14b   : > { %v2453_v21 = vadd.f32 %v3338_v20, %v2404_v17 }
 0x15b   : > { %v3355_v22 = vpop.f32.mrb[24].mxu0 }
 0x15c   : > { %v3356_v23 = vpop.f32.mrb[25].mxu0  ;;  %v3383_v26 = vpop.f32.mrb[24].mxu1 }
 0x15d   : > { %v3357_v24 = vadd.f32 %v3356_v23, %v3355_v22  ;;  %v3358_v25 = vpop.f32.mrb[26].mxu0  ;;  %v3384_v30 = vpop.f32.mrb[25].mxu1 }
 0x15e   : > { %v3359_v27 = vpop.f32.mrb[27].mxu0  ;;  %v3385_v31 = vadd.f32 %v3384_v30, %v3383_v26  ;;  %v3386_v32 = vpop.f32.mrb[26].mxu1 }
 0x15f   : > { %v2491_v28 = vadd.f32 %v3357_v24, %v2442_v3  ;;  %v3360_v29 = vadd.f32 %v3359_v27, %v3358_v25  ;;  %v3387_v34 = vpop.f32.mrb[27].mxu1 }
 0x160   : > { %v3388_v36 = vadd.f32 %v3387_v34, %v3386_v32 }
 0x161   : > { %v2494_v33 = vadd.f32 %v3360_v29, %v2445_v5  ;;  %v2540_v35 = vadd.f32 %v3385_v31, %v2491_v28 }
 0x163   : > { %v2543_v37 = vadd.f32 %v3388_v36, %v2494_v33  ;;  %v3361_v38 = vpop.f32.mrb[28].mxu0 }
 0x164   : > { %v3362_v39 = vpop.f32.mrb[29].mxu0  ;;  %v3389_v44 = vpop.f32.mrb[28].mxu1 }
 0x165   : > { %v3363_v40 = vadd.f32 %v3362_v39, %v3361_v38  ;;  %v3364_v41 = vpop.f32.mrb[30].mxu0  ;;  %v3390_v46 = vpop.f32.mrb[29].mxu1 }
 0x166   : > { %v3365_v42 = vpop.f32.mrb[31].mxu0  ;;  %v3391_v48 = vadd.f32 %v3390_v46, %v3389_v44  ;;  %v3392_v49 = vpop.f32.mrb[30].mxu1 }
 0x167   : > { %v2499_v43 = vadd.f32 %v3363_v40, %v2450_v19  ;;  %v3366_v45 = vadd.f32 %v3365_v42, %v3364_v41  ;;  %v3393_v50 = vpop.f32.mrb[31].mxu1 }
 0x168   : > { %v3394_v52 = vadd.f32 %v3393_v50, %v3392_v49 }
 0x169   : > { %v2502_v47 = vadd.f32 %v3366_v45, %v2453_v21  ;;  %v2548_v51 = vadd.f32 %v3391_v48, %v2499_v43 }
 0x16b   : > { %v2551_v53 = vadd.f32 %v3394_v52, %v2502_v47 }
 0x17b   : > { %v3411_v54 = vpop.f32.mrb[32].mxu0 }
 0x17c   : > { %v3412_v55 = vpop.f32.mrb[33].mxu0  ;;  %v3439_v58 = vpop.f32.mrb[32].mxu1 }
 0x17d   : > { %v3413_v56 = vadd.f32 %v3412_v55, %v3411_v54  ;;  %v3414_v57 = vpop.f32.mrb[34].mxu0  ;;  %v3440_v62 = vpop.f32.mrb[33].mxu1 }
 0x17e   : > { %v3415_v59 = vpop.f32.mrb[35].mxu0  ;;  %v3441_v63 = vadd.f32 %v3440_v62, %v3439_v58  ;;  %v3442_v0 = vpop.f32.mrb[34].mxu1 }
 0x17f   : > { %v2589_v60 = vadd.f32 %v3413_v56, %v2540_v35  ;;  %v3416_v61 = vadd.f32 %v3415_v59, %v3414_v57  ;;  %v3443_v2 = vpop.f32.mrb[35].mxu1 }
 0x180   : > { %v3444_v4 = vadd.f32 %v3443_v2, %v3442_v0  ;;  %v3166_v0 = vld [vmem:[%s4594_s2] ss:$0 sm:$0xff] }
 0x181   : > { %v2592_v1 = vadd.f32 %v3416_v61, %v2543_v37  ;;  %v2638_v3 = vadd.f32 %v3441_v63, %v2589_v60 }
 0x183   : > { %v2641_v5 = vadd.f32 %v3444_v4, %v2592_v1  ;;  %v3417_v6 = vpop.f32.mrb[36].mxu0 }
 0x184   : > { %v3418_v7 = vpop.f32.mrb[37].mxu0  ;;  %v3445_v10 = vpop.f32.mrb[36].mxu1 }
 0x185   : > { %v3419_v8 = vadd.f32 %v3418_v7, %v3417_v6  ;;  %v3420_v9 = vpop.f32.mrb[38].mxu0  ;;  %v3446_v14 = vpop.f32.mrb[37].mxu1 }
 0x186   : > { %v3421_v11 = vpop.f32.mrb[39].mxu0  ;;  %v3447_v15 = vadd.f32 %v3446_v14, %v3445_v10  ;;  %v3448_v16 = vpop.f32.mrb[38].mxu1 }
 0x187   : > { %v2597_v12 = vadd.f32 %v3419_v8, %v2548_v51  ;;  %v3422_v13 = vadd.f32 %v3421_v11, %v3420_v9  ;;  %v3449_v18 = vpop.f32.mrb[39].mxu1 }
 0x188   : > { %v3450_v20 = vadd.f32 %v3449_v18, %v3448_v16 }
 0x189   : > { %v2600_v17 = vadd.f32 %v3422_v13, %v2551_v53  ;;  %v2646_v19 = vadd.f32 %v3447_v15, %v2597_v12 }
 0x18b   : > { %v2649_v21 = vadd.f32 %v3450_v20, %v2600_v17 }
 0x19b   : > { %v3467_v22 = vpop.f32.mrb[40].mxu0 }
 0x19c   : > { %v3468_v23 = vpop.f32.mrb[41].mxu0  ;;  %v3495_v28 = vpop.f32.mrb[40].mxu1 }
 0x19d   : > { %v3469_v24 = vadd.f32 %v3468_v23, %v3467_v22  ;;  %v3470_v25 = vpop.f32.mrb[42].mxu0  ;;  %v3496_v30 = vpop.f32.mrb[41].mxu1 }
 0x19e   : > { %v3471_v26 = vpop.f32.mrb[43].mxu0  ;;  %v3497_v32 = vadd.f32 %v3496_v30, %v3495_v28  ;;  %v3498_v33 = vpop.f32.mrb[42].mxu1 }
 0x19f   : > { %v2687_v27 = vadd.f32 %v3469_v24, %v2638_v3  ;;  %v3472_v29 = vadd.f32 %v3471_v26, %v3470_v25  ;;  %v3499_v34 = vpop.f32.mrb[43].mxu1  ;;  %v3167_v3 = vld [vmem:[%s4595_s3] ss:$0 sm:$0xff] }
 0x1a0   : > { %v3500_v35 = vadd.f32 %v3499_v34, %v3498_v33 }
 0x1a1   : > { %v2690_v31 = vadd.f32 %v3472_v29, %v2641_v5  ;;  %v2736_v37 = vadd.f32 %v3497_v32, %v2687_v27  ;;  %v3168_v5 = vld [vmem:[%s4596_s4] ss:$0 sm:$0xff] }
 0x1a3   : > { %v3473_v36 = vpop.f32.mrb[44].mxu0  ;;  %v2739_v41 = vadd.f32 %v3500_v35, %v2690_v31 }
 0x1a4   : > { %v3474_v38 = vpop.f32.mrb[45].mxu0  ;;  %v3501_v44 = vpop.f32.mrb[44].mxu1 }
 0x1a5   : > { %v3475_v39 = vadd.f32 %v3474_v38, %v3473_v36  ;;  %v3476_v40 = vpop.f32.mrb[46].mxu0  ;;  %v3502_v46 = vpop.f32.mrb[45].mxu1 }
 0x1a6   : > { %v3477_v42 = vpop.f32.mrb[47].mxu0  ;;  %v3503_v48 = vadd.f32 %v3502_v46, %v3501_v44  ;;  %v3504_v49 = vpop.f32.mrb[46].mxu1 }
 0x1a7   : > { %v2695_v43 = vadd.f32 %v3475_v39, %v2646_v19  ;;  %v3478_v45 = vadd.f32 %v3477_v42, %v3476_v40  ;;  %v3505_v50 = vpop.f32.mrb[47].mxu1 }
 0x1a8   : > { %v3506_v51 = vadd.f32 %v3505_v50, %v3504_v49 }
 0x1a9   : > { %v2698_v47 = vadd.f32 %v3478_v45, %v2649_v21  ;;  %v2744_v52 = vadd.f32 %v3503_v48, %v2695_v43 }
 0x1ab   : > { %v2747_v53 = vadd.f32 %v3506_v51, %v2698_v47 }
 0x1bb   : > { %v3535_v54 = vpop.f32.mrb[48].mxu0 }
 0x1bc   : > { %v2793_v55 = vadd.f32 %v3535_v54, %v2744_v52  ;;  %v2784_v56 = vpop.f32.mrb[49].mxu0 }
 0x1bd   : > { %v2785_v57 = vadd.f32 %v2784_v56, %v2736_v37  ;;  %v3536_v58 = vpop.f32.mrb[50].mxu0 }
 0x1be   : > { %v2796_v59 = vadd.f32 %v3536_v58, %v2747_v53  ;;  %v2787_v60 = vpop.f32.mrb[51].mxu0 }
 0x1bf   : > { %v2788_v61 = vadd.f32 %v2787_v60, %v2739_v41 }
 0x1c0   : > { %v2800_v62 = vmax.f32 %v2793_v55, %v2796_v59 }
 0x1c1   : > { %v2799_v63 = vmax.f32 %v2785_v57, %v2788_v61 }
 0x1c3   : > { %v2801_v1 = vmax.f32 %v2799_v63, %v2800_v62 }
 0x1c5   : > { %v2809_v2 = vadd.f32 %v3166_v0, %v2801_v1 }
 0x1c7   : > { %v2810_v4 = vmax.f32 %v2809_v2, 0.0 }
 0x1c9   : > { %v2818_v6 = vmul.f32 %v3167_v3, %v2810_v4 }
 0x1cb   : > { %v2826_v7 = vadd.f32 %v3168_v5, %v2818_v6 }
 0x1cd   : > { %v2827_v8 = vpack.c.bf16 %v2826_v7, %v2826_v7 }
 0x1cf   : > { %2828 = vst [vmem:[%s256_s6] sm:$0xf] %v2827_v8 }
 0x1d0 PF: > { %s15_s20 = sadd.s32 1, %s3858_s20   ;;  %s4598_s18 = smov %s3854_s19 }
 0x1d1   : > { %p12_p5 = scmp.ge.s32.totalorder %s15_s20, 4   ;;  %s4599_s19 = smov %s4601_s21 }
 0x1d3   :  { %14 = sbr.rel (!%p12_p5) target bundleno = 2 (0x2), region = 70 }

// kernel: convnet_forward.5
= control target key start
LH: loop header
LB: loop body
LE: loop exit
PB: predicated region body
PF: predicated region fallthrough
CT: control target
= control target key end

     0   :  { %s4017_s1 = inlined_call_operand.vmem [shape: bf16[1024,512], index: 1, kind: input, shape index: {}]   ;;  %s4018_s0 = inlined_call_operand.vmem [shape: bf16[8,1024], index: 0, kind: input, shape index: {}]   ;;  %s4019_s3 = inlined_call_operand.vmem [shape: bf16[512,128], index: 3, kind: input, shape index: {}]   ;;  %s4020_s2 = inlined_call_operand.vmem [shape: f32[1,512], index: 2, kind: input, shape index: {}]   ;;  %s4021_s4 = inlined_call_operand.vmem [shape: f32[1,128], index: 4, kind: input, shape index: {}]   ;;  %s4022_s5 = inlined_call_operand.vmem [shape: f32[8,128], index: 5, kind: output, shape index: {}]  }
   0x1   :  { %v2660_v0 = vld [vmem:[%s4017_s1 + $0x4] ss:$16 sps:$4 sm:$0xff]   ;;  %v2662_v1 = vld [vmem:[%s4017_s1 + $0xc] ss:$16 sps:$4 sm:$0xff]   ;;  %v2664_v2 = vld [vmem:[%s4017_s1] ss:$16 sps:$4 sm:$0xff]  }
   0x2   :  { %1611 = vmatprep.subr.bf16.mxu0 %v2660_v0  ;;  %v2665_v3 = vld [vmem:[%s4017_s1 + $0x8] ss:$16 sps:$4 sm:$0xff]   ;;  %1775 = vmatprep.subr.bf16.mxu1 %v2662_v1  ;;  %v2666_v4 = vld [vmem:[%s4017_s1 + $0x24] ss:$16 sps:$4 sm:$0xff]   ;;  %v2668_v5 = vld [vmem:[%s4017_s1 + $0x2c] ss:$16 sps:$4 sm:$0xff]  }
   0x3   :  { %1612 = vmatpush1.bf16.msra.mxu0 %v2664_v2  ;;  %1776 = vmatpush1.bf16.msra.mxu1 %v2665_v3  ;;  %v2670_v6 = vld [vmem:[%s4017_s1 + $0x20] ss:$16 sps:$4 sm:$0xff]   ;;  %v2671_v7 = vld [vmem:[%s4017_s1 + $0x28] ss:$16 sps:$4 sm:$0xff]   ;;  %v2672_v8 = vld [vmem:[%s4017_s1 + $0x44] ss:$16 sps:$4 sm:$0xff]  }
   0x4   :  { %1613 = vmatprep.subr.bf16.mxu0 %v2666_v4  ;;  %1777 = vmatprep.subr.bf16.mxu1 %v2668_v5  ;;  %v2674_v9 = vld [vmem:[%s4017_s1 + $0x4c] ss:$16 sps:$4 sm:$0xff]   ;;  %v2676_v10 = vld [vmem:[%s4017_s1 + $0x40] ss:$16 sps:$4 sm:$0xff]   ;;  %v2677_v11 = vld [vmem:[%s4017_s1 + $0x48] ss:$16 sps:$4 sm:$0xff]  }
   0x5   :  { %v2678_v12 = vld [vmem:[%s4017_s1 + $0x64] ss:$16 sps:$4 sm:$0xff]   ;;  %v2680_v13 = vld [vmem:[%s4017_s1 + $0x6c] ss:$16 sps:$4 sm:$0xff]   ;;  %v2682_v14 = vld [vmem:[%s4017_s1 + $0x60] ss:$16 sps:$4 sm:$0xff]  }
   0x6   :  { %v2683_v15 = vld [vmem:[%s4017_s1 + $0x68] ss:$16 sps:$4 sm:$0xff]   ;;  %v2684_v16 = vld [vmem:[%s4017_s1 + $0x84] ss:$16 sps:$4 sm:$0xff]   ;;  %v2686_v17 = vld [vmem:[%s4017_s1 + $0x8c] ss:$16 sps:$4 sm:$0xff]  }
   0x7   :  { %1614 = vmatpush1.bf16.msra.mxu0 %v2670_v6  ;;  %1778 = vmatpush1.bf16.msra.mxu1 %v2671_v7  ;;  %v2688_v18 = vld [vmem:[%s4017_s1 + $0x80] ss:$16 sps:$4 sm:$0xff]   ;;  %v2689_v19 = vld [vmem:[%s4017_s1 + $0x88] ss:$16 sps:$4 sm:$0xff]   ;;  %v2690_v20 = vld [vmem:[%s4017_s1 + $0xa4] ss:$16 sps:$4 sm:$0xff]  }
   0x8   :  { %1615 = vmatprep.subr.bf16.mxu0 %v2672_v8  ;;  %1779 = vmatprep.subr.bf16.mxu1 %v2674_v9  ;;  %v2692_v21 = vld [vmem:[%s4017_s1 + $0xac] ss:$16 sps:$4 sm:$0xff]   ;;  %v2694_v22 = vld [vmem:[%s4017_s1 + $0xa0] ss:$16 sps:$4 sm:$0xff]   ;;  %v2695_v23 = vld [vmem:[%s4017_s1 + $0xa8] ss:$16 sps:$4 sm:$0xff]  }
   0x9   :  { %v2696_v24 = vld [vmem:[%s4017_s1 + $0xc4] ss:$16 sps:$4 sm:$0xff]   ;;  %v2698_v25 = vld [vmem:[%s4017_s1 + $0xcc] ss:$16 sps:$4 sm:$0xff]   ;;  %v2700_v26 = vld [vmem:[%s4017_s1 + $0xc0] ss:$16 sps:$4 sm:$0xff]  }
   0xa   :  { %v2701_v27 = vld [vmem:[%s4017_s1 + $0xc8] ss:$16 sps:$4 sm:$0xff]   ;;  %v2702_v28 = vld [vmem:[%s4017_s1 + $0xe4] ss:$16 sps:$4 sm:$0xff]   ;;  %v2704_v29 = vld [vmem:[%s4017_s1 + $0xec] ss:$16 sps:$4 sm:$0xff]  }
   0xb   :  { %1616 = vmatpush1.bf16.msra.mxu0 %v2676_v10  ;;  %1780 = vmatpush1.bf16.msra.mxu1 %v2677_v11  ;;  %v2706_v30 = vld [vmem:[%s4017_s1 + $0xe0] ss:$16 sps:$4 sm:$0xff]   ;;  %v2707_v31 = vld [vmem:[%s4017_s1 + $0xe8] ss:$16 sps:$4 sm:$0xff]   ;;  %v2708_v32 = vld [vmem:[%s4017_s1 + $0x104] ss:$16 sps:$4 sm:$0xff]  }
   0xc   :  { %1617 = vmatprep.subr.bf16.mxu0 %v2678_v12  ;;  %1781 = vmatprep.subr.bf16.mxu1 %v2680_v13  ;;  %v2710_v33 = vld [vmem:[%s4017_s1 + $0x10c] ss:$16 sps:$4 sm:$0xff]   ;;  %v2712_v34 = vld [vmem:[%s4017_s1 + $0x100] ss:$16 sps:$4 sm:$0xff]   ;;  %v2713_v35 = vld [vmem:[%s4017_s1 + $0x108] ss:$16 sps:$4 sm:$0xff]  }
   0xd   :  { %v2714_v36 = vld [vmem:[%s4017_s1 + $0x124] ss:$16 sps:$4 sm:$0xff]   ;;  %v2716_v37 = vld [vmem:[%s4017_s1 + $0x12c] ss:$16 sps:$4 sm:$0xff]   ;;  %v2718_v38 = vld [vmem:[%s4017_s1 + $0x120] ss:$16 sps:$4 sm:$0xff]  }
   0xe   :  { %v2719_v39 = vld [vmem:[%s4017_s1 + $0x128] ss:$16 sps:$4 sm:$0xff]   ;;  %v2720_v40 = vld [vmem:[%s4017_s1 + $0x144] ss:$16 sps:$4 sm:$0xff]   ;;  %v2722_v41 = vld [vmem:[%s4017_s1 + $0x14c] ss:$16 sps:$4 sm:$0xff]  }
   0xf   :  { %1618 = vmatpush1.bf16.msra.mxu0 %v2682_v14  ;;  %1782 = vmatpush1.bf16.msra.mxu1 %v2683_v15  ;;  %v2724_v42 = vld [vmem:[%s4017_s1 + $0x140] ss:$16 sps:$4 sm:$0xff]   ;;  %v2725_v43 = vld [vmem:[%s4017_s1 + $0x148] ss:$16 sps:$4 sm:$0xff]   ;;  %v2726_v44 = vld [vmem:[%s4017_s1 + $0x164] ss:$16 sps:$4 sm:$0xff]  }
  0x10   :  { %1619 = vmatprep.subr.bf16.mxu0 %v2684_v16  ;;  %1783 = vmatprep.subr.bf16.mxu1 %v2686_v17  ;;  %v2728_v45 = vld [vmem:[%s4017_s1 + $0x16c] ss:$16 sps:$4 sm:$0xff]   ;;  %v21_v46 = vld [vmem:[%s4018_s0] sm:$0xff]  ;;  %v2731_v49 = vld [vmem:[%s4017_s1 + $0x168] ss:$16 sps:$4 sm:$0xff]  }
  0x11   :  { %v2730_v47 = vld [vmem:[%s4017_s1 + $0x160] ss:$16 sps:$4 sm:$0xff]   ;;  %v2292_v48 = vcombine.high %v21_v46, %v21_v46  ;;  %v2732_v50 = vld [vmem:[%s4017_s1 + $0x184] ss:$16 sps:$4 sm:$0xff]   ;;  %v2734_v51 = vld [vmem:[%s4017_s1 + $0x18c] ss:$16 sps:$4 sm:$0xff]   ;;  %v2291_v4 = vcombine.low %v21_v46, %v21_v46 }
  0x12   :  { %v2736_v52 = vld [vmem:[%s4017_s1 + $0x180] ss:$16 sps:$4 sm:$0xff]   ;;  %v2737_v53 = vld [vmem:[%s4017_s1 + $0x188] ss:$16 sps:$4 sm:$0xff]   ;;  %v2738_v54 = vld [vmem:[%s4017_s1 + $0x1a4] ss:$16 sps:$4 sm:$0xff]  }
  0x13   :  { %1620 = vmatpush1.bf16.msra.mxu0 %v2688_v18  ;;  %1784 = vmatpush1.bf16.msra.mxu1 %v2689_v19  ;;  %v2740_v55 = vld [vmem:[%s4017_s1 + $0x1ac] ss:$16 sps:$4 sm:$0xff]   ;;  %v2742_v56 = vld [vmem:[%s4017_s1 + $0x1a0] ss:$16 sps:$4 sm:$0xff]   ;;  %v2743_v57 = vld [vmem:[%s4017_s1 + $0x1a8] ss:$16 sps:$4 sm:$0xff]  }
  0x14   :  { %1621 = vmatprep.subr.bf16.mxu0 %v2690_v20  ;;  %1785 = vmatprep.subr.bf16.mxu1 %v2692_v21  ;;  %v2744_v58 = vld [vmem:[%s4017_s1 + $0x1c4] ss:$16 sps:$4 sm:$0xff]   ;;  %v2746_v59 = vld [vmem:[%s4017_s1 + $0x1cc] ss:$16 sps:$4 sm:$0xff]   ;;  %v2748_v60 = vld [vmem:[%s4017_s1 + $0x1c0] ss:$16 sps:$4 sm:$0xff]  }
  0x15   :  { %1643 = vmatprep.mubr.bf16.mxu0 %v2292_v48  ;;  %1807 = vmatprep.mubr.bf16.mxu1 %v2292_v48  ;;  %v2749_v61 = vld [vmem:[%s4017_s1 + $0x1c8] ss:$16 sps:$4 sm:$0xff]   ;;  %v2750_v62 = vld [vmem:[%s4017_s1 + $0x1e4] ss:$16 sps:$4 sm:$0xff]   ;;  %v2752_v63 = vld [vmem:[%s4017_s1 + $0x1ec] ss:$16 sps:$4 sm:$0xff]  }
  0x16   :  { %v2754_v0 = vld [vmem:[%s4017_s1 + $0x1e0] ss:$16 sps:$4 sm:$0xff]   ;;  %v2755_v1 = vld [vmem:[%s4017_s1 + $0x1e8] ss:$16 sps:$4 sm:$0xff]   ;;  %v2760_v2 = vld [vmem:[%s4017_s1 + $0x204] ss:$16 sps:$4 sm:$0xff]  }
  0x17   :  { %1622 = vmatpush1.bf16.msra.mxu0 %v2694_v22  ;;  %1786 = vmatpush1.bf16.msra.mxu1 %v2695_v23  ;;  %v2763_v3 = vld [vmem:[%s4017_s1 + $0x20c] ss:$16 sps:$4 sm:$0xff]   ;;  %v2758_v5 = vld [vmem:[%s4017_s1 + $0x200] ss:$16 sps:$4 sm:$0xff]   ;;  %v2761_v6 = vld [vmem:[%s4017_s1 + $0x208] ss:$16 sps:$4 sm:$0xff]  }
  0x18   :  { %1623 = vmatprep.subr.bf16.mxu0 %v2696_v24  ;;  %1787 = vmatprep.subr.bf16.mxu1 %v2698_v25  ;;  %v2766_v7 = vld [vmem:[%s4017_s1 + $0x224] ss:$16 sps:$4 sm:$0xff]   ;;  %v2769_v8 = vld [vmem:[%s4017_s1 + $0x22c] ss:$16 sps:$4 sm:$0xff]   ;;  %v2764_v9 = vld [vmem:[%s4017_s1 + $0x220] ss:$16 sps:$4 sm:$0xff]  }
  0x19   :  { %v2767_v10 = vld [vmem:[%s4017_s1 + $0x228] ss:$16 sps:$4 sm:$0xff]   ;;  %v2772_v11 = vld [vmem:[%s4017_s1 + $0x244] ss:$16 sps:$4 sm:$0xff]   ;;  %v2775_v12 = vld [vmem:[%s4017_s1 + $0x24c] ss:$16 sps:$4 sm:$0xff]  }
  0x1a   :  { %v2770_v13 = vld [vmem:[%s4017_s1 + $0x240] ss:$16 sps:$4 sm:$0xff]   ;;  %v2773_v14 = vld [vmem:[%s4017_s1 + $0x248] ss:$16 sps:$4 sm:$0xff]   ;;  %v2778_v15 = vld [vmem:[%s4017_s1 + $0x264] ss:$16 sps:$4 sm:$0xff]  }
  0x1b   :  { %1624 = vmatpush1.bf16.msra.mxu0 %v2700_v26  ;;  %1788 = vmatpush1.bf16.msra.mxu1 %v2701_v27  ;;  %v2781_v16 = vld [vmem:[%s4017_s1 + $0x26c] ss:$16 sps:$4 sm:$0xff]   ;;  %v2776_v17 = vld [vmem:[%s4017_s1 + $0x260] ss:$16 sps:$4 sm:$0xff]   ;;  %v2779_v18 = vld [vmem:[%s4017_s1 + $0x268] ss:$16 sps:$4 sm:$0xff]  }
  0x1c   :  { %1625 = vmatprep.subr.bf16.mxu0 %v2702_v28  ;;  %1789 = vmatprep.subr.bf16.mxu1 %v2704_v29  ;;  %v2784_v19 = vld [vmem:[%s4017_s1 + $0x284] ss:$16 sps:$4 sm:$0xff]   ;;  %v2787_v20 = vld [vmem:[%s4017_s1 + $0x28c] ss:$16 sps:$4 sm:$0xff]   ;;  %v2782_v21 = vld [vmem:[%s4017_s1 + $0x280] ss:$16 sps:$4 sm:$0xff]  }
  0x1d   :  { %v2785_v22 = vld [vmem:[%s4017_s1 + $0x288] ss:$16 sps:$4 sm:$0xff]   ;;  %v2790_v23 = vld [vmem:[%s4017_s1 + $0x2a4] ss:$16 sps:$4 sm:$0xff]   ;;  %v2793_v24 = vld [vmem:[%s4017_s1 + $0x2ac] ss:$16 sps:$4 sm:$0xff]  }
  0x1e   :  { %v2788_v25 = vld [vmem:[%s4017_s1 + $0x2a0] ss:$16 sps:$4 sm:$0xff]   ;;  %v2791_v26 = vld [vmem:[%s4017_s1 + $0x2a8] ss:$16 sps:$4 sm:$0xff]   ;;  %v2796_v27 = vld [vmem:[%s4017_s1 + $0x2c4] ss:$16 sps:$4 sm:$0xff]  }
  0x1f   :  { %1626 = vmatpush1.bf16.msra.mxu0 %v2706_v30  ;;  %1790 = vmatpush1.bf16.msra.mxu1 %v2707_v31  ;;  %v2799_v28 = vld [vmem:[%s4017_s1 + $0x2cc] ss:$16 sps:$4 sm:$0xff]   ;;  %v2794_v31 = vld [vmem:[%s4017_s1 + $0x2c0] ss:$16 sps:$4 sm:$0xff]   ;;  %v2821_v48 = vld [vmem:[%s4017_s1 + $0x348] ss:$16 sps:$4 sm:$0xff]  }
  0x20   :  { %1627 = vmatprep.subr.bf16.mxu0 %v2708_v32  ;;  %1791 = vmatprep.subr.bf16.mxu1 %v2710_v33  ;;  %v3390_v29 = vld [vmem:[%s4018_s0 + $0x8] sm:$0xff]  ;;  %v2802_v33 = vld [vmem:[%s4017_s1 + $0x2e4] ss:$16 sps:$4 sm:$0xff]  }
  0x21   :  { %v2294_v30 = vcombine.high %v3390_v29, %v3390_v29  ;;  %v2797_v32 = vld [vmem:[%s4017_s1 + $0x2c8] ss:$16 sps:$4 sm:$0xff]   ;;  %v2823_v46 = vld [vmem:[%s4017_s1 + $0x34c] ss:$16 sps:$4 sm:$0xff]  }
  0x23   :  { %1628 = vmatpush1.bf16.msra.mxu0 %v2712_v34  ;;  %1792 = vmatpush1.bf16.msra.mxu1 %v2713_v35  ;;  %v2805_v34 = vld [vmem:[%s4017_s1 + $0x2ec] ss:$16 sps:$4 sm:$0xff]   ;;  %v2800_v35 = vld [vmem:[%s4017_s1 + $0x2e0] ss:$16 sps:$4 sm:$0xff]  }
  0x24   :  { %1629 = vmatprep.subr.bf16.mxu0 %v2714_v36  ;;  %1793 = vmatprep.subr.bf16.mxu1 %v2716_v37  ;;  %v2803_v36 = vld [vmem:[%s4017_s1 + $0x2e8] ss:$16 sps:$4 sm:$0xff]   ;;  %v2808_v37 = vld [vmem:[%s4017_s1 + $0x304] ss:$16 sps:$4 sm:$0xff]  }
  0x27   :  { %1630 = vmatpush1.bf16.msra.mxu0 %v2718_v38  ;;  %1794 = vmatpush1.bf16.msra.mxu1 %v2719_v39  ;;  %v2811_v38 = vld [vmem:[%s4017_s1 + $0x30c] ss:$16 sps:$4 sm:$0xff]   ;;  %v2806_v39 = vld [vmem:[%s4017_s1 + $0x300] ss:$16 sps:$4 sm:$0xff]  }
  0x28   :  { %1631 = vmatprep.subr.bf16.mxu0 %v2720_v40  ;;  %1795 = vmatprep.subr.bf16.mxu1 %v2722_v41  ;;  %v2809_v40 = vld [vmem:[%s4017_s1 + $0x308] ss:$16 sps:$4 sm:$0xff]   ;;  %v2814_v41 = vld [vmem:[%s4017_s1 + $0x324] ss:$16 sps:$4 sm:$0xff]  }
  0x2b   :  { %1632 = vmatpush1.bf16.msra.mxu0 %v2724_v42  ;;  %1796 = vmatpush1.bf16.msra.mxu1 %v2725_v43  ;;  %v2817_v42 = vld [vmem:[%s4017_s1 + $0x32c] ss:$16 sps:$4 sm:$0xff]   ;;  %v2812_v43 = vld [vmem:[%s4017_s1 + $0x320] ss:$16 sps:$4 sm:$0xff]  }
  0x2c   :  { %1633 = vmatprep.subr.bf16.mxu0 %v2726_v44  ;;  %1797 = vmatprep.subr.bf16.mxu1 %v2728_v45  ;;  %v2815_v44 = vld [vmem:[%s4017_s1 + $0x328] ss:$16 sps:$4 sm:$0xff]   ;;  %v2820_v45 = vld [vmem:[%s4017_s1 + $0x344] ss:$16 sps:$4 sm:$0xff]  }
  0x2f   :  { %1634 = vmatpush1.bf16.msra.mxu0 %v2730_v47  ;;  %1798 = vmatpush1.bf16.msra.mxu1 %v2731_v49  ;;  %v2818_v47 = vld [vmem:[%s4017_s1 + $0x340] ss:$16 sps:$4 sm:$0xff]   ;;  %v2826_v49 = vld [vmem:[%s4017_s1 + $0x364] ss:$16 sps:$4 sm:$0xff]  }
  0x30   :  { %1635 = vmatprep.subr.bf16.mxu0 %v2732_v50  ;;  %1799 = vmatprep.subr.bf16.mxu1 %v2734_v51  ;;  %v2829_v50 = vld [vmem:[%s4017_s1 + $0x36c] ss:$16 sps:$4 sm:$0xff]   ;;  %v2824_v51 = vld [vmem:[%s4017_s1 + $0x360] ss:$16 sps:$4 sm:$0xff]  }
  0x33   :  { %1636 = vmatpush1.bf16.msra.mxu0 %v2736_v52  ;;  %1800 = vmatpush1.bf16.msra.mxu1 %v2737_v53  ;;  %v2827_v52 = vld [vmem:[%s4017_s1 + $0x368] ss:$16 sps:$4 sm:$0xff]   ;;  %v2832_v53 = vld [vmem:[%s4017_s1 + $0x384] ss:$16 sps:$4 sm:$0xff]  }
  0x34   :  { %1637 = vmatprep.subr.bf16.mxu0 %v2738_v54  ;;  %1801 = vmatprep.subr.bf16.mxu1 %v2740_v55  ;;  %v2835_v54 = vld [vmem:[%s4017_s1 + $0x38c] ss:$16 sps:$4 sm:$0xff]   ;;  %v2830_v55 = vld [vmem:[%s4017_s1 + $0x380] ss:$16 sps:$4 sm:$0xff]  }
  0x37   :  { %1638 = vmatpush1.bf16.msra.mxu0 %v2742_v56  ;;  %1802 = vmatpush1.bf16.msra.mxu1 %v2743_v57  ;;  %v2833_v56 = vld [vmem:[%s4017_s1 + $0x388] ss:$16 sps:$4 sm:$0xff]   ;;  %v2838_v57 = vld [vmem:[%s4017_s1 + $0x3a4] ss:$16 sps:$4 sm:$0xff]  }
  0x38   :  { %1639 = vmatprep.subr.bf16.mxu0 %v2744_v58  ;;  %1803 = vmatprep.subr.bf16.mxu1 %v2746_v59  ;;  %v2841_v58 = vld [vmem:[%s4017_s1 + $0x3ac] ss:$16 sps:$4 sm:$0xff]   ;;  %v2836_v59 = vld [vmem:[%s4017_s1 + $0x3a0] ss:$16 sps:$4 sm:$0xff]  }
  0x3b   :  { %1640 = vmatpush1.bf16.msra.mxu0 %v2748_v60  ;;  %1804 = vmatpush1.bf16.msra.mxu1 %v2749_v61  ;;  %v2839_v60 = vld [vmem:[%s4017_s1 + $0x3a8] ss:$16 sps:$4 sm:$0xff]   ;;  %v2844_v61 = vld [vmem:[%s4017_s1 + $0x3c4] ss:$16 sps:$4 sm:$0xff]  }
  0x3c   :  { %1641 = vmatprep.subr.bf16.mxu0 %v2750_v62  ;;  %1805 = vmatprep.subr.bf16.mxu1 %v2752_v63  ;;  %v2847_v62 = vld [vmem:[%s4017_s1 + $0x3cc] ss:$16 sps:$4 sm:$0xff]   ;;  %v2842_v63 = vld [vmem:[%s4017_s1 + $0x3c0] ss:$16 sps:$4 sm:$0xff]  }
  0x3f   :  { %1642 = vmatpush1.bf16.msra.mxu0 %v2754_v0  ;;  %1806 = vmatpush1.bf16.msra.mxu1 %v2755_v1  ;;  %v2845_v0 = vld [vmem:[%s4017_s1 + $0x3c8] ss:$16 sps:$4 sm:$0xff]   ;;  %v2850_v1 = vld [vmem:[%s4017_s1 + $0x3e4] ss:$16 sps:$4 sm:$0xff]  }
  0x40   :  { %1652 = vmatprep.subr.bf16.mxu0 %v2760_v2  ;;  %1816 = vmatprep.subr.bf16.mxu1 %v2763_v3  ;;  %v2853_v2 = vld [vmem:[%s4017_s1 + $0x3ec] ss:$16 sps:$4 sm:$0xff]   ;;  %v2848_v3 = vld [vmem:[%s4017_s1 + $0x3e0] ss:$16 sps:$4 sm:$0xff]  }
  0x42   :  { %1644 = vmatmul.mubr.bf16.vlgmr.msra.gmra.mrb[0].mxu0 %v2291_v4  ;;  %1808 = vmatmul.mubr.bf16.vlgmr.msra.gmra.mrb[0].mxu1 %v2291_v4  ;;  %v2851_v4 = vld [vmem:[%s4017_s1 + $0x3e8] ss:$16 sps:$4 sm:$0xff]  }
  0x43   :  { %1653 = vmatpush1.bf16.msra.mxu0 %v2758_v5  ;;  %1817 = vmatpush1.bf16.msra.mxu1 %v2761_v6  ;;  %v2858_v5 = vld [vmem:[%s4017_s1 + $0x404] ss:$16 sps:$4 sm:$0xff]   ;;  %v2861_v6 = vld [vmem:[%s4017_s1 + $0x40c] ss:$16 sps:$4 sm:$0xff]  }
  0x44   :  { %1654 = vmatprep.subr.bf16.mxu0 %v2766_v7  ;;  %1818 = vmatprep.subr.bf16.mxu1 %v2769_v8  ;;  %v2293_v7 = vcombine.low %v3390_v29, %v3390_v29  ;;  %v2856_v8 = vld [vmem:[%s4017_s1 + $0x400] ss:$16 sps:$4 sm:$0xff]   ;;  %v2891_v29 = vld [vmem:[%s4017_s1 + $0x4ac] ss:$16 sps:$4 sm:$0xff]  }
  0x45   :  { %1684 = vmatprep.mubr.bf16.mxu0 %v2294_v30  ;;  %1848 = vmatprep.mubr.bf16.mxu1 %v2294_v30  ;;  %v2886_v30 = vld [vmem:[%s4017_s1 + $0x4a0] ss:$16 sps:$4 sm:$0xff]  }
  0x47   :  { %1655 = vmatpush1.bf16.msra.mxu0 %v2764_v9  ;;  %1819 = vmatpush1.bf16.msra.mxu1 %v2767_v10  ;;  %v2859_v9 = vld [vmem:[%s4017_s1 + $0x408] ss:$16 sps:$4 sm:$0xff]   ;;  %v2864_v10 = vld [vmem:[%s4017_s1 + $0x424] ss:$16 sps:$4 sm:$0xff]  }
  0x48   :  { %1656 = vmatprep.subr.bf16.mxu0 %v2772_v11  ;;  %1820 = vmatprep.subr.bf16.mxu1 %v2775_v12  ;;  %v3528_v11 = vld [vmem:[%s4018_s0 + $0x10] sm:$0xff]  ;;  %v2867_v12 = vld [vmem:[%s4017_s1 + $0x42c] ss:$16 sps:$4 sm:$0xff]  }
  0x4b   :  { %1657 = vmatpush1.bf16.msra.mxu0 %v2770_v13  ;;  %1821 = vmatpush1.bf16.msra.mxu1 %v2773_v14  ;;  %v2296_v13 = vcombine.high %v3528_v11, %v3528_v11  ;;  %v2862_v14 = vld [vmem:[%s4017_s1 + $0x420] ss:$16 sps:$4 sm:$0xff]  }
  0x4c   :  { %1658 = vmatprep.subr.bf16.mxu0 %v2778_v15  ;;  %1822 = vmatprep.subr.bf16.mxu1 %v2781_v16  ;;  %v2865_v15 = vld [vmem:[%s4017_s1 + $0x428] ss:$16 sps:$4 sm:$0xff]   ;;  %v2870_v16 = vld [vmem:[%s4017_s1 + $0x444] ss:$16 sps:$4 sm:$0xff]  }
  0x4f   :  { %1659 = vmatpush1.bf16.msra.mxu0 %v2776_v17  ;;  %1823 = vmatpush1.bf16.msra.mxu1 %v2779_v18  ;;  %v2873_v17 = vld [vmem:[%s4017_s1 + $0x44c] ss:$16 sps:$4 sm:$0xff]   ;;  %v2868_v18 = vld [vmem:[%s4017_s1 + $0x440] ss:$16 sps:$4 sm:$0xff]  }
  0x50   :  { %1660 = vmatprep.subr.bf16.mxu0 %v2784_v19  ;;  %1824 = vmatprep.subr.bf16.mxu1 %v2787_v20  ;;  %v2871_v19 = vld [vmem:[%s4017_s1 + $0x448] ss:$16 sps:$4 sm:$0xff]   ;;  %v2876_v20 = vld [vmem:[%s4017_s1 + $0x464] ss:$16 sps:$4 sm:$0xff]  }
  0x53   :  { %1661 = vmatpush1.bf16.msra.mxu0 %v2782_v21  ;;  %1825 = vmatpush1.bf16.msra.mxu1 %v2785_v22  ;;  %v2879_v21 = vld [vmem:[%s4017_s1 + $0x46c] ss:$16 sps:$4 sm:$0xff]   ;;  %v2874_v22 = vld [vmem:[%s4017_s1 + $0x460] ss:$16 sps:$4 sm:$0xff]  }
  0x54   :  { %1662 = vmatprep.subr.bf16.mxu0 %v2790_v23  ;;  %1826 = vmatprep.subr.bf16.mxu1 %v2793_v24  ;;  %v2877_v23 = vld [vmem:[%s4017_s1 + $0x468] ss:$16 sps:$4 sm:$0xff]   ;;  %v2882_v24 = vld [vmem:[%s4017_s1 + $0x484] ss:$16 sps:$4 sm:$0xff]  }
  0x57   :  { %1663 = vmatpush1.bf16.msra.mxu0 %v2788_v25  ;;  %1827 = vmatpush1.bf16.msra.mxu1 %v2791_v26  ;;  %v2885_v25 = vld [vmem:[%s4017_s1 + $0x48c] ss:$16 sps:$4 sm:$0xff]   ;;  %v2880_v26 = vld [vmem:[%s4017_s1 + $0x480] ss:$16 sps:$4 sm:$0xff]  }
  0x58   :  { %1664 = vmatprep.subr.bf16.mxu0 %v2796_v27  ;;  %1828 = vmatprep.subr.bf16.mxu1 %v2799_v28  ;;  %v2883_v27 = vld [vmem:[%s4017_s1 + $0x488] ss:$16 sps:$4 sm:$0xff]   ;;  %v2888_v28 = vld [vmem:[%s4017_s1 + $0x4a4] ss:$16 sps:$4 sm:$0xff]  }
  0x5b   :  { %1665 = vmatpush1.bf16.msra.mxu0 %v2794_v31  ;;  %1829 = vmatpush1.bf16.msra.mxu1 %v2797_v32  ;;  %v2889_v31 = vld [vmem:[%s4017_s1 + $0x4a8] ss:$16 sps:$4 sm:$0xff]   ;;  %v2894_v32 = vld [vmem:[%s4017_s1 + $0x4c4] ss:$16 sps:$4 sm:$0xff]  }
  0x5c   :  { %1666 = vmatprep.subr.bf16.mxu0 %v2802_v33  ;;  %1830 = vmatprep.subr.bf16.mxu1 %v2805_v34  ;;  %v2897_v33 = vld [vmem:[%s4017_s1 + $0x4cc] ss:$16 sps:$4 sm:$0xff]   ;;  %v2892_v34 = vld [vmem:[%s4017_s1 + $0x4c0] ss:$16 sps:$4 sm:$0xff]  }
  0x5f   :  { %1667 = vmatpush1.bf16.msra.mxu0 %v2800_v35  ;;  %1831 = vmatpush1.bf16.msra.mxu1 %v2803_v36  ;;  %v2895_v35 = vld [vmem:[%s4017_s1 + $0x4c8] ss:$16 sps:$4 sm:$0xff]   ;;  %v2900_v36 = vld [vmem:[%s4017_s1 + $0x4e4] ss:$16 sps:$4 sm:$0xff]  }
  0x60   :  { %1668 = vmatprep.subr.bf16.mxu0 %v2808_v37  ;;  %1832 = vmatprep.subr.bf16.mxu1 %v2811_v38  ;;  %v2903_v37 = vld [vmem:[%s4017_s1 + $0x4ec] ss:$16 sps:$4 sm:$0xff]   ;;  %v2898_v38 = vld [vmem:[%s4017_s1 + $0x4e0] ss:$16 sps:$4 sm:$0xff]  }
  0x63   :  { %1669 = vmatpush1.bf16.msra.mxu0 %v2806_v39  ;;  %1833 = vmatpush1.bf16.msra.mxu1 %v2809_v40  ;;  %v2901_v39 = vld [vmem:[%s4017_s1 + $0x4e8] ss:$16 sps:$4 sm:$0xff]   ;;  %v2906_v40 = vld [vmem:[%s4017_s1 + $0x504] ss:$16 sps:$4 sm:$0xff]  }
  0x64   :  { %1670 = vmatprep.subr.bf16.mxu0 %v2814_v41  ;;  %1834 = vmatprep.subr.bf16.mxu1 %v2817_v42  ;;  %v2909_v41 = vld [vmem:[%s4017_s1 + $0x50c] ss:$16 sps:$4 sm:$0xff]   ;;  %v2904_v42 = vld [vmem:[%s4017_s1 + $0x500] ss:$16 sps:$4 sm:$0xff]  }
  0x67   :  { %1671 = vmatpush1.bf16.msra.mxu0 %v2812_v43  ;;  %1835 = vmatpush1.bf16.msra.mxu1 %v2815_v44  ;;  %v2907_v43 = vld [vmem:[%s4017_s1 + $0x508] ss:$16 sps:$4 sm:$0xff]   ;;  %v2912_v44 = vld [vmem:[%s4017_s1 + $0x524] ss:$16 sps:$4 sm:$0xff]  }
  0x68   :  { %1672 = vmatprep.subr.bf16.mxu0 %v2820_v45  ;;  %1836 = vmatprep.subr.bf16.mxu1 %v2823_v46  ;;  %v2915_v45 = vld [vmem:[%s4017_s1 + $0x52c] ss:$16 sps:$4 sm:$0xff]   ;;  %v2910_v46 = vld [vmem:[%s4017_s1 + $0x520] ss:$16 sps:$4 sm:$0xff]  }
  0x6b   :  { %1673 = vmatpush1.bf16.msra.mxu0 %v2818_v47  ;;  %1837 = vmatpush1.bf16.msra.mxu1 %v2821_v48  ;;  %v2913_v47 = vld [vmem:[%s4017_s1 + $0x528] ss:$16 sps:$4 sm:$0xff]   ;;  %v2918_v48 = vld [vmem:[%s4017_s1 + $0x544] ss:$16 sps:$4 sm:$0xff]  }
  0x6c   :  { %1674 = vmatprep.subr.bf16.mxu0 %v2826_v49  ;;  %1838 = vmatprep.subr.bf16.mxu1 %v2829_v50  ;;  %v2921_v49 = vld [vmem:[%s4017_s1 + $0x54c] ss:$16 sps:$4 sm:$0xff]   ;;  %v2916_v50 = vld [vmem:[%s4017_s1 + $0x540] ss:$16 sps:$4 sm:$0xff]  }
  0x6f   :  { %1675 = vmatpush1.bf16.msra.mxu0 %v2824_v51  ;;  %1839 = vmatpush1.bf16.msra.mxu1 %v2827_v52  ;;  %v2919_v51 = vld [vmem:[%s4017_s1 + $0x548] ss:$16 sps:$4 sm:$0xff]   ;;  %v2924_v52 = vld [vmem:[%s4017_s1 + $0x564] ss:$16 sps:$4 sm:$0xff]  }
  0x70   :  { %1676 = vmatprep.subr.bf16.mxu0 %v2832_v53  ;;  %1840 = vmatprep.subr.bf16.mxu1 %v2835_v54  ;;  %v2927_v53 = vld [vmem:[%s4017_s1 + $0x56c] ss:$16 sps:$4 sm:$0xff]   ;;  %v2922_v54 = vld [vmem:[%s4017_s1 + $0x560] ss:$16 sps:$4 sm:$0xff]  }
  0x73   :  { %1677 = vmatpush1.bf16.msra.mxu0 %v2830_v55  ;;  %1841 = vmatpush1.bf16.msra.mxu1 %v2833_v56  ;;  %v2925_v55 = vld [vmem:[%s4017_s1 + $0x568] ss:$16 sps:$4 sm:$0xff]   ;;  %v2930_v56 = vld [vmem:[%s4017_s1 + $0x584] ss:$16 sps:$4 sm:$0xff]  }
  0x74   :  { %1678 = vmatprep.subr.bf16.mxu0 %v2838_v57  ;;  %1842 = vmatprep.subr.bf16.mxu1 %v2841_v58  ;;  %v2933_v57 = vld [vmem:[%s4017_s1 + $0x58c] ss:$16 sps:$4 sm:$0xff]   ;;  %v2928_v58 = vld [vmem:[%s4017_s1 + $0x580] ss:$16 sps:$4 sm:$0xff]  }
  0x77   :  { %1679 = vmatpush1.bf16.msra.mxu0 %v2836_v59  ;;  %1843 = vmatpush1.bf16.msra.mxu1 %v2839_v60  ;;  %v2931_v59 = vld [vmem:[%s4017_s1 + $0x588] ss:$16 sps:$4 sm:$0xff]   ;;  %v2936_v60 = vld [vmem:[%s4017_s1 + $0x5a4] ss:$16 sps:$4 sm:$0xff]  }
  0x78   :  { %1680 = vmatprep.subr.bf16.mxu0 %v2844_v61  ;;  %1844 = vmatprep.subr.bf16.mxu1 %v2847_v62  ;;  %v2939_v61 = vld [vmem:[%s4017_s1 + $0x5ac] ss:$16 sps:$4 sm:$0xff]   ;;  %v2934_v62 = vld [vmem:[%s4017_s1 + $0x5a0] ss:$16 sps:$4 sm:$0xff]  }
  0x7b   :  { %1681 = vmatpush1.bf16.msra.mxu0 %v2842_v63  ;;  %1845 = vmatpush1.bf16.msra.mxu1 %v2845_v0  ;;  %v2937_v63 = vld [vmem:[%s4017_s1 + $0x5a8] ss:$16 sps:$4 sm:$0xff]   ;;  %v2942_v0 = vld [vmem:[%s4017_s1 + $0x5c4] ss:$16 sps:$4 sm:$0xff]  }
  0x7c   :  { %1682 = vmatprep.subr.bf16.mxu0 %v2850_v1  ;;  %1846 = vmatprep.subr.bf16.mxu1 %v2853_v2  ;;  %v2945_v1 = vld [vmem:[%s4017_s1 + $0x5cc] ss:$16 sps:$4 sm:$0xff]   ;;  %v2940_v2 = vld [vmem:[%s4017_s1 + $0x5c0] ss:$16 sps:$4 sm:$0xff]  }
  0x7f   :  { %1683 = vmatpush1.bf16.msra.mxu0 %v2848_v3  ;;  %1847 = vmatpush1.bf16.msra.mxu1 %v2851_v4  ;;  %v2943_v3 = vld [vmem:[%s4017_s1 + $0x5c8] ss:$16 sps:$4 sm:$0xff]   ;;  %v2948_v4 = vld [vmem:[%s4017_s1 + $0x5e4] ss:$16 sps:$4 sm:$0xff]  }
  0x80   :  { %1693 = vmatprep.subr.bf16.mxu0 %v2858_v5  ;;  %1857 = vmatprep.subr.bf16.mxu1 %v2861_v6  ;;  %v2951_v5 = vld [vmem:[%s4017_s1 + $0x5ec] ss:$16 sps:$4 sm:$0xff]   ;;  %v2946_v6 = vld [vmem:[%s4017_s1 + $0x5e0] ss:$16 sps:$4 sm:$0xff]  }
  0x82   :  { %1685 = vmatmul.mubr.bf16.vlgmr.msra.gmra.mrb[0].mxu0 %v2293_v7  ;;  %1849 = vmatmul.mubr.bf16.vlgmr.msra.gmra.mrb[0].mxu1 %v2293_v7  ;;  %v2949_v7 = vld [vmem:[%s4017_s1 + $0x5e8] ss:$16 sps:$4 sm:$0xff]  }
  0x83   :  { %1694 = vmatpush1.bf16.msra.mxu0 %v2856_v8  ;;  %1858 = vmatpush1.bf16.msra.mxu1 %v2859_v9  ;;  %v2956_v8 = vld [vmem:[%s4017_s1 + $0x604] ss:$16 sps:$4 sm:$0xff]   ;;  %v2959_v9 = vld [vmem:[%s4017_s1 + $0x60c] ss:$16 sps:$4 sm:$0xff]  }
  0x84   :  { %1695 = vmatprep.subr.bf16.mxu0 %v2864_v10  ;;  %1859 = vmatprep.subr.bf16.mxu1 %v2867_v12  ;;  %v2954_v10 = vld [vmem:[%s4017_s1 + $0x600] ss:$16 sps:$4 sm:$0xff]   ;;  %v2957_v12 = vld [vmem:[%s4017_s1 + $0x608] ss:$16 sps:$4 sm:$0xff]  }
  0x85   :  { %1725 = vmatprep.mubr.bf16.mxu0 %v2296_v13  ;;  %1889 = vmatprep.mubr.bf16.mxu1 %v2296_v13  ;;  %v2295_v13 = vcombine.low %v3528_v11, %v3528_v11  ;;  %v2960_v11 = vld [vmem:[%s4017_s1 + $0x620] ss:$16 sps:$4 sm:$0xff]  }
  0x87   :  { %1696 = vmatpush1.bf16.msra.mxu0 %v2862_v14  ;;  %1860 = vmatpush1.bf16.msra.mxu1 %v2865_v15  ;;  %v3726_v14 = vld [vmem:[%s4018_s0 + $0x18] sm:$0xff]  ;;  %v2962_v15 = vld [vmem:[%s4017_s1 + $0x624] ss:$16 sps:$4 sm:$0xff]  }
  0x88   :  { %1697 = vmatprep.subr.bf16.mxu0 %v2870_v16  ;;  %1861 = vmatprep.subr.bf16.mxu1 %v2873_v17  ;;  %v2965_v16 = vld [vmem:[%s4017_s1 + $0x62c] ss:$16 sps:$4 sm:$0xff]   ;;  %v2298_v17 = vcombine.high %v3726_v14, %v3726_v14 }
  0x8b   :  { %1698 = vmatpush1.bf16.msra.mxu0 %v2868_v18  ;;  %1862 = vmatpush1.bf16.msra.mxu1 %v2871_v19  ;;  %v2963_v18 = vld [vmem:[%s4017_s1 + $0x628] ss:$16 sps:$4 sm:$0xff]   ;;  %v2968_v19 = vld [vmem:[%s4017_s1 + $0x644] ss:$16 sps:$4 sm:$0xff]  }
  0x8c   :  { %1699 = vmatprep.subr.bf16.mxu0 %v2876_v20  ;;  %1863 = vmatprep.subr.bf16.mxu1 %v2879_v21  ;;  %v2971_v20 = vld [vmem:[%s4017_s1 + $0x64c] ss:$16 sps:$4 sm:$0xff]   ;;  %v2966_v21 = vld [vmem:[%s4017_s1 + $0x640] ss:$16 sps:$4 sm:$0xff]  }
  0x8f   :  { %1700 = vmatpush1.bf16.msra.mxu0 %v2874_v22  ;;  %1864 = vmatpush1.bf16.msra.mxu1 %v2877_v23  ;;  %v2969_v22 = vld [vmem:[%s4017_s1 + $0x648] ss:$16 sps:$4 sm:$0xff]   ;;  %v2974_v23 = vld [vmem:[%s4017_s1 + $0x664] ss:$16 sps:$4 sm:$0xff]  }
  0x90   :  { %1701 = vmatprep.subr.bf16.mxu0 %v2882_v24  ;;  %1865 = vmatprep.subr.bf16.mxu1 %v2885_v25  ;;  %v2977_v24 = vld [vmem:[%s4017_s1 + $0x66c] ss:$16 sps:$4 sm:$0xff]   ;;  %v2972_v25 = vld [vmem:[%s4017_s1 + $0x660] ss:$16 sps:$4 sm:$0xff]  }
  0x93   :  { %1702 = vmatpush1.bf16.msra.mxu0 %v2880_v26  ;;  %1866 = vmatpush1.bf16.msra.mxu1 %v2883_v27  ;;  %v2975_v26 = vld [vmem:[%s4017_s1 + $0x668] ss:$16 sps:$4 sm:$0xff]   ;;  %v2980_v27 = vld [vmem:[%s4017_s1 + $0x684] ss:$16 sps:$4 sm:$0xff]  }
  0x94   :  { %1703 = vmatprep.subr.bf16.mxu0 %v2888_v28  ;;  %1867 = vmatprep.subr.bf16.mxu1 %v2891_v29  ;;  %v2983_v28 = vld [vmem:[%s4017_s1 + $0x68c] ss:$16 sps:$4 sm:$0xff]   ;;  %v2978_v29 = vld [vmem:[%s4017_s1 + $0x680] ss:$16 sps:$4 sm:$0xff]  }
  0x97   :  { %1704 = vmatpush1.bf16.msra.mxu0 %v2886_v30  ;;  %1868 = vmatpush1.bf16.msra.mxu1 %v2889_v31  ;;  %v2981_v30 = vld [vmem:[%s4017_s1 + $0x688] ss:$16 sps:$4 sm:$0xff]   ;;  %v2986_v31 = vld [vmem:[%s4017_s1 + $0x6a4] ss:$16 sps:$4 sm:$0xff]  }
  0x98   :  { %1705 = vmatprep.subr.bf16.mxu0 %v2894_v32  ;;  %1869 = vmatprep.subr.bf16.mxu1 %v2897_v33  ;;  %v2989_v32 = vld [vmem:[%s4017_s1 + $0x6ac] ss:$16 sps:$4 sm:$0xff]   ;;  %v2984_v33 = vld [vmem:[%s4017_s1 + $0x6a0] ss:$16 sps:$4 sm:$0xff]  }
  0x9b   :  { %1706 = vmatpush1.bf16.msra.mxu0 %v2892_v34  ;;  %1870 = vmatpush1.bf16.msra.mxu1 %v2895_v35  ;;  %v2987_v34 = vld [vmem:[%s4017_s1 + $0x6a8] ss:$16 sps:$4 sm:$0xff]   ;;  %v2992_v35 = vld [vmem:[%s4017_s1 + $0x6c4] ss:$16 sps:$4 sm:$0xff]  }
  0x9c   :  { %1707 = vmatprep.subr.bf16.mxu0 %v2900_v36  ;;  %1871 = vmatprep.subr.bf16.mxu1 %v2903_v37  ;;  %v2995_v36 = vld [vmem:[%s4017_s1 + $0x6cc] ss:$16 sps:$4 sm:$0xff]   ;;  %v2990_v37 = vld [vmem:[%s4017_s1 + $0x6c0] ss:$16 sps:$4 sm:$0xff]  }
  0x9f   :  { %1708 = vmatpush1.bf16.msra.mxu0 %v2898_v38  ;;  %1872 = vmatpush1.bf16.msra.mxu1 %v2901_v39  ;;  %v2993_v38 = vld [vmem:[%s4017_s1 + $0x6c8] ss:$16 sps:$4 sm:$0xff]   ;;  %v2998_v39 = vld [vmem:[%s4017_s1 + $0x6e4] ss:$16 sps:$4 sm:$0xff]  }
  0xa0   :  { %1709 = vmatprep.subr.bf16.mxu0 %v2906_v40  ;;  %1873 = vmatprep.subr.bf16.mxu1 %v2909_v41  ;;  %v3001_v40 = vld [vmem:[%s4017_s1 + $0x6ec] ss:$16 sps:$4 sm:$0xff]   ;;  %v2996_v41 = vld [vmem:[%s4017_s1 + $0x6e0] ss:$16 sps:$4 sm:$0xff]  }
  0xa3   :  { %1710 = vmatpush1.bf16.msra.mxu0 %v2904_v42  ;;  %1874 = vmatpush1.bf16.msra.mxu1 %v2907_v43  ;;  %v2999_v42 = vld [vmem:[%s4017_s1 + $0x6e8] ss:$16 sps:$4 sm:$0xff]   ;;  %v3004_v43 = vld [vmem:[%s4017_s1 + $0x704] ss:$16 sps:$4 sm:$0xff]  }
  0xa4   :  { %1711 = vmatprep.subr.bf16.mxu0 %v2912_v44  ;;  %1875 = vmatprep.subr.bf16.mxu1 %v2915_v45  ;;  %v3007_v44 = vld [vmem:[%s4017_s1 + $0x70c] ss:$16 sps:$4 sm:$0xff]   ;;  %v3002_v45 = vld [vmem:[%s4017_s1 + $0x700] ss:$16 sps:$4 sm:$0xff]  }
  0xa7   :  { %1712 = vmatpush1.bf16.msra.mxu0 %v2910_v46  ;;  %1876 = vmatpush1.bf16.msra.mxu1 %v2913_v47  ;;  %v3005_v46 = vld [vmem:[%s4017_s1 + $0x708] ss:$16 sps:$4 sm:$0xff]   ;;  %v3010_v47 = vld [vmem:[%s4017_s1 + $0x724] ss:$16 sps:$4 sm:$0xff]  }
  0xa8   :  { %1713 = vmatprep.subr.bf16.mxu0 %v2918_v48  ;;  %1877 = vmatprep.subr.bf16.mxu1 %v2921_v49  ;;  %v3013_v48 = vld [vmem:[%s4017_s1 + $0x72c] ss:$16 sps:$4 sm:$0xff]   ;;  %v3008_v49 = vld [vmem:[%s4017_s1 + $0x720] ss:$16 sps:$4 sm:$0xff]  }
  0xab   :  { %1714 = vmatpush1.bf16.msra.mxu0 %v2916_v50  ;;  %1878 = vmatpush1.bf16.msra.mxu1 %v2919_v51  ;;  %v3011_v50 = vld [vmem:[%s4017_s1 + $0x728] ss:$16 sps:$4 sm:$0xff]   ;;  %v3016_v51 = vld [vmem:[%s4017_s1 + $0x744] ss:$16 sps:$4 sm:$0xff]  }
  0xac   :  { %1715 = vmatprep.subr.bf16.mxu0 %v2924_v52  ;;  %1879 = vmatprep.subr.bf16.mxu1 %v2927_v53  ;;  %v3019_v52 = vld [vmem:[%s4017_s1 + $0x74c] ss:$16 sps:$4 sm:$0xff]   ;;  %v3014_v53 = vld [vmem:[%s4017_s1 + $0x740] ss:$16 sps:$4 sm:$0xff]  }
  0xaf   :  { %1716 = vmatpush1.bf16.msra.mxu0 %v2922_v54  ;;  %1880 = vmatpush1.bf16.msra.mxu1 %v2925_v55  ;;  %v3017_v54 = vld [vmem:[%s4017_s1 + $0x748] ss:$16 sps:$4 sm:$0xff]   ;;  %v3022_v55 = vld [vmem:[%s4017_s1 + $0x764] ss:$16 sps:$4 sm:$0xff]  }
  0xb0   :  { %1717 = vmatprep.subr.bf16.mxu0 %v2930_v56  ;;  %1881 = vmatprep.subr.bf16.mxu1 %v2933_v57  ;;  %v3025_v56 = vld [vmem:[%s4017_s1 + $0x76c] ss:$16 sps:$4 sm:$0xff]   ;;  %v3020_v57 = vld [vmem:[%s4017_s1 + $0x760] ss:$16 sps:$4 sm:$0xff]  }
  0xb3   :  { %1718 = vmatpush1.bf16.msra.mxu0 %v2928_v58  ;;  %1882 = vmatpush1.bf16.msra.mxu1 %v2931_v59  ;;  %v3023_v58 = vld [vmem:[%s4017_s1 + $0x768] ss:$16 sps:$4 sm:$0xff]   ;;  %v3028_v59 = vld [vmem:[%s4017_s1 + $0x784] ss:$16 sps:$4 sm:$0xff]  }
  0xb4   :  { %1719 = vmatprep.subr.bf16.mxu0 %v2936_v60  ;;  %1883 = vmatprep.subr.bf16.mxu1 %v2939_v61  ;;  %v3031_v60 = vld [vmem:[%s4017_s1 + $0x78c] ss:$16 sps:$4 sm:$0xff]   ;;  %v3026_v61 = vld [vmem:[%s4017_s1 + $0x780] ss:$16 sps:$4 sm:$0xff]  }
  0xb7   :  { %1720 = vmatpush1.bf16.msra.mxu0 %v2934_v62  ;;  %1884 = vmatpush1.bf16.msra.mxu1 %v2937_v63  ;;  %v3029_v62 = vld [vmem:[%s4017_s1 + $0x788] ss:$16 sps:$4 sm:$0xff]   ;;  %v3034_v63 = vld [vmem:[%s4017_s1 + $0x7a4] ss:$16 sps:$4 sm:$0xff]  }
  0xb8   :  { %1721 = vmatprep.subr.bf16.mxu0 %v2942_v0  ;;  %1885 = vmatprep.subr.bf16.mxu1 %v2945_v1  ;;  %v3037_v0 = vld [vmem:[%s4017_s1 + $0x7ac] ss:$16 sps:$4 sm:$0xff]   ;;  %v3032_v1 = vld [vmem:[%s4017_s1 + $0x7a0] ss:$16 sps:$4 sm:$0xff]  }
  0xbb   :  { %1722 = vmatpush1.bf16.msra.mxu0 %v2940_v2  ;;  %1886 = vmatpush1.bf16.msra.mxu1 %v2943_v3  ;;  %v3035_v2 = vld [vmem:[%s4017_s1 + $0x7a8] ss:$16 sps:$4 sm:$0xff]   ;;  %v3040_v3 = vld [vmem:[%s4017_s1 + $0x7c4] ss:$16 sps:$4 sm:$0xff]  }
  0xbc   :  { %1723 = vmatprep.subr.bf16.mxu0 %v2948_v4  ;;  %1887 = vmatprep.subr.bf16.mxu1 %v2951_v5  ;;  %v3043_v4 = vld [vmem:[%s4017_s1 + $0x7cc] ss:$16 sps:$4 sm:$0xff]   ;;  %v3038_v5 = vld [vmem:[%s4017_s1 + $0x7c0] ss:$16 sps:$4 sm:$0xff]  }
  0xbf   :  { %1724 = vmatpush1.bf16.msra.mxu0 %v2946_v6  ;;  %1888 = vmatpush1.bf16.msra.mxu1 %v2949_v7  ;;  %v3041_v6 = vld [vmem:[%s4017_s1 + $0x7c8] ss:$16 sps:$4 sm:$0xff]   ;;  %v3046_v7 = vld [vmem:[%s4017_s1 + $0x7e4] ss:$16 sps:$4 sm:$0xff]  }
  0xc0   :  { %1734 = vmatprep.subr.bf16.mxu0 %v2956_v8  ;;  %1898 = vmatprep.subr.bf16.mxu1 %v2959_v9  ;;  %v3049_v8 = vld [vmem:[%s4017_s1 + $0x7ec] ss:$16 sps:$4 sm:$0xff]   ;;  %v3044_v9 = vld [vmem:[%s4017_s1 + $0x7e0] ss:$16 sps:$4 sm:$0xff]  }
  0xc2   :  { %1726 = vmatmul.mubr.bf16.vlgmr.msra.gmra.mrb[0].mxu0 %v2295_v13  ;;  %1890 = vmatmul.mubr.bf16.vlgmr.msra.gmra.mrb[0].mxu1 %v2295_v13  ;;  %v3053_v13 = vld [vmem:[%s4019_s3 + $0xc0] sm:$0xff]  }
  0xc3   :  { %1735 = vmatpush1.bf16.msra.mxu0 %v2954_v10  ;;  %1899 = vmatpush1.bf16.msra.mxu1 %v2957_v12  ;;  %v3047_v10 = vld [vmem:[%s4017_s1 + $0x7e8] ss:$16 sps:$4 sm:$0xff]   ;;  %v3052_v12 = vld [vmem:[%s4019_s3 + $0x40] sm:$0xff]  }
  0xc4   :  { %1736 = vmatprep.subr.bf16.mxu0 %v2962_v15  ;;  %1900 = vmatprep.subr.bf16.mxu1 %v2965_v16  ;;  %v2297_v15 = vcombine.low %v3726_v14, %v3726_v14  ;;  %v3054_v16 = vld [vmem:[%s4019_s3] sm:$0xff]   ;;  %v3057_v14 = vld [vmem:[%s4019_s3 + $0xc8] sm:$0xff]  }
  0xc5   :  { %1766 = vmatprep.mubr.bf16.mxu0 %v2298_v17  ;;  %1930 = vmatprep.mubr.bf16.mxu1 %v2298_v17  ;;  %v3056_v17 = vld [vmem:[%s4019_s3 + $0x48] sm:$0xff]  }
  0xc7   :  { %1737 = vmatpush1.bf16.msra.mxu0 %v2960_v11  ;;  %1901 = vmatpush1.bf16.msra.mxu1 %v2963_v18  ;;  %v3055_v11 = vld [vmem:[%s4019_s3 + $0x80] sm:$0xff]   ;;  %v3058_v18 = vld [vmem:[%s4019_s3 + $0x8] sm:$0xff]  }
  0xc8   :  { %1738 = vmatprep.subr.bf16.mxu0 %v2968_v19  ;;  %1902 = vmatprep.subr.bf16.mxu1 %v2971_v20  ;;  %v3059_v19 = vld [vmem:[%s4019_s3 + $0x88] sm:$0xff]   ;;  %v3060_v20 = vld [vmem:[%s4019_s3 + $0x50] sm:$0xff]  }
  0xcb   :  { %1739 = vmatpush1.bf16.msra.mxu0 %v2966_v21  ;;  %1903 = vmatpush1.bf16.msra.mxu1 %v2969_v22  ;;  %v3061_v21 = vld [vmem:[%s4019_s3 + $0xd0] sm:$0xff]  }
  0xcc   :  { %1740 = vmatprep.subr.bf16.mxu0 %v2974_v23  ;;  %1904 = vmatprep.subr.bf16.mxu1 %v2977_v24  ;;  %v3062_v22 = vld [vmem:[%s4019_s3 + $0x10] sm:$0xff]   ;;  %v3064_v24 = vld [vmem:[%s4019_s3 + $0x58] sm:$0xff]  }
  0xcd   :  { %v3063_v23 = vld [vmem:[%s4019_s3 + $0x90] sm:$0xff]  }
  0xcf   :  { %1741 = vmatpush1.bf16.msra.mxu0 %v2972_v25  ;;  %1905 = vmatpush1.bf16.msra.mxu1 %v2975_v26  ;;  %v3065_v25 = vld [vmem:[%s4019_s3 + $0xd8] sm:$0xff]  }
  0xd0   :  { %1742 = vmatprep.subr.bf16.mxu0 %v2980_v27  ;;  %1906 = vmatprep.subr.bf16.mxu1 %v2983_v28  ;;  %v3066_v26 = vld [vmem:[%s4019_s3 + $0x18] sm:$0xff]   ;;  %v3068_v28 = vld [vmem:[%s4019_s3 + $0x60] sm:$0xff]  }
  0xd1   :  { %v3067_v27 = vld [vmem:[%s4019_s3 + $0x98] sm:$0xff]  }
  0xd3   :  { %1743 = vmatpush1.bf16.msra.mxu0 %v2978_v29  ;;  %1907 = vmatpush1.bf16.msra.mxu1 %v2981_v30  ;;  %v3069_v29 = vld [vmem:[%s4019_s3 + $0xe0] sm:$0xff]  }
  0xd4   :  { %1744 = vmatprep.subr.bf16.mxu0 %v2986_v31  ;;  %1908 = vmatprep.subr.bf16.mxu1 %v2989_v32  ;;  %v3070_v30 = vld [vmem:[%s4019_s3 + $0x20] sm:$0xff]   ;;  %v3072_v32 = vld [vmem:[%s4019_s3 + $0x68] sm:$0xff]  }
  0xd5   :  { %v3071_v31 = vld [vmem:[%s4019_s3 + $0xa0] sm:$0xff]  }
  0xd7   :  { %1745 = vmatpush1.bf16.msra.mxu0 %v2984_v33  ;;  %1909 = vmatpush1.bf16.msra.mxu1 %v2987_v34  ;;  %v3073_v33 = vld [vmem:[%s4019_s3 + $0xe8] sm:$0xff]  }
  0xd8   :  { %1746 = vmatprep.subr.bf16.mxu0 %v2992_v35  ;;  %1910 = vmatprep.subr.bf16.mxu1 %v2995_v36  ;;  %v3074_v34 = vld [vmem:[%s4019_s3 + $0x28] sm:$0xff]   ;;  %v3076_v36 = vld [vmem:[%s4019_s3 + $0x70] sm:$0xff]  }
  0xd9   :  { %v3075_v35 = vld [vmem:[%s4019_s3 + $0xa8] sm:$0xff]  }
  0xdb   :  { %1747 = vmatpush1.bf16.msra.mxu0 %v2990_v37  ;;  %1911 = vmatpush1.bf16.msra.mxu1 %v2993_v38  ;;  %v3077_v37 = vld [vmem:[%s4019_s3 + $0xf0] sm:$0xff]  }
  0xdc   :  { %1748 = vmatprep.subr.bf16.mxu0 %v2998_v39  ;;  %1912 = vmatprep.subr.bf16.mxu1 %v3001_v40  ;;  %v3078_v38 = vld [vmem:[%s4019_s3 + $0x30] sm:$0xff]   ;;  %v3080_v40 = vld [vmem:[%s4019_s3 + $0x78] sm:$0xff]  }
  0xdd   :  { %v3079_v39 = vld [vmem:[%s4019_s3 + $0xb0] sm:$0xff]  }
  0xdf   :  { %1749 = vmatpush1.bf16.msra.mxu0 %v2996_v41  ;;  %1913 = vmatpush1.bf16.msra.mxu1 %v2999_v42  ;;  %v3081_v41 = vld [vmem:[%s4019_s3 + $0xf8] sm:$0xff]  }
  0xe0   :  { %1750 = vmatprep.subr.bf16.mxu0 %v3004_v43  ;;  %1914 = vmatprep.subr.bf16.mxu1 %v3007_v44  ;;  %v3082_v42 = vld [vmem:[%s4019_s3 + $0x38] sm:$0xff]   ;;  %v283_v44 = vlaneseq }
  0xe1   :  { %v3083_v43 = vld [vmem:[%s4019_s3 + $0xb8] sm:$0xff]  }
  0xe3   :  { %1751 = vmatpush1.bf16.msra.mxu0 %v3002_v45  ;;  %1915 = vmatpush1.bf16.msra.mxu1 %v3005_v46  ;;  %v284_v45 = vshrl.u32 %v283_v44, 7 }
  0xe4   :  { %1752 = vmatprep.subr.bf16.mxu0 %v3010_v47  ;;  %1916 = vmatprep.subr.bf16.mxu1 %v3013_v48  ;;  %v281_v48 = vld [vmem:[%s4020_s2] sm:$0xf] }
  0xe5   :  { %v285_v46 = vsub.s32 0, %v284_v45  ;;  %v293_v47 = vsub.s32 2, %v284_v45 }
  0xe7   :  { %1753 = vmatpush1.bf16.msra.mxu0 %v3008_v49  ;;  %1917 = vmatpush1.bf16.msra.mxu1 %v3011_v50  ;;  %v289_v49 = vsub.s32 1, %v284_v45  ;;  %v297_v50 = vsub.s32 3, %v284_v45 }
  0xe8   :  { %1754 = vmatprep.subr.bf16.mxu0 %v3016_v51  ;;  %1918 = vmatprep.subr.bf16.mxu1 %v3019_v52  ;;  %v286_v51 = vrot.slane %v281_v48, %v285_v46  ;;  %v294_v52 = vrot.slane %v281_v48, %v293_v47 }
  0xeb   :  { %1755 = vmatpush1.bf16.msra.mxu0 %v3014_v53  ;;  %1919 = vmatpush1.bf16.msra.mxu1 %v3017_v54  ;;  %v290_v53 = vrot.slane %v281_v48, %v289_v49  ;;  %v298_v54 = vrot.slane %v281_v48, %v297_v50 }
  0xec   :  { %1756 = vmatprep.subr.bf16.mxu0 %v3022_v55  ;;  %1920 = vmatprep.subr.bf16.mxu1 %v3025_v56 }
  0xef   :  { %1757 = vmatpush1.bf16.msra.mxu0 %v3020_v57  ;;  %1921 = vmatpush1.bf16.msra.mxu1 %v3023_v58 }
  0xf0   :  { %1758 = vmatprep.subr.bf16.mxu0 %v3028_v59  ;;  %1922 = vmatprep.subr.bf16.mxu1 %v3031_v60 }
  0xf3   :  { %1759 = vmatpush1.bf16.msra.mxu0 %v3026_v61  ;;  %1923 = vmatpush1.bf16.msra.mxu1 %v3029_v62 }
  0xf4   :  { %1760 = vmatprep.subr.bf16.mxu0 %v3034_v63  ;;  %1924 = vmatprep.subr.bf16.mxu1 %v3037_v0 }
  0xf7   :  { %1761 = vmatpush1.bf16.msra.mxu0 %v3032_v1  ;;  %1925 = vmatpush1.bf16.msra.mxu1 %v3035_v2 }
  0xf8   :  { %1762 = vmatprep.subr.bf16.mxu0 %v3040_v3  ;;  %1926 = vmatprep.subr.bf16.mxu1 %v3043_v4 }
  0xfb   :  { %1763 = vmatpush1.bf16.msra.mxu0 %v3038_v5  ;;  %1927 = vmatpush1.bf16.msra.mxu1 %v3041_v6 }
  0xfc   :  { %1764 = vmatprep.subr.bf16.mxu0 %v3046_v7  ;;  %1928 = vmatprep.subr.bf16.mxu1 %v3049_v8 }
  0xff   :  { %1765 = vmatpush1.bf16.msra.mxu0 %v3044_v9  ;;  %1929 = vmatpush1.bf16.msra.mxu1 %v3047_v10  ;;  %v2555_v9 = vld [vmem:[%s4021_s4] ss:$0 sm:$0xff] }
 0x100   :  { %2588 = vmatprep.subr.bf16.mxu0 %v3052_v12  ;;  %2610 = vmatprep.subr.bf16.mxu1 %v3053_v13 }
 0x102   :  { %1767 = vmatmul.mubr.bf16.vlgmr.msra.gmra.mrb[0].mxu0 %v2297_v15  ;;  %1931 = vmatmul.mubr.bf16.vlgmr.msra.gmra.mrb[0].mxu1 %v2297_v15 }
 0x103   :  { %2589 = vmatpush3.bf16.msra.mxu0 %v3054_v16  ;;  %2611 = vmatpush3.bf16.msra.mxu1 %v3055_v11 }
 0x104   :  { %2590 = vmatprep.subr.bf16.mxu0 %v3056_v17  ;;  %2612 = vmatprep.subr.bf16.mxu1 %v3057_v14 }
 0x107   :  { %2591 = vmatpush3.bf16.msra.mxu0 %v3058_v18  ;;  %2613 = vmatpush3.bf16.msra.mxu1 %v3059_v19 }
 0x108   :  { %2592 = vmatprep.subr.bf16.mxu0 %v3060_v20  ;;  %2614 = vmatprep.subr.bf16.mxu1 %v3061_v21 }
 0x10b   :  { %2593 = vmatpush3.bf16.msra.mxu0 %v3062_v22  ;;  %2615 = vmatpush3.bf16.msra.mxu1 %v3063_v23 }
 0x10c   :  { %2594 = vmatprep.subr.bf16.mxu0 %v3064_v24  ;;  %2616 = vmatprep.subr.bf16.mxu1 %v3065_v25 }
 0x10f   :  { %2595 = vmatpush3.bf16.msra.mxu0 %v3066_v26  ;;  %2617 = vmatpush3.bf16.msra.mxu1 %v3067_v27 }
 0x110   :  { %2596 = vmatprep.subr.bf16.mxu0 %v3068_v28  ;;  %2618 = vmatprep.subr.bf16.mxu1 %v3069_v29 }
 0x113   :  { %2597 = vmatpush3.bf16.msra.mxu0 %v3070_v30  ;;  %2619 = vmatpush3.bf16.msra.mxu1 %v3071_v31 }
 0x114   :  { %2598 = vmatprep.subr.bf16.mxu0 %v3072_v32  ;;  %2620 = vmatprep.subr.bf16.mxu1 %v3073_v33 }
 0x117   :  { %2599 = vmatpush3.bf16.msra.mxu0 %v3074_v34  ;;  %2621 = vmatpush3.bf16.msra.mxu1 %v3075_v35 }
 0x118   :  { %2600 = vmatprep.subr.bf16.mxu0 %v3076_v36  ;;  %2622 = vmatprep.subr.bf16.mxu1 %v3077_v37 }
 0x11b   :  { %2601 = vmatpush3.bf16.msra.mxu0 %v3078_v38  ;;  %2623 = vmatpush3.bf16.msra.mxu1 %v3079_v39 }
 0x11c   :  { %2602 = vmatprep.subr.bf16.mxu0 %v3080_v40  ;;  %2624 = vmatprep.subr.bf16.mxu1 %v3081_v41 }
 0x11f   :  { %2603 = vmatpush3.bf16.msra.mxu0 %v3082_v42  ;;  %2625 = vmatpush3.bf16.msra.mxu1 %v3083_v43 }
 0x1d5   :  { %v1768_v55 = vpop.f32.mrb[0].mxu0  ;;  %v1932_v56 = vpop.f32.mrb[0].mxu1 }
 0x1d6   :  { %v2632_v57 = vadd.f32 %v1768_v55, %v286_v51  ;;  %v2634_v58 = vadd.f32 %v1932_v56, %v294_v52  ;;  %v1770_v59 = vpop.f32.mrb[1].mxu0  ;;  %v1934_v60 = vpop.f32.mrb[1].mxu1 }
 0x1d7   :  { %v2633_v61 = vadd.f32 %v1770_v59, %v290_v53  ;;  %v2635_v62 = vadd.f32 %v1934_v60, %v298_v54  ;;  %v1772_v63 = vpop.f32.mrb[2].mxu0  ;;  %v1936_v0 = vpop.f32.mrb[2].mxu1 }
 0x1d8   :  { %v1773_v1 = vpop.f32.mrb[3].mxu0  ;;  %v1937_v2 = vpop.f32.mrb[3].mxu1  ;;  %v1939_v5 = vpack.c.bf16 %v2632_v57, %v2632_v57  ;;  %v1941_v6 = vpack.c.bf16 %v2634_v58, %v2634_v58 }
 0x1d9   :  { %v1940_v3 = vpack.c.bf16 %v2633_v61, %v2633_v61  ;;  %v1942_v4 = vpack.c.bf16 %v2635_v62, %v2635_v62 }
 0x1db   :  { %2238 = vmatprep.mubr.bf16.mxu0 %v1940_v3  ;;  %2278 = vmatprep.mubr.bf16.mxu1 %v1942_v4 }
 0x1dc   :  { %2239 = vmatmul.mubr.bf16.vlgmr.msra.gmra.mrb[4].mxu0 %v1939_v5  ;;  %2279 = vmatmul.mubr.bf16.vlgmr.msra.gmra.mrb[4].mxu1 %v1941_v6 }
 0x2af   :  { %v2604_v7 = vpop.f32.mrb[4].mxu0  ;;  %v2626_v8 = vpop.f32.mrb[4].mxu1 }
 0x2b0   :  { %v2605_v10 = vpop.f32.mrb[5].mxu0  ;;  %v2627_v12 = vpop.f32.mrb[5].mxu1 }
 0x2b1   :  { %v2606_v13 = vadd.f32 %v2605_v10, %v2604_v7  ;;  %v2628_v15 = vadd.f32 %v2627_v12, %v2626_v8  ;;  %v2607_v16 = vpop.f32.mrb[6].mxu0  ;;  %v2629_v11 = vpop.f32.mrb[6].mxu1 }
 0x2b2   :  { %v2608_v17 = vpop.f32.mrb[7].mxu0  ;;  %v2630_v14 = vpop.f32.mrb[7].mxu1 }
 0x2b3   :  { %v2241_v18 = vadd.f32 %v2606_v13, %v2555_v9 }
 0x2b5   :  { %v2281_v19 = vadd.f32 %v2628_v15, %v2241_v18 }
 0x2b7   :  { %2286 = vst [vmem:[%s4022_s5] sm:$0xff] %v2281_v19 }

</bundles_post_ra>
